<compile_context>
chip_gen: v7x
topology: tpu7x:2x2x1
jax: 0.10.0
libtpu: 0.0.40
codegen_flags: <defaults>
</compile_context>

<pallas_src>
import math

import jax
import jax.numpy as jnp
from jax import lax
from jax.experimental import pallas as pl
from jax.experimental.pallas import tpu as pltpu

DROPOUT_P = 0.1
_KEEP_SCALE = 1.0 / (1.0 - DROPOUT_P)
# drop iff (low 31 random bits) < threshold  =>  P(drop) ~= DROPOUT_P
_DROP_THRESHOLD = int(DROPOUT_P * 2147483648.0)

# splitmix32-style mixing constants expressed as int32 (two's complement).
_GOLDEN = -1640531527          # 0x9E3779B9
_MIX1 = 0x7FEB352D             # 2145916205
_MIX2 = -2073434485            # 0x846CA68B


def _mix32(x):
    """Avalanche hash on int32; logical right-shift emulated via mask."""
    x = x ^ ((x >> 16) & jnp.int32(0x0000FFFF))
    x = x * jnp.int32(_MIX1)
    x = x ^ ((x >> 15) & jnp.int32(0x0001FFFF))
    x = x * jnp.int32(_MIX2)
    x = x ^ ((x >> 16) & jnp.int32(0x0000FFFF))
    return x


def _dropout_keep_mask(seed, global_batch0, shape):
    """Counter-based keep mask: deterministic, backend independent."""
    _, m, n = shape
    b = lax.broadcasted_iota(jnp.int32, shape, 0) + global_batch0
    r = lax.broadcasted_iota(jnp.int32, shape, 1)
    c = lax.broadcasted_iota(jnp.int32, shape, 2)
    counter = (b * jnp.int32(m) + r) * jnp.int32(n) + c
    bits = _mix32(counter + seed * jnp.int32(_GOLDEN))
    r31 = bits & jnp.int32(0x7FFFFFFF)
    return r31 >= jnp.int32(_DROP_THRESHOLD)


def sdpa_kernel(seed_ref, x1_ref, x2_ref, o_ref):
    # seed_ref: SMEM int32[1] (scalar prefetch)
    # x1_ref: (Bt, M, M) f32   x2_ref: (Bt, N, M) f32   o_ref: (Bt, N, N) f32
    x1 = x1_ref[...].astype(jnp.bfloat16)   # bf16 MXU operands,
    x2 = x2_ref[...].astype(jnp.bfloat16)   # f32 accumulation below.

    # v1 = x1 @ x2^T (contract the feature dim) -> (Bt, M, N)
    scores = jnp.einsum("bmk,bnk->bmn", x1, x2,
                        preferred_element_type=jnp.float32)

    # softmax over last dim; the 1/sqrt(N) scale is folded into exp's argument
    # (max over unscaled scores is valid: scaling by a positive constant is
    # monotone).  Matches torch: scale = 1/sqrt(v1.size(-1)) = 1/sqrt(N).
    scale = 1.0 / math.sqrt(scores.shape[-1])
    m = jnp.max(scores, axis=-1, keepdims=True)
    e = jnp.exp((scores - m) * scale)
    denom = jnp.sum(e, axis=-1, keepdims=True)
    probs = e * pl.reciprocal(denom, approx=True)

    # dropout (F.dropout default training=True -> inverted scaling by 1/(1-p))
    bt = x1_ref.shape[0]
    keep = _dropout_keep_mask(seed_ref[0], pl.program_id(0) * bt, probs.shape)
    probs = jnp.where(keep, probs * jnp.float32(_KEEP_SCALE), 0.0)

    # out = x2 @ v4 : (Bt, N, M) @ (Bt, M, N) -> (Bt, N, N)
    out = jnp.einsum("bnm,bmq->bnq", x2, probs.astype(jnp.bfloat16),
                     preferred_element_type=jnp.float32)
    o_ref[...] = out.astype(o_ref.dtype)


def model_forward(x1, x2, seed=0, block_b=None):
    B, M, Mk = x1.shape
    assert M == Mk, "x1 must be (B, M, M) for both matmuls to be consistent"
    assert x2.ndim == 3 and x2.shape[0] == B and x2.shape[2] == M
    N = x2.shape[1]

    if block_b is None:
        # Amortize per-grid-step overhead: several batches per step, keeping
        # the per-step working set around ~1 MiB (well inside scoped VMEM
        # even double-buffered, on v5e/v6e/v7x alike).
        bytes_per_batch = 4 * (M * M + N * M + N * N)
        block_b = max(1, min(B, (1 * 1024 * 1024) // bytes_per_batch))
        while B % block_b != 0:
            block_b -= 1
    assert B % block_b == 0

    grid = (B // block_b,)
    seed_arr = jnp.array([seed], dtype=jnp.int32)

    cost = pl.CostEstimate(
        flops=2 * B * (M * M * N + N * M * N),
        transcendentals=B * M * N,
        bytes_accessed=4 * (x1.size + x2.size + B * N * N),
    )

    return pl.pallas_call(
        sdpa_kernel,
        out_shape=jax.ShapeDtypeStruct((B, N, N), jnp.float32),
        grid_spec=pltpu.PrefetchScalarGridSpec(
            num_scalar_prefetch=1,
            grid=grid,
            in_specs=[
                pl.BlockSpec((block_b, M, M), lambda b, sref: (b, 0, 0)),
                pl.BlockSpec((block_b, N, M), lambda b, sref: (b, 0, 0)),
            ],
            out_specs=pl.BlockSpec((block_b, N, N), lambda b, sref: (b, 0, 0)),
        ),
        compiler_params=pltpu.CompilerParams(
            # Batch steps are independent -> shard across both TCs on v7x.
            dimension_semantics=("parallel",),
        ),
        cost_estimate=cost,
    )(seed_arr, x1, x2)


if __name__ == "__main__":
    key = jax.random.PRNGKey(0)
    k1, k2 = jax.random.split(key)

    # Small, lane-aligned shapes consistent with the module's forward pass
    # (contraction dim = 128 fills the vreg lanes / MXU depth).
    B, M, N = 8, 128, 128
    x1 = jax.random.normal(k1, (B, M, M), dtype=jnp.float32)   # "queries"
    x2 = jax.random.normal(k2, (B, N, M), dtype=jnp.float32)   # "keys/values"

    out = model_forward(x1, x2, seed=0)
    jax.block_until_ready(out)

    assert out.shape == (B, N, N)
    assert out.dtype == jnp.float32
    assert bool(jnp.all(jnp.isfinite(out)))
    print("KERNEL_OK")
</pallas_src>

<mosaic_0001>
module attributes {stable_mosaic.version = 11 : i64} {
  func.func @sdpa_kernel(%arg0: i32, %arg1: memref<1xi32, #tpu.memory_space<smem>>, %arg2: memref<4x128x128xf32, #tpu.memory_space<vmem>>, %arg3: memref<4x128x128xf32, #tpu.memory_space<vmem>>, %arg4: memref<4x128x128xf32, #tpu.memory_space<vmem>>) attributes {dimension_semantics = [#tpu.dimension_semantics<parallel>], iteration_bounds = array<i64: 2>, scalar_prefetch = 1 : i64, scratch_operands = 0 : i64, tpu.core_type = #tpu.core_type<tc>, window_params = [{transform_indices = @transform_0, window_bounds = array<i64: 4, 128, 128>}, {transform_indices = @transform_1, window_bounds = array<i64: 4, 128, 128>}, {transform_indices = @transform_2, window_bounds = array<i64: 4, 128, 128>}]} {
    %c0 = arith.constant 0 : index
    %c0_0 = arith.constant 0 : index
    %c0_1 = arith.constant 0 : index
    %0 = vector.load %arg2[%c0, %c0_0, %c0_1] : memref<4x128x128xf32, #tpu.memory_space<vmem>>, vector<4x128x128xf32>
    %1 = arith.truncf %0 : vector<4x128x128xf32> to vector<4x128x128xbf16>
    %c0_2 = arith.constant 0 : index
    %c0_3 = arith.constant 0 : index
    %c0_4 = arith.constant 0 : index
    %2 = vector.load %arg3[%c0_2, %c0_3, %c0_4] : memref<4x128x128xf32, #tpu.memory_space<vmem>>, vector<4x128x128xf32>
    %3 = arith.truncf %2 : vector<4x128x128xf32> to vector<4x128x128xbf16>
    "tpu.trace_start"() <{level = 10 : i32, message = "bmk,bnk->bmn"}> : () -> ()
    %cst = arith.constant dense<0.000000e+00> : vector<4x128x128xf32>
    %4 = tpu.matmul %1, %3, %cst {dimension_numbers = #tpu.dot_dimension_numbers<[2], [2], [1], [1], [0, 0, 0, 1, 1, 1], [0], [0]>} : vector<4x128x128xbf16>, vector<4x128x128xbf16>, vector<4x128x128xf32> -> vector<4x128x128xf32>
    "tpu.trace_stop"() : () -> ()
    %cst_5 = arith.constant dense<0xFF800000> : vector<4x128xf32>
    %5 = vector.multi_reduction <maximumf>, %4, %cst_5 [2] : vector<4x128x128xf32> to vector<4x128xf32>
    %6 = vector.shape_cast %5 : vector<4x128xf32> to vector<4x128x1xf32>
    %7 = vector.broadcast %6 : vector<4x128x1xf32> to vector<4x128x128xf32>
    %8 = arith.subf %4, %7 : vector<4x128x128xf32>
    %cst_6 = arith.constant 0.0883883461 : f32
    %9 = vector.broadcast %cst_6 : f32 to vector<4x128x128xf32>
    %10 = arith.mulf %8, %9 : vector<4x128x128xf32>
    %11 = math.exp %10 : vector<4x128x128xf32>
    %cst_7 = arith.constant dense<0.000000e+00> : vector<4x128xf32>
    %12 = vector.multi_reduction <add>, %11, %cst_7 [2] : vector<4x128x128xf32> to vector<4x128xf32>
    %13 = vector.shape_cast %12 : vector<4x128xf32> to vector<4x128x1xf32>
    %14 = tpu.reciprocal %13 {approx = true} : vector<4x128x1xf32> -> vector<4x128x1xf32>
    %15 = vector.broadcast %14 : vector<4x128x1xf32> to vector<4x128x128xf32>
    %16 = arith.mulf %11, %15 : vector<4x128x128xf32>
    %c0_8 = arith.constant 0 : index
    %17 = memref.load %arg1[%c0_8] : memref<1xi32, #tpu.memory_space<smem>>
    %c4_i32 = arith.constant 4 : i32
    %18 = arith.muli %arg0, %c4_i32 : i32
    %19 = tpu.iota {dimensions = array<i32: 0>} : vector<4x128x128xi32>
    %20 = vector.broadcast %18 : i32 to vector<4x128x128xi32>
    %21 = arith.addi %19, %20 : vector<4x128x128xi32>
    %22 = tpu.iota {dimensions = array<i32: 1>} : vector<4x128x128xi32>
    %23 = tpu.iota {dimensions = array<i32: 2>} : vector<4x128x128xi32>
    %c128_i32 = arith.constant 128 : i32
    %24 = vector.broadcast %c128_i32 : i32 to vector<4x128x128xi32>
    %25 = arith.muli %21, %24 : vector<4x128x128xi32>
    %26 = arith.addi %25, %22 : vector<4x128x128xi32>
    %c128_i32_9 = arith.constant 128 : i32
    %27 = vector.broadcast %c128_i32_9 : i32 to vector<4x128x128xi32>
    %28 = arith.muli %26, %27 : vector<4x128x128xi32>
    %29 = arith.addi %28, %23 : vector<4x128x128xi32>
    %c-1640531527_i32 = arith.constant -1640531527 : i32
    %30 = arith.muli %17, %c-1640531527_i32 : i32
    %31 = vector.broadcast %30 : i32 to vector<4x128x128xi32>
    %32 = arith.addi %29, %31 : vector<4x128x128xi32>
    %c16_i32 = arith.constant 16 : i32
    %33 = vector.broadcast %c16_i32 : i32 to vector<4x128x128xi32>
    %34 = arith.shrsi %32, %33 : vector<4x128x128xi32>
    %c65535_i32 = arith.constant 65535 : i32
    %35 = vector.broadcast %c65535_i32 : i32 to vector<4x128x128xi32>
    %36 = arith.andi %34, %35 : vector<4x128x128xi32>
    %37 = arith.xori %32, %36 : vector<4x128x128xi32>
    %c2146121005_i32 = arith.constant 2146121005 : i32
    %38 = vector.broadcast %c2146121005_i32 : i32 to vector<4x128x128xi32>
    %39 = arith.muli %37, %38 : vector<4x128x128xi32>
    %c15_i32 = arith.constant 15 : i32
    %40 = vector.broadcast %c15_i32 : i32 to vector<4x128x128xi32>
    %41 = arith.shrsi %39, %40 : vector<4x128x128xi32>
    %c131071_i32 = arith.constant 131071 : i32
    %42 = vector.broadcast %c131071_i32 : i32 to vector<4x128x128xi32>
    %43 = arith.andi %41, %42 : vector<4x128x128xi32>
    %44 = arith.xori %39, %43 : vector<4x128x128xi32>
    %c-2073434485_i32 = arith.constant -2073434485 : i32
    %45 = vector.broadcast %c-2073434485_i32 : i32 to vector<4x128x128xi32>
    %46 = arith.muli %44, %45 : vector<4x128x128xi32>
    %c16_i32_10 = arith.constant 16 : i32
    %47 = vector.broadcast %c16_i32_10 : i32 to vector<4x128x128xi32>
    %48 = arith.shrsi %46, %47 : vector<4x128x128xi32>
    %c65535_i32_11 = arith.constant 65535 : i32
    %49 = vector.broadcast %c65535_i32_11 : i32 to vector<4x128x128xi32>
    %50 = arith.andi %48, %49 : vector<4x128x128xi32>
    %51 = arith.xori %46, %50 : vector<4x128x128xi32>
    %c2147483647_i32 = arith.constant 2147483647 : i32
    %52 = vector.broadcast %c2147483647_i32 : i32 to vector<4x128x128xi32>
    %53 = arith.andi %51, %52 : vector<4x128x128xi32>
    %c214748364_i32 = arith.constant 214748364 : i32
    %54 = vector.broadcast %c214748364_i32 : i32 to vector<4x128x128xi32>
    %55 = arith.cmpi sge, %53, %54 : vector<4x128x128xi32>
    %cst_12 = arith.constant 1.11111116 : f32
    %56 = vector.broadcast %cst_12 : f32 to vector<4x128x128xf32>
    %57 = arith.mulf %16, %56 : vector<4x128x128xf32>
    %cst_13 = arith.constant 0.000000e+00 : f32
    %58 = vector.broadcast %cst_13 : f32 to vector<4x128x128xf32>
    %59 = arith.select %55, %57, %58 : vector<4x128x128xi1>, vector<4x128x128xf32>
    %60 = arith.truncf %59 : vector<4x128x128xf32> to vector<4x128x128xbf16>
    "tpu.trace_start"() <{level = 10 : i32, message = "bnm,bmq->bnq"}> : () -> ()
    %cst_14 = arith.constant dense<0.000000e+00> : vector<4x128x128xf32>
    %61 = tpu.matmul %3, %60, %cst_14 {dimension_numbers = #tpu.dot_dimension_numbers<[2], [1], [1], [2], [0, 0, 0, 1, 1, 2], [0], [0]>} : vector<4x128x128xbf16>, vector<4x128x128xbf16>, vector<4x128x128xf32> -> vector<4x128x128xf32>
    "tpu.trace_stop"() : () -> ()
    %c0_15 = arith.constant 0 : index
    %c0_16 = arith.constant 0 : index
    %c0_17 = arith.constant 0 : index
    %62 = vector.load %arg4[%c0_15, %c0_16, %c0_17] : memref<4x128x128xf32, #tpu.memory_space<vmem>>, vector<4x128x128xf32>
    tpu.vector_store %arg4[%c0_15, %c0_16, %c0_17], %61 {strides = array<i32>} : memref<4x128x128xf32, #tpu.memory_space<vmem>>, vector<4x128x128xf32>,
    return
  }
  func.func @transform_0(%arg0: i32, %arg1: memref<1xi32, #tpu.memory_space<smem>>) -> (i32, i32, i32) {
    %c0_i32 = arith.constant 0 : i32
    %c0_i32_0 = arith.constant 0 : i32
    %c0_i32_1 = arith.constant 0 : i32
    return %arg0, %c0_i32, %c0_i32_0 : i32, i32, i32
  }
  func.func @transform_1(%arg0: i32, %arg1: memref<1xi32, #tpu.memory_space<smem>>) -> (i32, i32, i32) {
    %c0_i32 = arith.constant 0 : i32
    %c0_i32_0 = arith.constant 0 : i32
    %c0_i32_1 = arith.constant 0 : i32
    return %arg0, %c0_i32, %c0_i32_0 : i32, i32, i32
  }
  func.func @transform_2(%arg0: i32, %arg1: memref<1xi32, #tpu.memory_space<smem>>) -> (i32, i32, i32) {
    %c0_i32 = arith.constant 0 : i32
    %c0_i32_0 = arith.constant 0 : i32
    %c0_i32_1 = arith.constant 0 : i32
    return %arg0, %c0_i32, %c0_i32_0 : i32, i32, i32
  }
}

</mosaic_0001>

<bundles_post_ra>
// kernel: tpu_custom_call.1
= control target key start
LH: loop header
LB: loop body
LE: loop exit
PB: predicated region body
PF: predicated region fallthrough
CT: control target
= control target key end

     0   :  { %s6740_s0 = inlined_call_operand.<no memory space> [shape: s32[1], index: 0, kind: input, shape index: {}]   ;;  %s6741_s1 = inlined_call_operand.hbm [shape: f32[8,128,128], index: 1, kind: input, shape index: {}]   ;;  %s6742_s2 = inlined_call_operand.hbm [shape: f32[8,128,128], index: 2, kind: input, shape index: {}]   ;;  %s6743_s3 = inlined_call_operand.hbm [shape: f32[8,128,128], index: 3, kind: output, shape index: {}]  }
   0x1   :  { %8 = sst [smem:[#allocation3]] %s6740_s0 }
   0x2   :  { %9 = vsyncpa [#allocation5], 0 }
   0x3   :  { %11 = vsyncpa [#allocation5 + $0x1], 0 }
   0x4   :  { %12 = vsyncpa [#allocation8], 0 }
   0x5   :  { %14 = vsyncpa [#allocation8 + $0x1], 0 }
   0x6   :  { %15 = vsyncpa [#allocation6], 0 }
   0x7   :  { %17 = vsyncpa [#allocation6 + $0x1], 0  ;;  %s4445_s14 = smov 0   ;;  %s4447_s15 = smov 0  }
   0x8   :  { %s4449_s16 = smov 0   ;;  %s4451_s17 = smov 0  }
   0x9 LB: > { %s4466_s0 = sadd.s32 4294967295, %s4413_s17   ;;  %s3272_s18 = sadd.s32 4294967294, %s4413_s17   ;;  %s4413_s17 = sphi %s4451_s17, %s7263_s17   ;;  %s4409_s16 = sphi %s4449_s16, %s7262_s16   ;;  %s4405_s15 = sphi %s4447_s15, %s7261_s15   ;;  %s4401_s14 = sphi %s4445_s14, %s7260_s14  }
   0xa   : > { %s4470_s19 = sadd.s32 1, %s4413_s17   ;;  %s30_s20 = sadd.s32 1, %s4409_s16 }
   0xb   : > { %s27_s21 = ssub.s32 %s4413_s17, %s4470_s19  ;;  %p37_p0 = scmp.ne.s32.totalorder %s4409_s16, %s4405_s15 }
   0xc   : > { %p28_p1 = scmp.eq.s32.totalorder %s27_s21, 0  ;;  %p38_p2 = scmp.eq.s32.totalorder %s4413_s17, 0 }
   0xd   : > { %p43_p3 = scmp.ne.s32.totalorder %s4405_s15, %s4401_s14  ;;  %p44_p4 = scmp.eq.s32.totalorder %s4466_s0, 0 }
   0xe   : > { %s4482_s22 = scalar_select %p28_p1, %s4409_s16, %s30_s20  }
   0xf   : > { %p4484_p5 = por %p38_p2, %p37_p0  ;;  %p4488_p6 = por %p44_p4, %p43_p3 }
  0x10   : > { %p93_p7 = scmp.eq.s32.totalorder %s4466_s0, 1  ;;  %p99_p8 = scmp.eq.s32.totalorder %s3272_s18, 1 }
  0x11   : > { %s6879_s24 = scalar_select %p4488_p6, 1, 0 }
  0x12   : > { %p3989_p10 = scmp.lt.s32.totalorder %s4413_s17, 2  ;;  %p4495_p11 = por %p93_p7, %p37_p0 }
  0x13   : > { %p4499_p12 = por %p99_p8, %p43_p3  ;;  %s4504_s27 = sand.u32 1, %s4409_s16  }
  0x14   : > { %s6880_s25 = scalar_select %p4495_p11, 1, 0 }
  0x15   : > { %s6881_s26 = scalar_select %p4499_p12, 1, 0 }
  0x16   : > { %s3583_s28 = sshll.u32 %s4413_s17, 13  ;;  %s3275_s29 = sshll.u32 %s4504_s27, 9 }
  0x17   : > { %s4513_s5 = scalar_lea.hbm %s6741_s1, %s3583_s28  ;;  %s123_s6 = scalar_lea.vmem [#allocation4], %s3275_s29 }
  0x18   : > { %s131_s7 = sshll.u32 %s123_s6, 4  ;;  %p4519_p13 = pnand %p3989_p10, %p4484_p5  ;;  %s4523_s7 = int_to_ptr.vmem [resolvable:$true] %s131_s7 }
  0x19   : > { %s120_s9 = scalar_lea.sflag [#allocation5], %s4504_s27  ;;  %s4283_s10 = scalar_lea.hbm %s4513_s5, 8192 }
  0x1a   : > { %p4284_p0 = scmp.ne.s32.totalorder %s4513_s5, %s4283_s10  ;;  %p4285_p1 = pneg %p4519_p13 }
  0x1b   : > { %s4288_s13 = scalar_lea.hbm %s6741_s1, 16384  ;;  %p4289_p4 = scmp.lt.u32.totalorder %s4513_s5, %s6741_s1 }
  0x1c   : > { %p4286_p2 = pnand %p4285_p1, %p4284_p0  ;;  %p4290_p5 = scmp.lt.u32.totalorder %s4288_s13, %s4283_s10 }
  0x1d   : > { %p4292_p8 = scmp.lt.u32.totalorder %s4283_s10, %s4513_s5 }
  0x1e   : > { %p4287_p3 = pneg %p4286_p2  ;;  %p4291_p7 = por %p4290_p5, %p4289_p4 }
  0x20   : > { %p4293_p10 = por %p4292_p8, %p4291_p7 }
  0x22   : > { %p4294_p9 = pnand %p4293_p10, %p4287_p3 }
  0x24   : > { %4297 = shalt.err (!%p4294_p9)
}
  0x25   : > { %s4298_s21 = scalar_lea.vmem %s4523_s7, 8192  ;;  %s4415_s23 = smov [#allocation4]  }
  0x26   : > { %p4299_p0 = scmp.ne.s32.totalorder %s4523_s7, %s4298_s21  ;;  %s4303_s30 = sshll.u32 %s4415_s23, 4  ;;  %s4304_s30 = int_to_ptr.vmem [resolvable:$false] %s4303_s30 }
  0x27   : > { %s4305_s4 = scalar_lea.vmem %s4304_s30, 16384  ;;  %p4306_p11 = scmp.lt.s32.totalorder %s4523_s7, %s4304_s30 }
  0x28   : > { %p4301_p2 = pnand %p4299_p0, %p4285_p1  ;;  %p4307_p4 = scmp.lt.s32.totalorder %s4305_s4, %s4298_s21 }
  0x2a   : > { %p4302_p12 = pneg %p4301_p2  ;;  %p4308_p5 = por %p4307_p4, %p4306_p11 }
  0x2c   : > { %p4309_p7 = pnand %p4308_p5, %p4302_p12 }
  0x2e   : > { %4312 = shalt.err (!%p4309_p7)
}
  0x2f   : > { %s4416_s6 = smov 128   ;;  %s4417_s10 = smov 8  }
  0x30   : > { %3981 = dma.hbm_to_vmem [thread:$0]  (!%p4519_p13), %s4513_s5, 8192, %s4523_s7, %s120_s9, %s4416_s6, %s4416_s6, %s4417_s10  }
  0x31   : > { %p3283_p9 = scmp.ge.s32.totalorder %s4413_s17, 1  ;;  %p161_p11 = scmp.lt.s32.totalorder %s4413_s17, 3 }
  0x32   : > { %s4567_s18 = scalar_lea.hbm %s6742_s2, %s3583_s28  ;;  %s145_s20 = scalar_lea.vmem [#allocation7], %s3275_s29 }
  0x33   : > { %p4558_p12 = pnand %p3283_p9, %p161_p11  ;;  %s153_s21 = sshll.u32 %s145_s20, 4  ;;  %s4571_s21 = int_to_ptr.vmem [resolvable:$true] %s153_s21 }
  0x34   : > { %s142_s5 = scalar_lea.sflag [#allocation8], %s4504_s27  ;;  %s4313_s7 = scalar_lea.hbm %s4567_s18, 8192 }
  0x35   : > { %p4314_p3 = scmp.ne.s32.totalorder %s4567_s18, %s4313_s7  ;;  %s4318_s28 = scalar_lea.hbm %s6742_s2, 16384 }
  0x36   : > { %p4319_p0 = scmp.lt.u32.totalorder %s4567_s18, %s6742_s2  ;;  %p4320_p2 = scmp.lt.u32.totalorder %s4318_s28, %s4313_s7 }
  0x37   : > { %p4316_p8 = pnand %p4314_p3, %p4285_p1  ;;  %p4322_p5 = scmp.lt.u32.totalorder %s4313_s7, %s4567_s18 }
  0x38   : > { %p4321_p4 = por %p4320_p2, %p4319_p0 }
  0x39   : > { %p4317_p10 = pneg %p4316_p8 }
  0x3a   : > { %p4323_p7 = por %p4322_p5, %p4321_p4 }
  0x3c   : > { %p4324_p9 = pnand %p4323_p7, %p4317_p10 }
  0x3e   : > { %4327 = shalt.err (!%p4324_p9)
}
  0x3f   : > { %s4328_s29 = scalar_lea.vmem %s4571_s21, 8192  ;;  %s4418_s12 = smov [#allocation7]  }
  0x40   : > { %p4329_p11 = scmp.ne.s32.totalorder %s4571_s21, %s4328_s29  ;;  %s4333_s13 = sshll.u32 %s4418_s12, 4  ;;  %s4334_s13 = int_to_ptr.vmem [resolvable:$false] %s4333_s13 }
  0x41   : > { %s4335_s20 = scalar_lea.vmem %s4334_s13, 16384  ;;  %p4336_p6 = scmp.lt.s32.totalorder %s4571_s21, %s4334_s13 }
  0x42   : > { %p4331_p3 = pnand %p4329_p11, %p4285_p1  ;;  %p4337_p0 = scmp.lt.s32.totalorder %s4335_s20, %s4328_s29 }
  0x44   : > { %p4332_p8 = pneg %p4331_p3  ;;  %p4338_p2 = por %p4337_p0, %p4336_p6 }
  0x46   : > { %p4339_p4 = pnand %p4338_p2, %p4332_p8 }
  0x48   : > { %4342 = shalt.err (!%p4339_p4)
}
  0x49   : > { %3984 = dma.hbm_to_vmem [thread:$0]  (!%p4519_p13), %s4567_s18, 8192, %s4571_s21, %s142_s5, %s4416_s6, %s4416_s6, %s4417_s10  }
  0x4a   : > { %165 = sbr.rel (%p4558_p12) target bundleno = 1153 (0x481), region = 28 }
  0x51   : > { %s4605_s7 = sand.u32 1, %s4405_s15   ;;  %p6884_p6 = scmp.ne.s32.totalorder %s6879_s24, 0 }
  0x52   : > { %s4608_s9 = sshll.u32 %s4605_s7, 9  ;;  %s168_s8 = scalar_lea.sflag [#allocation5], %s4605_s7 }
  0x53   : > { %s4612_s23 = scalar_lea.vmem [#allocation4], %s4608_s9 }
  0x54   : > { %4388 = dma.done.wait (%p6884_p6), %s168_s8, 8192  }
  0x55   : > { %4390 = vsyncadd (%p6884_p6), %s168_s8, 4294959104  ;;  %s177_s27 = scalar_lea.sflag [#allocation8], %s4605_s7  ;;  %s4620_s6 = scalar_lea.vmem [#allocation7], %s4608_s9 }
  0x56   : > { %4392 = dma.done.wait (%p6884_p6), %s177_s27, 8192  }
  0x57   : > { %4394 = vsyncadd (%p6884_p6), %s177_s27, 4294959104  ;;  %v306_v0 = vld [vmem:[%s4620_s6] sm:$0xff]  ;;  %v307_v1 = vld [vmem:[%s4620_s6 + $0x8] sm:$0xff]  ;;  %s3287_s24 = sshll.u32 %s4466_s0, 2  ;;  %s5114_s10 = sld [smem:[#allocation3]] }
  0x58   : > { %v322_v2 = vld [vmem:[%s4620_s6 + $0x80] sm:$0xff]  ;;  %v4629_v3 = vpack.c.bf16 %v307_v1, %v306_v0  ;;  %v323_v4 = vld [vmem:[%s4620_s6 + $0x88] sm:$0xff]  ;;  %v308_v5 = vld [vmem:[%s4620_s6 + $0x10] sm:$0xff]  ;;  %s6623_s18 = scalar_lea.vmem [#allocation9], %s4608_s9  ;;  %s3587_s21 = sshll.u32 %s4466_s0, 13 }
  0x59   : > { %v309_v6 = vld [vmem:[%s4620_s6 + $0x18] sm:$0xff]  ;;  %v4634_v7 = vpack.c.bf16 %v323_v4, %v322_v2  ;;  %v324_v9 = vld [vmem:[%s4620_s6 + $0x90] sm:$0xff]  ;;  %v310_v12 = vld [vmem:[%s4620_s6 + $0x20] sm:$0xff]  ;;  %s3176_s5 = sshll.u32 %s6623_s18, 4  ;;  %s6691_s4 = scalar_lea.hbm %s6743_s3, %s3587_s21  ;;  %s6693_s5 = int_to_ptr.vmem [resolvable:$true] %s3176_s5 }
  0x5a   : > { %v4636_v8 = vpack.c.bf16 %v309_v6, %v308_v5  ;;  %v325_v10 = vld [vmem:[%s4620_s6 + $0x98] sm:$0xff]  ;;  %3716 = vmatprep.subr.bf16.mxu0 %v4629_v3  ;;  %v311_v13 = vld [vmem:[%s4620_s6 + $0x28] sm:$0xff]  ;;  %v326_v14 = vld [vmem:[%s4620_s6 + $0xa0] sm:$0xff]  ;;  %s3162_s0 = scalar_lea.sflag [#allocation6], %s4605_s7  ;;  %s4343_s29 = scalar_lea.vmem %s6693_s5, 8192 }
  0x5b   : > { %v4641_v11 = vpack.c.bf16 %v325_v10, %v324_v9  ;;  %3748 = vmatprep.subr.bf16.mxu1 %v4634_v7  ;;  %3717 = vmatpush3.bf16.xpose.msra.mxu0 %v4629_v3  ;;  %v327_v15 = vld [vmem:[%s4620_s6 + $0xa8] sm:$0xff]  ;;  %v4652_v16 = vpack.c.bf16 %v311_v13, %v310_v12  ;;  %v210_v18 = vld [vmem:[%s4612_s23] sm:$0xff]  ;;  %v312_v24 = vld [vmem:[%s4620_s6 + $0x30] sm:$0xff]  ;;  %p4344_p13 = scmp.ne.s32.totalorder %s6693_s5, %s4343_s29  ;;  %p7257_p1 = scmp.ne.s32.totalorder %s6880_s25, 0 }
  0x5c   : > { %6885 = vst [vmem:[#allocation13_spill] sm:$0xff] %v4636_v8  ;;  %3749 = vmatpush3.bf16.xpose.msra.mxu1 %v4634_v7  ;;  %3718 = vmatprep.subr.bf16.mxu0 %v4636_v8  ;;  %v4654_v17 = vpack.c.bf16 %v327_v15, %v326_v14  ;;  %v211_v19 = vld [vmem:[%s4612_s23 + $0x8] sm:$0xff]  ;;  %v226_v20 = vld [vmem:[%s4612_s23 + $0x80] sm:$0xff]  ;;  %v313_v25 = vld [vmem:[%s4620_s6 + $0x38] sm:$0xff]  ;;  %s4419_s12 = smov [#allocation9]  }
  0x5d   : > { %6886 = vst [vmem:[#allocation14_spill] sm:$0xff] %v4641_v11  ;;  %3750 = vmatprep.subr.bf16.mxu1 %v4641_v11  ;;  %6887 = vst [vmem:[#allocation15_spill] sm:$0xff] %v4652_v16  ;;  %v227_v21 = vld [vmem:[%s4612_s23 + $0x88] sm:$0xff]  ;;  %v274_v22 = vpack.c.bf16 %v211_v19, %v210_v18  ;;  %v328_v26 = vld [vmem:[%s4620_s6 + $0xb0] sm:$0xff]  ;;  %v4668_v28 = vpack.c.bf16 %v313_v25, %v312_v24  ;;  %s1651_s11 = smul.u32 2654435769, %s5114_s10  ;;  %p4345_p12 = pnand %p4344_p13, %p7257_p1 }
  0x5e   : > { %6888 = vst [vmem:[#allocation16_spill] sm:$0xff] %v4654_v17  ;;  %v282_v23 = vpack.c.bf16 %v227_v21, %v226_v20  ;;  %v329_v27 = vld [vmem:[%s4620_s6 + $0xb8] sm:$0xff]  ;;  %v314_v30 = vld [vmem:[%s4620_s6 + $0x40] sm:$0xff]  ;;  %v315_v31 = vld [vmem:[%s4620_s6 + $0x48] sm:$0xff]  ;;  %s4347_s13 = sshll.u32 %s4419_s12, 4  ;;  %s4348_s13 = int_to_ptr.vmem [resolvable:$false] %s4347_s13 }
  0x5f   : > { %3732 = vmatprep.mubr.bf16.mxu0 %v274_v22  ;;  %6889 = vst [vmem:[#allocation17_spill] sm:$0xff] %v4668_v28  ;;  %v4670_v29 = vpack.c.bf16 %v329_v27, %v328_v26  ;;  %v330_v32 = vld [vmem:[%s4620_s6 + $0xc0] sm:$0xff]  ;;  %v331_v33 = vld [vmem:[%s4620_s6 + $0xc8] sm:$0xff]  ;;  %v4680_v34 = vpack.c.bf16 %v315_v31, %v314_v30  ;;  %v316_v36 = vld [vmem:[%s4620_s6 + $0x50] sm:$0xff]  ;;  %p4346_p10 = pneg %p4345_p12  ;;  %s4349_s20 = scalar_lea.vmem %s4348_s13, 16384 }
  0x60   : > { %3764 = vmatprep.mubr.bf16.mxu1 %v282_v23  ;;  %v4682_v35 = vpack.c.bf16 %v331_v33, %v330_v32  ;;  %v317_v37 = vld [vmem:[%s4620_s6 + $0x58] sm:$0xff]  ;;  %v332_v38 = vld [vmem:[%s4620_s6 + $0xd0] sm:$0xff]  ;;  %v318_v42 = vld [vmem:[%s4620_s6 + $0x60] sm:$0xff]  ;;  %p4350_p5 = scmp.lt.s32.totalorder %s6693_s5, %s4348_s13  ;;  %p4351_p7 = scmp.lt.s32.totalorder %s4349_s20, %s4343_s29 }
  0x61   : > { %6890 = vst [vmem:[#allocation18_spill] sm:$0xff] %v4670_v29  ;;  %6891 = vst [vmem:[#allocation19_spill] sm:$0xff] %v4680_v34  ;;  %v333_v39 = vld [vmem:[%s4620_s6 + $0xd8] sm:$0xff]  ;;  %v4692_v40 = vpack.c.bf16 %v317_v37, %v316_v36  ;;  %v319_v43 = vld [vmem:[%s4620_s6 + $0x68] sm:$0xff] }
  0x62   : > { %6892 = vst [vmem:[#allocation20_spill] sm:$0xff] %v4682_v35  ;;  %v4694_v41 = vpack.c.bf16 %v333_v39, %v332_v38  ;;  %v334_v44 = vld [vmem:[%s4620_s6 + $0xe0] sm:$0xff]  ;;  %v335_v45 = vld [vmem:[%s4620_s6 + $0xe8] sm:$0xff]  ;;  %v4704_v46 = vpack.c.bf16 %v319_v43, %v318_v42  ;;  %v320_v48 = vld [vmem:[%s4620_s6 + $0x70] sm:$0xff]  ;;  %p4352_p9 = por %p4351_p7, %p4350_p5 }
  0x63   : > { %3719 = vmatpush3.bf16.xpose.msra.mxu0 %v4636_v8  ;;  %6893 = vst [vmem:[#allocation21_spill] sm:$0xff] %v4692_v40  ;;  %v4706_v47 = vpack.c.bf16 %v335_v45, %v334_v44  ;;  %v321_v49 = vld [vmem:[%s4620_s6 + $0x78] sm:$0xff]  ;;  %v336_v50 = vld [vmem:[%s4620_s6 + $0xf0] sm:$0xff]  ;;  %v338_v54 = vld [vmem:[%s4620_s6 + $0x100] sm:$0xff] }
  0x64   : > { %3751 = vmatpush3.bf16.xpose.msra.mxu1 %v4641_v11  ;;  %3720 = vmatprep.subr.bf16.mxu0 %v4652_v16  ;;  %6894 = vst [vmem:[#allocation22_spill] sm:$0xff] %v4694_v41  ;;  %6895 = vst [vmem:[#allocation23_spill] sm:$0xff] %v4704_v46  ;;  %v337_v51 = vld [vmem:[%s4620_s6 + $0xf8] sm:$0xff]  ;;  %v4716_v52 = vpack.c.bf16 %v321_v49, %v320_v48  ;;  %v339_v55 = vld [vmem:[%s4620_s6 + $0x108] sm:$0xff]  ;;  %p4353_p11 = pnand %p4352_p9, %p4346_p10 }
  0x65   : > { %3752 = vmatprep.subr.bf16.mxu1 %v4654_v17  ;;  %6896 = vst [vmem:[#allocation24_spill] sm:$0xff] %v4706_v47  ;;  %v4718_v53 = vpack.c.bf16 %v337_v51, %v336_v50  ;;  %v354_v56 = vld [vmem:[%s4620_s6 + $0x180] sm:$0xff]  ;;  %v355_v57 = vld [vmem:[%s4620_s6 + $0x188] sm:$0xff]  ;;  %v4728_v58 = vpack.c.bf16 %v339_v55, %v338_v54  ;;  %v212_v60 = vld [vmem:[%s4612_s23 + $0x10] sm:$0xff] }
  0x66   : > { %6897 = vst [vmem:[#allocation25_spill] sm:$0xff] %v4716_v52  ;;  %v4730_v59 = vpack.c.bf16 %v355_v57, %v354_v56  ;;  %v213_v61 = vld [vmem:[%s4612_s23 + $0x18] sm:$0xff]  ;;  %v228_v62 = vld [vmem:[%s4612_s23 + $0x90] sm:$0xff]  ;;  %v214_v6 = vld [vmem:[%s4612_s23 + $0x20] sm:$0xff] }
  0x67   : > { %6898 = vst [vmem:[#allocation26_spill] sm:$0xff] %v4718_v53  ;;  %6899 = vst [vmem:[#allocation27_spill] sm:$0xff] %v4728_v58  ;;  %v229_v63 = vld [vmem:[%s4612_s23 + $0x98] sm:$0xff]  ;;  %v340_v0 = vld [vmem:[%s4620_s6 + $0x110] sm:$0xff]  ;;  %v275_v4 = vpack.c.bf16 %v213_v61, %v212_v60 }
  0x68   : > { %6900 = vst [vmem:[#allocation28_spill] sm:$0xff] %v4730_v59  ;;  %v341_v1 = vld [vmem:[%s4620_s6 + $0x118] sm:$0xff]  ;;  %v356_v2 = vld [vmem:[%s4620_s6 + $0x190] sm:$0xff]  ;;  %v215_v9 = vld [vmem:[%s4612_s23 + $0x28] sm:$0xff]  ;;  %v283_v10 = vpack.c.bf16 %v229_v63, %v228_v62 }
  0x69   : > { %v357_v5 = vld [vmem:[%s4620_s6 + $0x198] sm:$0xff]  ;;  %v230_v12 = vld [vmem:[%s4612_s23 + $0xa0] sm:$0xff]  ;;  %v231_v13 = vld [vmem:[%s4612_s23 + $0xa8] sm:$0xff]  ;;  %v4748_v14 = vpack.c.bf16 %v341_v1, %v340_v0  ;;  %v276_v18 = vpack.c.bf16 %v215_v9, %v214_v6 }
  0x6a   : > { %v4750_v15 = vpack.c.bf16 %v357_v5, %v356_v2  ;;  %v284_v19 = vpack.c.bf16 %v231_v13, %v230_v12  ;;  %v216_v20 = vld [vmem:[%s4612_s23 + $0x30] sm:$0xff]  ;;  %v217_v21 = vld [vmem:[%s4612_s23 + $0x38] sm:$0xff]  ;;  %v342_v24 = vld [vmem:[%s4620_s6 + $0x120] sm:$0xff] }
  0x6b   : > { %3721 = vmatpush3.bf16.xpose.msra.mxu0 %v4652_v16  ;;  %6901 = vst [vmem:[#allocation29_spill] sm:$0xff] %v4748_v14  ;;  %v232_v22 = vld [vmem:[%s4612_s23 + $0xb0] sm:$0xff]  ;;  %v233_v23 = vld [vmem:[%s4612_s23 + $0xb8] sm:$0xff]  ;;  %v343_v25 = vld [vmem:[%s4620_s6 + $0x128] sm:$0xff]  ;;  %v277_v27 = vpack.c.bf16 %v217_v21, %v216_v20 }
  0x6c   : > { %3753 = vmatpush3.bf16.xpose.msra.mxu1 %v4654_v17  ;;  %3722 = vmatprep.subr.bf16.mxu0 %v4668_v28  ;;  %6902 = vst [vmem:[#allocation30_spill] sm:$0xff] %v4750_v15  ;;  %v358_v26 = vld [vmem:[%s4620_s6 + $0x1a0] sm:$0xff]  ;;  %v359_v30 = vld [vmem:[%s4620_s6 + $0x1a8] sm:$0xff]  ;;  %v285_v33 = vpack.c.bf16 %v233_v23, %v232_v22  ;;  %v4768_v38 = vpack.c.bf16 %v343_v25, %v342_v24  ;;  %v220_v44 = vld [vmem:[%s4612_s23 + $0x50] sm:$0xff] }
  0x6d   : > { %3754 = vmatprep.subr.bf16.mxu1 %v4670_v29  ;;  %v218_v31 = vld [vmem:[%s4612_s23 + $0x40] sm:$0xff]  ;;  %v219_v32 = vld [vmem:[%s4612_s23 + $0x48] sm:$0xff]  ;;  %v4770_v39 = vpack.c.bf16 %v359_v30, %v358_v26  ;;  %v221_v45 = vld [vmem:[%s4612_s23 + $0x58] sm:$0xff] }
  0x6e   : > { %v234_v36 = vld [vmem:[%s4612_s23 + $0xc0] sm:$0xff]  ;;  %v235_v37 = vld [vmem:[%s4612_s23 + $0xc8] sm:$0xff]  ;;  %6903 = vst [vmem:[#allocation31_spill] sm:$0xff] %v4768_v38  ;;  %v278_v42 = vpack.c.bf16 %v219_v32, %v218_v31  ;;  %v236_v48 = vld [vmem:[%s4612_s23 + $0xd0] sm:$0xff]  ;;  %v279_v56 = vpack.c.bf16 %v221_v45, %v220_v44 }
  0x6f   : > { %6904 = vst [vmem:[#allocation32_spill] sm:$0xff] %v4770_v39  ;;  %v286_v43 = vpack.c.bf16 %v235_v37, %v234_v36  ;;  %v237_v49 = vld [vmem:[%s4612_s23 + $0xd8] sm:$0xff]  ;;  %v344_v50 = vld [vmem:[%s4620_s6 + $0x130] sm:$0xff]  ;;  %v222_v57 = vld [vmem:[%s4612_s23 + $0x60] sm:$0xff] }
  0x70   : > { %v345_v51 = vld [vmem:[%s4620_s6 + $0x138] sm:$0xff]  ;;  %v360_v54 = vld [vmem:[%s4620_s6 + $0x1b0] sm:$0xff]  ;;  %v223_v60 = vld [vmem:[%s4612_s23 + $0x68] sm:$0xff]  ;;  %v287_v61 = vpack.c.bf16 %v237_v49, %v236_v48 }
  0x71   : > { %v361_v55 = vld [vmem:[%s4620_s6 + $0x1b8] sm:$0xff]  ;;  %v238_v62 = vld [vmem:[%s4612_s23 + $0xe0] sm:$0xff]  ;;  %v239_v63 = vld [vmem:[%s4612_s23 + $0xe8] sm:$0xff]  ;;  %v4788_v0 = vpack.c.bf16 %v345_v51, %v344_v50  ;;  %v280_v2 = vpack.c.bf16 %v223_v60, %v222_v57 }
  0x72   : > { %v4790_v1 = vpack.c.bf16 %v361_v55, %v360_v54  ;;  %v224_v5 = vld [vmem:[%s4612_s23 + $0x70] sm:$0xff]  ;;  %v225_v6 = vld [vmem:[%s4612_s23 + $0x78] sm:$0xff]  ;;  %v346_v12 = vld [vmem:[%s4620_s6 + $0x140] sm:$0xff] }
  0x73   : > { %3723 = vmatpush3.bf16.xpose.msra.mxu0 %v4668_v28  ;;  %6905 = vst [vmem:[#allocation33_spill] sm:$0xff] %v4788_v0  ;;  %v240_v9 = vld [vmem:[%s4612_s23 + $0xf0] sm:$0xff]  ;;  %v347_v13 = vld [vmem:[%s4620_s6 + $0x148] sm:$0xff]  ;;  %v281_v20 = vpack.c.bf16 %v225_v6, %v224_v5  ;;  %v242_v21 = vld [vmem:[%s4612_s23 + $0x100] sm:$0xff] }
  0x74   : > { %3755 = vmatpush3.bf16.xpose.msra.mxu1 %v4670_v29  ;;  %3724 = vmatprep.subr.bf16.mxu0 %v4680_v34  ;;  %6906 = vst [vmem:[#allocation34_spill] sm:$0xff] %v4790_v1  ;;  %v243_v22 = vld [vmem:[%s4612_s23 + $0x108] sm:$0xff]  ;;  %v258_v24 = vld [vmem:[%s4612_s23 + $0x180] sm:$0xff]  ;;  %v4808_v26 = vpack.c.bf16 %v347_v13, %v346_v12  ;;  %v348_v32 = vld [vmem:[%s4620_s6 + $0x150] sm:$0xff] }
  0x75   : > { %3756 = vmatprep.subr.bf16.mxu1 %v4682_v35  ;;  %v259_v25 = vld [vmem:[%s4612_s23 + $0x188] sm:$0xff]  ;;  %v290_v30 = vpack.c.bf16 %v243_v22, %v242_v21  ;;  %v364_v36 = vld [vmem:[%s4620_s6 + $0x1d0] sm:$0xff]  ;;  %v365_v37 = vld [vmem:[%s4620_s6 + $0x1d8] sm:$0xff] }
  0x76   : > { %6907 = vst [vmem:[#allocation35_spill] sm:$0xff] %v4808_v26  ;;  %v298_v31 = vpack.c.bf16 %v259_v25, %v258_v24  ;;  %v350_v44 = vld [vmem:[%s4620_s6 + $0x160] sm:$0xff]  ;;  %v351_v45 = vld [vmem:[%s4620_s6 + $0x168] sm:$0xff]  ;;  %v352_v54 = vld [vmem:[%s4620_s6 + $0x170] sm:$0xff] }
  0x77   : > { %v366_v48 = vld [vmem:[%s4620_s6 + $0x1e0] sm:$0xff]  ;;  %v367_v49 = vld [vmem:[%s4620_s6 + $0x1e8] sm:$0xff]  ;;  %v4832_v50 = vpack.c.bf16 %v351_v45, %v350_v44  ;;  %v353_v55 = vld [vmem:[%s4620_s6 + $0x178] sm:$0xff] }
  0x78   : > { %v4834_v51 = vpack.c.bf16 %v367_v49, %v366_v48  ;;  %v369_v57 = vld [vmem:[%s4620_s6 + $0x1f8] sm:$0xff]  ;;  %v4844_v60 = vpack.c.bf16 %v353_v55, %v352_v54  ;;  %v246_v5 = vld [vmem:[%s4612_s23 + $0x120] sm:$0xff]  ;;  %v247_v6 = vld [vmem:[%s4612_s23 + $0x128] sm:$0xff] }
  0x79   : > { %6911 = vst [vmem:[#allocation39_spill] sm:$0xff] %v4832_v50  ;;  %v249_v21 = vld [vmem:[%s4612_s23 + $0x138] sm:$0xff]  ;;  %v264_v22 = vld [vmem:[%s4612_s23 + $0x1b0] sm:$0xff]  ;;  %v250_v24 = vld [vmem:[%s4612_s23 + $0x140] sm:$0xff] }
  0x7a   : > { %6912 = vst [vmem:[#allocation40_spill] sm:$0xff] %v4834_v51  ;;  %6913 = vst [vmem:[#allocation41_spill] sm:$0xff] %v4844_v60  ;;  %v251_v25 = vld [vmem:[%s4612_s23 + $0x148] sm:$0xff]  ;;  %v252_v44 = vld [vmem:[%s4612_s23 + $0x150] sm:$0xff] }
  0x7b   : > { %3725 = vmatpush3.bf16.xpose.msra.mxu0 %v4680_v34  ;;  %v253_v45 = vld [vmem:[%s4612_s23 + $0x158] sm:$0xff]  ;;  %v268_v48 = vld [vmem:[%s4612_s23 + $0x1d0] sm:$0xff]  ;;  %v254_v54 = vld [vmem:[%s4612_s23 + $0x160] sm:$0xff] }
  0x7c   : > { %3757 = vmatpush3.bf16.xpose.msra.mxu1 %v4682_v35  ;;  %3726 = vmatprep.subr.bf16.mxu0 %v4692_v40  ;;  %v269_v49 = vld [vmem:[%s4612_s23 + $0x1d8] sm:$0xff]  ;;  %v255_v55 = vld [vmem:[%s4612_s23 + $0x168] sm:$0xff] }
  0x7d   : > { %3758 = vmatprep.subr.bf16.mxu1 %v4694_v41 }
  0x83   : > { %3727 = vmatpush3.bf16.xpose.msra.mxu0 %v4692_v40 }
  0x84   : > { %3759 = vmatpush3.bf16.xpose.msra.mxu1 %v4694_v41  ;;  %3728 = vmatprep.subr.bf16.mxu0 %v4704_v46 }
  0x85   : > { %3760 = vmatprep.subr.bf16.mxu1 %v4706_v47 }
  0x8b   : > { %3729 = vmatpush3.bf16.xpose.msra.mxu0 %v4704_v46 }
  0x8c   : > { %3761 = vmatpush3.bf16.xpose.msra.mxu1 %v4706_v47  ;;  %3730 = vmatprep.subr.bf16.mxu0 %v4716_v52 }
  0x8d   : > { %3762 = vmatprep.subr.bf16.mxu1 %v4718_v53 }
  0x93   : > { %3731 = vmatpush3.bf16.xpose.msra.mxu0 %v4716_v52 }
  0x94   : > { %3763 = vmatpush3.bf16.xpose.msra.mxu1 %v4718_v53  ;;  %3780 = vmatprep.subr.bf16.mxu0 %v4728_v58 }
  0x95   : > { %3812 = vmatprep.subr.bf16.mxu1 %v4730_v59 }
  0x9a   : > { %3733 = vmatmul.mubr.bf16.vlgmr.msra.gmra.mrb[0].mxu0 %v275_v4  ;;  %v288_v4 = vpack.c.bf16 %v239_v63, %v238_v62  ;;  %v244_v62 = vld [vmem:[%s4612_s23 + $0x110] sm:$0xff]  ;;  %v245_v63 = vld [vmem:[%s4612_s23 + $0x118] sm:$0xff] }
  0x9b   : > { %3765 = vmatmul.mubr.bf16.vlgmr.msra.gmra.mrb[0].mxu1 %v283_v10  ;;  %3781 = vmatpush3.bf16.xpose.msra.mxu0 %v4728_v58  ;;  %v241_v10 = vld [vmem:[%s4612_s23 + $0xf8] sm:$0xff]  ;;  %v291_v12 = vpack.c.bf16 %v245_v63, %v244_v62  ;;  %v295_v62 = vpack.c.bf16 %v253_v45, %v252_v44  ;;  %v303_v63 = vpack.c.bf16 %v269_v49, %v268_v48 }
  0x9c   : > { %3813 = vmatpush3.bf16.xpose.msra.mxu1 %v4730_v59  ;;  %3782 = vmatprep.subr.bf16.mxu0 %v4748_v14  ;;  %v289_v23 = vpack.c.bf16 %v241_v10, %v240_v9  ;;  %v262_v9 = vld [vmem:[%s4612_s23 + $0x1a0] sm:$0xff]  ;;  %v263_v10 = vld [vmem:[%s4612_s23 + $0x1a8] sm:$0xff] }
  0x9d   : > { %3814 = vmatprep.subr.bf16.mxu1 %v4750_v15  ;;  %3736 = vmatprep.mubr.bf16.mxu0 %v276_v18  ;;  %v362_v18 = vld [vmem:[%s4620_s6 + $0x1c0] sm:$0xff] }
  0x9e   : > { %3768 = vmatprep.mubr.bf16.mxu1 %v284_v19  ;;  %v363_v19 = vld [vmem:[%s4620_s6 + $0x1c8] sm:$0xff] }
  0xa2   : > { %3737 = vmatmul.mubr.bf16.gmra.mrb[4].mxu0 %v277_v27  ;;  %v4810_v27 = vpack.c.bf16 %v363_v19, %v362_v18  ;;  %v292_v18 = vpack.c.bf16 %v247_v6, %v246_v5  ;;  %v300_v19 = vpack.c.bf16 %v263_v10, %v262_v9  ;;  %v256_v5 = vld [vmem:[%s4612_s23 + $0x170] sm:$0xff]  ;;  %v257_v6 = vld [vmem:[%s4612_s23 + $0x178] sm:$0xff] }
  0xa3   : > { %3783 = vmatpush3.bf16.xpose.msra.mxu0 %v4748_v14  ;;  %3769 = vmatmul.mubr.bf16.gmra.mrb[4].mxu1 %v285_v33  ;;  %v349_v33 = vld [vmem:[%s4620_s6 + $0x158] sm:$0xff]  ;;  %v272_v9 = vld [vmem:[%s4612_s23 + $0x1f0] sm:$0xff] }
  0xa4   : > { %3815 = vmatpush3.bf16.xpose.msra.mxu1 %v4750_v15  ;;  %3784 = vmatprep.subr.bf16.mxu0 %v4768_v38  ;;  %6908 = vst [vmem:[#allocation36_spill] sm:$0xff] %v4810_v27  ;;  %v273_v10 = vld [vmem:[%s4612_s23 + $0x1f8] sm:$0xff] }
  0xa5   : > { %3816 = vmatprep.subr.bf16.mxu1 %v4770_v39  ;;  %3740 = vmatprep.mubr.bf16.mxu0 %v278_v42  ;;  %v4820_v42 = vpack.c.bf16 %v349_v33, %v348_v32 }
  0xa6   : > { %3772 = vmatprep.mubr.bf16.mxu1 %v286_v43  ;;  %v4822_v43 = vpack.c.bf16 %v365_v37, %v364_v36  ;;  %v294_v36 = vpack.c.bf16 %v251_v25, %v250_v24 }
  0xa7   : > { %6909 = vst [vmem:[#allocation37_spill] sm:$0xff] %v4820_v42 }
  0xa8   : > { %6910 = vst [vmem:[#allocation38_spill] sm:$0xff] %v4822_v43 }
  0xaa   : > { %3741 = vmatmul.mubr.bf16.gmra.mrb[8].mxu0 %v279_v56  ;;  %v368_v56 = vld [vmem:[%s4620_s6 + $0x1f0] sm:$0xff] }
  0xab   : > { %3785 = vmatpush3.bf16.xpose.msra.mxu0 %v4768_v38  ;;  %3773 = vmatmul.mubr.bf16.gmra.mrb[8].mxu1 %v287_v61  ;;  %v4846_v61 = vpack.c.bf16 %v369_v57, %v368_v56  ;;  %v270_v56 = vld [vmem:[%s4612_s23 + $0x1e0] sm:$0xff]  ;;  %v271_v57 = vld [vmem:[%s4612_s23 + $0x1e8] sm:$0xff] }
  0xac   : > { %3817 = vmatpush3.bf16.xpose.msra.mxu1 %v4770_v39  ;;  %3786 = vmatprep.subr.bf16.mxu0 %v4788_v0 }
  0xad   : > { %3818 = vmatprep.subr.bf16.mxu1 %v4790_v1  ;;  %3744 = vmatprep.mubr.bf16.mxu0 %v280_v2  ;;  %6914 = vst [vmem:[#allocation42_spill] sm:$0xff] %v4846_v61  ;;  %v260_v2 = vld [vmem:[%s4612_s23 + $0x190] sm:$0xff] }
  0xae   : > { %3776 = vmatprep.mubr.bf16.mxu1 %v288_v4  ;;  %v261_v4 = vld [vmem:[%s4612_s23 + $0x198] sm:$0xff] }
  0xaf   : > { %v299_v13 = vpack.c.bf16 %v261_v4, %v260_v2  ;;  %v296_v2 = vpack.c.bf16 %v255_v55, %v254_v54  ;;  %v304_v4 = vpack.c.bf16 %v271_v57, %v270_v56 }
  0xb2   : > { %3745 = vmatmul.mubr.bf16.gmra.mrb[12].mxu0 %v281_v20  ;;  %v248_v20 = vld [vmem:[%s4612_s23 + $0x130] sm:$0xff] }
  0xb3   : > { %3787 = vmatpush3.bf16.xpose.msra.mxu0 %v4788_v0  ;;  %3777 = vmatmul.mubr.bf16.gmra.mrb[12].mxu1 %v289_v23  ;;  %v265_v23 = vld [vmem:[%s4612_s23 + $0x1b8] sm:$0xff]  ;;  %v293_v32 = vpack.c.bf16 %v249_v21, %v248_v20 }
  0xb4   : > { %3819 = vmatpush3.bf16.xpose.msra.mxu1 %v4790_v1  ;;  %3788 = vmatprep.subr.bf16.mxu0 %v4808_v26  ;;  %v301_v33 = vpack.c.bf16 %v265_v23, %v264_v22 }
  0xb5   : > { %3820 = vmatprep.subr.bf16.mxu1 %v4810_v27  ;;  %3796 = vmatprep.mubr.bf16.mxu0 %v290_v30  ;;  %v266_v30 = vld [vmem:[%s4612_s23 + $0x1c0] sm:$0xff] }
  0xb6   : > { %3828 = vmatprep.mubr.bf16.mxu1 %v298_v31  ;;  %v267_v31 = vld [vmem:[%s4612_s23 + $0x1c8] sm:$0xff] }
  0xb7   : > { %v302_v37 = vpack.c.bf16 %v267_v31, %v266_v30 }
  0xbb   : > { %3789 = vmatpush3.bf16.xpose.msra.mxu0 %v4808_v26 }
  0xbc   : > { %3821 = vmatpush3.bf16.xpose.msra.mxu1 %v4810_v27  ;;  %3790 = vmatprep.subr.bf16.mxu0 %v4820_v42 }
  0xbd   : > { %3822 = vmatprep.subr.bf16.mxu1 %v4822_v43 }
  0xc3   : > { %3791 = vmatpush3.bf16.xpose.msra.mxu0 %v4820_v42 }
  0xc4   : > { %3823 = vmatpush3.bf16.xpose.msra.mxu1 %v4822_v43  ;;  %3792 = vmatprep.subr.bf16.mxu0 %v4832_v50 }
  0xc5   : > { %3824 = vmatprep.subr.bf16.mxu1 %v4834_v51 }
  0xcb   : > { %3793 = vmatpush3.bf16.xpose.msra.mxu0 %v4832_v50 }
  0xcc   : > { %3825 = vmatpush3.bf16.xpose.msra.mxu1 %v4834_v51  ;;  %3794 = vmatprep.subr.bf16.mxu0 %v4844_v60 }
  0xcd   : > { %3826 = vmatprep.subr.bf16.mxu1 %v4846_v61 }
  0xd3   : > { %3795 = vmatpush3.bf16.xpose.msra.mxu0 %v4844_v60 }
  0xd4   : > { %3827 = vmatpush3.bf16.xpose.msra.mxu1 %v4846_v61 }
  0xda   : > { %3797 = vmatmul.mubr.bf16.vlgmr.msra.gmra.mrb[16].mxu0 %v291_v12  ;;  %v297_v12 = vpack.c.bf16 %v257_v6, %v256_v5 }
  0xdb   : > { %3829 = vmatmul.mubr.bf16.vlgmr.msra.gmra.mrb[16].mxu1 %v299_v13  ;;  %3800 = vmatprep.mubr.bf16.mxu0 %v292_v18  ;;  %v305_v13 = vpack.c.bf16 %v273_v10, %v272_v9 }
  0xdc   : > { %3832 = vmatprep.mubr.bf16.mxu1 %v300_v19 }
  0xe2   : > { %3801 = vmatmul.mubr.bf16.gmra.mrb[20].mxu0 %v293_v32 }
  0xe3   : > { %3833 = vmatmul.mubr.bf16.gmra.mrb[20].mxu1 %v301_v33  ;;  %3804 = vmatprep.mubr.bf16.mxu0 %v294_v36 }
  0xe4   : > { %3836 = vmatprep.mubr.bf16.mxu1 %v302_v37 }
  0xea   : > { %3805 = vmatmul.mubr.bf16.gmra.mrb[24].mxu0 %v295_v62 }
  0xeb   : > { %3837 = vmatmul.mubr.bf16.gmra.mrb[24].mxu1 %v303_v63  ;;  %3808 = vmatprep.mubr.bf16.mxu0 %v296_v2 }
  0xec   : > { %3840 = vmatprep.mubr.bf16.mxu1 %v304_v4 }
  0xf2   : > { %3809 = vmatmul.mubr.bf16.gmra.mrb[28].mxu0 %v297_v12 }
  0xf3   : > { %3841 = vmatmul.mubr.bf16.gmra.mrb[28].mxu1 %v305_v13  ;;  %3860 = vmatprep.mubr.bf16.mxu0 %v4629_v3 }
  0xf4   : > { %3892 = vmatprep.mubr.bf16.mxu1 %v4634_v7 }
 0x16d   : > { %v4884_v18 = vpop.f32.mrb[0].mxu0 }
 0x16e   : > { %v4886_v19 = vpop.f32.mrb[0].mxu1  ;;  %794 = vmax.xlane.f32.xlu0 %v4884_v18  ;;  %v4889_v20 = vpop.f32.mrb[1].mxu0 }
 0x16f   : > { %v4891_v21 = vpop.f32.mrb[1].mxu1  ;;  %v4893_v22 = vpop.f32.mrb[2].mxu0 }
 0x170   : > { %822 = vmax.xlane.f32.xlu1 %v4891_v21  ;;  %v4896_v23 = vpop.f32.mrb[2].mxu1  ;;  %v4898_v24 = vpop.f32.mrb[3].mxu0 }
 0x171   : > { %v4900_v3 = vpop.f32.mrb[3].mxu1 }
 0x172   : > { %826 = vmax.xlane.f32.xlu0 %v4886_v19 }
 0x174   : > { %796 = vmax.xlane.f32.xlu1 %v4893_v22 }
 0x175   : > { %v4904_v7 = vpop.f32.mrb[4].mxu0 }
 0x176   : > { %790 = vmax.xlane.f32.xlu0 %v4889_v20  ;;  %v4907_v25 = vpop.f32.mrb[5].mxu0  ;;  %v4909_v30 = vpop.f32.mrb[4].mxu1 }
 0x177   : > { %v4911_v31 = vpop.f32.mrb[6].mxu0  ;;  %v4913_v32 = vpop.f32.mrb[5].mxu1 }
 0x178   : > { %828 = vmax.xlane.f32.xlu1 %v4896_v23  ;;  %v4916_v33 = vpop.f32.mrb[7].mxu0  ;;  %v4918_v36 = vpop.f32.mrb[6].mxu1 }
 0x179   : > { %v4920_v37 = vpop.f32.mrb[7].mxu1 }
 0x17a   : > { %792 = vmax.xlane.f32.xlu0 %v4898_v24 }
 0x17c   : > { %824 = vmax.xlane.f32.xlu1 %v4900_v3 }
 0x17d   : > { %v4924_v44 = vpop.f32.mrb[8].mxu0 }
 0x17e   : > { %802 = vmax.xlane.f32.xlu0 %v4904_v7  ;;  %v4927_v45 = vpop.f32.mrb[9].mxu0  ;;  %v4929_v48 = vpop.f32.mrb[8].mxu1 }
 0x17f   : > { %v4931_v49 = vpop.f32.mrb[10].mxu0  ;;  %v4933_v54 = vpop.f32.mrb[9].mxu1 }
 0x180   : > { %804 = vmax.xlane.f32.xlu1 %v4911_v31  ;;  %v4936_v55 = vpop.f32.mrb[11].mxu0  ;;  %v4938_v56 = vpop.f32.mrb[10].mxu1 }
 0x181   : > { %v4940_v57 = vpop.f32.mrb[11].mxu1 }
 0x182   : > { %834 = vmax.xlane.f32.xlu0 %v4909_v30 }
 0x184   : > { %836 = vmax.xlane.f32.xlu1 %v4918_v36 }
 0x185   : > { %v4944_v62 = vpop.f32.mrb[12].mxu0 }
 0x186   : > { %798 = vmax.xlane.f32.xlu0 %v4907_v25  ;;  %v4947_v63 = vpop.f32.mrb[13].mxu0  ;;  %v4949_v2 = vpop.f32.mrb[12].mxu1 }
 0x187   : > { %v4951_v4 = vpop.f32.mrb[14].mxu0  ;;  %v4953_v5 = vpop.f32.mrb[13].mxu1 }
 0x188   : > { %800 = vmax.xlane.f32.xlu1 %v4916_v33  ;;  %v4956_v6 = vpop.f32.mrb[15].mxu0  ;;  %v4958_v9 = vpop.f32.mrb[14].mxu1 }
 0x189   : > { %v4960_v10 = vpop.f32.mrb[15].mxu1 }
 0x18a   : > { %830 = vmax.xlane.f32.xlu0 %v4913_v32 }
 0x18c   : > { %832 = vmax.xlane.f32.xlu1 %v4920_v37 }
 0x18e   : > { %810 = vmax.xlane.f32.xlu0 %v4924_v44 }
 0x190   : > { %812 = vmax.xlane.f32.xlu1 %v4931_v49 }
 0x192   : > { %842 = vmax.xlane.f32.xlu0 %v4929_v48 }
 0x194   : > { %844 = vmax.xlane.f32.xlu1 %v4938_v56 }
 0x196   : > { %806 = vmax.xlane.f32.xlu0 %v4927_v45 }
 0x198   : > { %808 = vmax.xlane.f32.xlu1 %v4936_v55 }
 0x19a   : > { %838 = vmax.xlane.f32.xlu0 %v4933_v54 }
 0x19c   : > { %840 = vmax.xlane.f32.xlu1 %v4940_v57 }
 0x19e   : > { %818 = vmax.xlane.f32.xlu0 %v4944_v62 }
 0x1a0   : > { %820 = vmax.xlane.f32.xlu1 %v4951_v4 }
 0x1a2   : > { %850 = vmax.xlane.f32.xlu0 %v4949_v2 }
 0x1a4   : > { %852 = vmax.xlane.f32.xlu1 %v4958_v9 }
 0x1a6   : > { %814 = vmax.xlane.f32.xlu0 %v4947_v63 }
 0x1a8   : > { %816 = vmax.xlane.f32.xlu1 %v4956_v6 }
 0x1aa   : > { %846 = vmax.xlane.f32.xlu0 %v4953_v5 }
 0x1ac   : > { %848 = vmax.xlane.f32.xlu1 %v4960_v10 }
 0x1ad   : > { %v4980_v12 = vpop.f32.mrb[16].mxu0 }
 0x1ae   : > { %v4982_v13 = vpop.f32.mrb[16].mxu1  ;;  %858 = vmax.xlane.f32.xlu0 %v4980_v12  ;;  %v4985_v61 = vpop.f32.mrb[17].mxu0 }
 0x1af   : > { %v4987_v51 = vpop.f32.mrb[18].mxu0  ;;  %v4989_v43 = vpop.f32.mrb[17].mxu1 }
 0x1b0   : > { %v4991_v60 = vpop.f32.mrb[18].mxu1  ;;  %860 = vmax.xlane.f32.xlu1 %v4987_v51  ;;  %v4994_v27 = vpop.f32.mrb[19].mxu0 }
 0x1b1   : > { %v4996_v1 = vpop.f32.mrb[19].mxu1 }
 0x1b2   : > { %890 = vmax.xlane.f32.xlu0 %v4982_v13 }
 0x1b4   : > { %892 = vmax.xlane.f32.xlu1 %v4991_v60 }
 0x1b5   : > { %v5000_v50 = vpop.f32.mrb[20].mxu0 }
 0x1b6   : > { %854 = vmax.xlane.f32.xlu0 %v4985_v61  ;;  %v5003_v42 = vpop.f32.mrb[21].mxu0  ;;  %v5005_v39 = vpop.f32.mrb[20].mxu1 }
 0x1b7   : > { %v5007_v15 = vpop.f32.mrb[22].mxu0  ;;  %v5009_v26 = vpop.f32.mrb[21].mxu1 }
 0x1b8   : > { %856 = vmax.xlane.f32.xlu1 %v4994_v27  ;;  %v5012_v0 = vpop.f32.mrb[23].mxu0  ;;  %v5014_v38 = vpop.f32.mrb[22].mxu1 }
 0x1b9   : > { %v5016_v14 = vpop.f32.mrb[23].mxu1 }
 0x1ba   : > { %886 = vmax.xlane.f32.xlu0 %v4989_v43 }
 0x1bc   : > { %888 = vmax.xlane.f32.xlu1 %v4996_v1 }
 0x1bd   : > { %v5020_v59 = vpop.f32.mrb[24].mxu0 }
 0x1be   : > { %6915 = vst [vmem:[#allocation43_spill] sm:$0xff] %v5020_v59  ;;  %866 = vmax.xlane.f32.xlu0 %v5000_v50  ;;  %v5023_v53 = vpop.f32.mrb[25].mxu0  ;;  %v5025_v58 = vpop.f32.mrb[24].mxu1 }
 0x1bf   : > { %6916 = vst [vmem:[#allocation44_spill] sm:$0xff] %v5023_v53  ;;  %6917 = vst [vmem:[#allocation45_spill] sm:$0xff] %v5025_v58  ;;  %v5027_v52 = vpop.f32.mrb[26].mxu0  ;;  %v5029_v47 = vpop.f32.mrb[25].mxu1 }
 0x1c0   : > { %6918 = vst [vmem:[#allocation46_spill] sm:$0xff] %v5027_v52  ;;  %6919 = vst [vmem:[#allocation47_spill] sm:$0xff] %v5029_v47  ;;  %868 = vmax.xlane.f32.xlu1 %v5007_v15  ;;  %v5032_v41 = vpop.f32.mrb[27].mxu0  ;;  %v5034_v46 = vpop.f32.mrb[26].mxu1 }
 0x1c1   : > { %6920 = vst [vmem:[#allocation48_spill] sm:$0xff] %v5032_v41  ;;  %6921 = vst [vmem:[#allocation49_spill] sm:$0xff] %v5034_v46  ;;  %v5036_v40 = vpop.f32.mrb[27].mxu1 }
 0x1c2   : > { %6922 = vst [vmem:[#allocation50_spill] sm:$0xff] %v5036_v40  ;;  %898 = vmax.xlane.f32.xlu0 %v5005_v39 }
 0x1c4   : > { %900 = vmax.xlane.f32.xlu1 %v5014_v38 }
 0x1c5   : > { %v5040_v35 = vpop.f32.mrb[28].mxu0 }
 0x1c6   : > { %6923 = vst [vmem:[#allocation51_spill] sm:$0xff] %v5040_v35  ;;  %862 = vmax.xlane.f32.xlu0 %v5003_v42  ;;  %v5043_v29 = vpop.f32.mrb[29].mxu0  ;;  %v5045_v34 = vpop.f32.mrb[28].mxu1 }
 0x1c7   : > { %6924 = vst [vmem:[#allocation52_spill] sm:$0xff] %v5043_v29  ;;  %6925 = vst [vmem:[#allocation53_spill] sm:$0xff] %v5045_v34  ;;  %v5047_v28 = vpop.f32.mrb[30].mxu0  ;;  %v5049_v17 = vpop.f32.mrb[29].mxu1 }
 0x1c8   : > { %6926 = vst [vmem:[#allocation54_spill] sm:$0xff] %v5047_v28  ;;  %6927 = vst [vmem:[#allocation55_spill] sm:$0xff] %v5049_v17  ;;  %864 = vmax.xlane.f32.xlu1 %v5012_v0  ;;  %v5052_v11 = vpop.f32.mrb[31].mxu0  ;;  %v5054_v16 = vpop.f32.mrb[30].mxu1 }
 0x1c9   : > { %6928 = vst [vmem:[#allocation56_spill] sm:$0xff] %v5052_v11  ;;  %6929 = vst [vmem:[#allocation57_spill] sm:$0xff] %v5054_v16  ;;  %v5056_v8 = vpop.f32.mrb[31].mxu1 }
 0x1ca   : > { %6930 = vst [vmem:[#allocation58_spill] sm:$0xff] %v5056_v8  ;;  %894 = vmax.xlane.f32.xlu0 %v5009_v26 }
 0x1cc   : > { %896 = vmax.xlane.f32.xlu1 %v5016_v14 }
 0x1ce   : > { %874 = vmax.xlane.f32.xlu0 %v5020_v59 }
 0x1d0   : > { %876 = vmax.xlane.f32.xlu1 %v5027_v52 }
 0x1d2   : > { %906 = vmax.xlane.f32.xlu0 %v5025_v58 }
 0x1d4   : > { %908 = vmax.xlane.f32.xlu1 %v5034_v46 }
 0x1d6   : > { %870 = vmax.xlane.f32.xlu0 %v5023_v53 }
 0x1d8   : > { %872 = vmax.xlane.f32.xlu1 %v5032_v41 }
 0x1da   : > { %902 = vmax.xlane.f32.xlu0 %v5029_v47 }
 0x1dc   : > { %904 = vmax.xlane.f32.xlu1 %v5036_v40 }
 0x1de   : > { %882 = vmax.xlane.f32.xlu0 %v5040_v35 }
 0x1e0   : > { %884 = vmax.xlane.f32.xlu1 %v5047_v28 }
 0x1e2   : > { %914 = vmax.xlane.f32.xlu0 %v5045_v34 }
 0x1e4   : > { %916 = vmax.xlane.f32.xlu1 %v5054_v16 }
 0x1e6   : > { %878 = vmax.xlane.f32.xlu0 %v5043_v29 }
 0x1e8   : > { %880 = vmax.xlane.f32.xlu1 %v5052_v11 }
 0x1ea   : > { %910 = vmax.xlane.f32.xlu0 %v5049_v17 }
 0x1ec   : > { %912 = vmax.xlane.f32.xlu1 %v5056_v8 }
 0x1fb   : > { %v795_v41 = vpop.xlane.xlu0 %794 }
 0x1fc   : > { %v920_v47 = vsub.f32 %v4884_v18, %v795_v41 }
 0x1fd   : > { %v823_v40 = vpop.xlane.xlu1 %822 }
 0x1fe   : > { %v984_v53 = vmul.f32 0.088388346, %v920_v47  ;;  %v934_v34 = vsub.f32 %v4891_v21, %v823_v40 }
 0x1ff   : > { %v827_v35 = vpop.xlane.xlu0 %826 }
 0x200   : > { %v1050_v46 = vmul.f32 1.442695, %v984_v53  ;;  %v936_v28 = vsub.f32 %v4886_v19, %v827_v35  ;;  %v998_v59 = vmul.f32 0.088388346, %v934_v34 }
 0x201   : > { %v797_v16 = vpop.xlane.xlu1 %796 }
 0x202   : > { %4027 = vpow2.f32 %v1050_v46  ;;  %v1000_v29 = vmul.f32 0.088388346, %v936_v28  ;;  %v921_v11 = vsub.f32 %v4893_v22, %v797_v16  ;;  %v1078_v46 = vmul.f32 1.442695, %v998_v59 }
 0x203   : > { %v791_v58 = vpop.xlane.xlu0 %790 }
 0x204   : > { %v1082_v17 = vmul.f32 1.442695, %v1000_v29  ;;  %v985_v52 = vmul.f32 0.088388346, %v921_v11  ;;  %v918_v8 = vsub.f32 %v4889_v20, %v791_v58 }
 0x205   : > { %v829_v41 = vpop.xlane.xlu1 %828 }
 0x206   : > { %4029 = vpow2.f32 %v1082_v17  ;;  %v1052_v47 = vmul.f32 1.442695, %v985_v52  ;;  %v982_v18 = vmul.f32 0.088388346, %v918_v8  ;;  %v937_v53 = vsub.f32 %v4896_v23, %v829_v41 }
 0x207   : > { %v793_v35 = vpop.xlane.xlu0 %792 }
 0x208   : > { %4031 = vpow2.f32 %v1052_v47  ;;  %v1046_v40 = vmul.f32 1.442695, %v982_v18  ;;  %v1001_v19 = vmul.f32 0.088388346, %v937_v53  ;;  %v919_v28 = vsub.f32 %v4898_v24, %v793_v35 }
 0x209   : > { %v825_v16 = vpop.xlane.xlu1 %824 }
 0x20a   : > { %4033 = vpow2.f32 %v1046_v40  ;;  %v1084_v29 = vmul.f32 1.442695, %v1001_v19  ;;  %v983_v11 = vmul.f32 0.088388346, %v919_v28  ;;  %v935_v58 = vsub.f32 %v4900_v3, %v825_v16 }
 0x20b   : > { %v803_v34 = vpop.xlane.xlu0 %802 }
 0x20c   : > { %v5084_v20 = vpop.eup %4027  ;;  %4035 = vpow2.f32 %v1084_v29  ;;  %v1048_v8 = vmul.f32 1.442695, %v983_v11  ;;  %v999_v17 = vmul.f32 0.088388346, %v935_v58  ;;  %v924_v52 = vsub.f32 %v4904_v7, %v803_v34 }
 0x20d   : > { %4037 = vpow2.f32 %v1078_v46  ;;  %v805_v21 = vpop.xlane.xlu1 %804  ;;  %1178 = vadd.xlane.f32.xlu0 %v5084_v20 }
 0x20e   : > { %4039 = vpow2.f32 %v1048_v8  ;;  %v988_v59 = vmul.f32 0.088388346, %v924_v52  ;;  %v925_v22 = vsub.f32 %v4911_v31, %v805_v21  ;;  %v1080_v23 = vmul.f32 1.442695, %v999_v17 }
 0x20f   : > { %v835_v24 = vpop.xlane.xlu0 %834 }
 0x210   : > { %v5089_v41 = vpop.eup %4029  ;;  %v1058_v3 = vmul.f32 1.442695, %v988_v59  ;;  %v989_v47 = vmul.f32 0.088388346, %v925_v22  ;;  %v940_v18 = vsub.f32 %v4909_v30, %v835_v24 }
 0x211   : > { %v837_v53 = vpop.xlane.xlu1 %836  ;;  %1210 = vadd.xlane.f32.xlu0 %v5089_v41 }
 0x212   : > { %v5093_v7 = vpop.eup %4031  ;;  %4041 = vpow2.f32 %v1058_v3  ;;  %v1004_v35 = vmul.f32 0.088388346, %v940_v18  ;;  %v941_v40 = vsub.f32 %v4918_v36, %v837_v53  ;;  %v1060_v28 = vmul.f32 1.442695, %v989_v47 }
 0x213   : > { %4043 = vpow2.f32 %v1080_v23  ;;  %1180 = vadd.xlane.f32.xlu1 %v5093_v7  ;;  %v799_v31 = vpop.xlane.xlu0 %798  ;;  %v1436_v23 = vlaneseq  ;;  %v5116_v47 = vstv %s3287_s24 }
 0x214   : > { %v5097_v19 = vpop.eup %4033  ;;  %v1090_v46 = vmul.f32 1.442695, %v1004_v35  ;;  %v1005_v16 = vmul.f32 0.088388346, %v941_v40  ;;  %v922_v30 = vsub.f32 %v4907_v25, %v799_v31  ;;  %6931 = vst [vmem:[#allocation59_spill] sm:$0xff] %v5116_v47 }
 0x215   : > { %v801_v29 = vpop.xlane.xlu1 %800  ;;  %1174 = vadd.xlane.f32.xlu0 %v5097_v19  ;;  %v5118_v18 = vshrl.u32 %v1436_v23, 7 }
 0x216   : > { %v5101_v11 = vpop.eup %4035  ;;  %4045 = vpow2.f32 %v1090_v46  ;;  %v986_v58 = vmul.f32 0.088388346, %v922_v30  ;;  %v923_v36 = vsub.f32 %v4916_v33, %v801_v29  ;;  %v1092_v8 = vmul.f32 1.442695, %v1005_v16 }
 0x217   : > { %v5104_v34 = vpop.eup %4037  ;;  %1212 = vadd.xlane.f32.xlu1 %v5101_v11  ;;  %v831_v17 = vpop.xlane.xlu0 %830  ;;  %4047 = vpow2.f32 %v1060_v28  ;;  %6932 = vst [vmem:[#allocation60_spill] sm:$0xff] %v5118_v18  ;;  %v5127_v46 = vadd.s32 8, %v5118_v18  ;;  %v5130_v16 = vmul.u32 128, %v5116_v47 }
 0x218   : > { %v5107_v52 = vpop.eup %4039  ;;  %v1054_v25 = vmul.f32 1.442695, %v986_v58  ;;  %v987_v21 = vmul.f32 0.088388346, %v923_v36  ;;  %v938_v59 = vsub.f32 %v4913_v32, %v831_v17 }
 0x219   : > { %v833_v22 = vpop.xlane.xlu1 %832  ;;  %1206 = vadd.xlane.f32.xlu0 %v5104_v34  ;;  %6933 = vst [vmem:[#allocation61_spill] sm:$0xff] %v5127_v46 }
 0x21a   : > { %4049 = vpow2.f32 %v1054_v25  ;;  %v1002_v33 = vmul.f32 0.088388346, %v938_v59  ;;  %v939_v24 = vsub.f32 %v4920_v37, %v833_v22  ;;  %v1056_v53 = vmul.f32 1.442695, %v987_v21 }
 0x21b   : > { %4051 = vpow2.f32 %v1092_v8  ;;  %1176 = vadd.xlane.f32.xlu1 %v5107_v52  ;;  %v811_v3 = vpop.xlane.xlu0 %810 }
 0x21c   : > { %v5120_v32 = vpop.eup %4041  ;;  %v1086_v35 = vmul.f32 1.442695, %v1002_v33  ;;  %v1003_v40 = vmul.f32 0.088388346, %v939_v24  ;;  %v928_v31 = vsub.f32 %v4924_v44, %v811_v3  ;;  %v1459_v44 = vadd.s32 %v5130_v16, %v5118_v18 }
 0x21d   : > { %v5123_v28 = vpop.eup %4043  ;;  %v813_v37 = vpop.xlane.xlu1 %812  ;;  %1186 = vadd.xlane.f32.xlu0 %v5120_v32 }
 0x21e   : > { %4053 = vpow2.f32 %v1086_v35  ;;  %v992_v30 = vmul.f32 0.088388346, %v928_v31  ;;  %v929_v29 = vsub.f32 %v4931_v49, %v813_v37  ;;  %v1088_v58 = vmul.f32 1.442695, %v1003_v40 }
 0x21f   : > { %1208 = vadd.xlane.f32.xlu1 %v5123_v28  ;;  %v843_v36 = vpop.xlane.xlu0 %842  ;;  %4055 = vpow2.f32 %v1056_v53  ;;  %v1460_v49 = vadd.s32 %v5130_v16, %v5127_v46  ;;  %v5146_v53 = vand.u32 127, %v1436_v23  ;;  %v1523_v35 = vmul.u32 128, %v1459_v44 }
 0x220   : > { %v5136_v8 = vpop.eup %4045  ;;  %v1066_v17 = vmul.f32 1.442695, %v992_v30  ;;  %v993_v25 = vmul.f32 0.088388346, %v929_v29  ;;  %v944_v21 = vsub.f32 %v4929_v48, %v843_v36 }
 0x221   : > { %6934 = vst [vmem:[#allocation62_spill] sm:$0xff] %v5136_v8  ;;  %v845_v59 = vpop.xlane.xlu1 %844  ;;  %1218 = vadd.xlane.f32.xlu0 %v5136_v8  ;;  %v5142_v22 = vpop.eup %4047 }
 0x222   : > { %4057 = vpow2.f32 %v1066_v17  ;;  %v1008_v33 = vmul.f32 0.088388346, %v944_v21  ;;  %v945_v24 = vsub.f32 %v4938_v56, %v845_v59  ;;  %v1068_v40 = vmul.f32 1.442695, %v993_v25 }
 0x223   : > { %4059 = vpow2.f32 %v1088_v58  ;;  %1188 = vadd.xlane.f32.xlu1 %v5142_v22  ;;  %v807_v3 = vpop.xlane.xlu0 %806  ;;  %v1524_v56 = vmul.u32 128, %v1460_v49  ;;  %v5156_v58 = vadd.s32 16, %v5118_v18  ;;  %v5160_v17 = vadd.s32 24, %v5118_v18 }
 0x224   : > { %v5149_v48 = vpop.eup %4049  ;;  %v1098_v31 = vmul.f32 1.442695, %v1008_v33  ;;  %v1009_v37 = vmul.f32 0.088388346, %v945_v24  ;;  %v926_v30 = vsub.f32 %v4927_v45, %v807_v3  ;;  %v1587_v21 = vadd.s32 %v1523_v35, %v5146_v53 }
 0x225   : > { %6935 = vst [vmem:[#allocation63_spill] sm:$0xff] %v5149_v48  ;;  %v5152_v29 = vpop.eup %4051  ;;  %v809_v36 = vpop.xlane.xlu1 %808  ;;  %1182 = vadd.xlane.f32.xlu0 %v5149_v48  ;;  %6937 = vst [vmem:[#allocation65_spill] sm:$0xff] %v5156_v58  ;;  %v5164_v59 = vstv %s1651_s11 }
 0x226   : > { %6936 = vst [vmem:[#allocation64_spill] sm:$0xff] %v5152_v29  ;;  %4061 = vpow2.f32 %v1098_v31  ;;  %v990_v23 = vmul.f32 0.088388346, %v926_v30  ;;  %v927_v44 = vsub.f32 %v4936_v55, %v809_v36  ;;  %6938 = vst [vmem:[#allocation66_spill] sm:$0xff] %v5160_v17  ;;  %v1100_v25 = vmul.f32 1.442695, %v1009_v37 }
 0x227   : > { %1220 = vadd.xlane.f32.xlu1 %v5152_v29  ;;  %v839_v45 = vpop.xlane.xlu0 %838  ;;  %4063 = vpow2.f32 %v1068_v40  ;;  %v1588_v55 = vadd.s32 %v1524_v56, %v5146_v53  ;;  %v1461_v37 = vadd.s32 %v5130_v16, %v5156_v58  ;;  %v1462_v40 = vadd.s32 %v5130_v16, %v5160_v17 }
 0x228   : > { %v5166_v33 = vpop.eup %4053  ;;  %v1062_v49 = vmul.f32 1.442695, %v990_v23  ;;  %v991_v24 = vmul.f32 0.088388346, %v927_v44  ;;  %v942_v3 = vsub.f32 %v4933_v54, %v839_v45  ;;  %v1653_v23 = vadd.s32 %v5164_v59, %v1587_v21 }
 0x229   : > { %6939 = vst [vmem:[#allocation67_spill] sm:$0xff] %v5166_v33  ;;  %v841_v31 = vpop.xlane.xlu1 %840  ;;  %1214 = vadd.xlane.f32.xlu0 %v5166_v33  ;;  %v5173_v30 = vpop.eup %4055  ;;  %v1526_v21 = vmul.u32 128, %v1462_v40 }
 0x22a   : > { %6940 = vst [vmem:[#allocation68_spill] sm:$0xff] %v5173_v30  ;;  %4065 = vpow2.f32 %v1062_v49  ;;  %v1006_v35 = vmul.f32 0.088388346, %v942_v3  ;;  %v943_v36 = vsub.f32 %v4940_v57, %v841_v31  ;;  %v1064_v56 = vmul.f32 1.442695, %v991_v24 }
 0x22b   : > { %4067 = vpow2.f32 %v1100_v25  ;;  %1184 = vadd.xlane.f32.xlu1 %v5173_v30  ;;  %v819_v54 = vpop.xlane.xlu0 %818  ;;  %v1654_v57 = vadd.s32 %v5164_v59, %v1588_v55  ;;  %v1525_v25 = vmul.u32 128, %v1461_v37  ;;  %v1590_v40 = vadd.s32 %v1526_v21, %v5146_v53 }
 0x22c   : > { %v5180_v44 = vpop.eup %4057  ;;  %v1094_v45 = vmul.f32 1.442695, %v1006_v35  ;;  %v1007_v33 = vmul.f32 0.088388346, %v943_v36  ;;  %v932_v29 = vsub.f32 %v4944_v62, %v819_v54  ;;  %v3288_v35 = vshrl.u32 %v1653_v23, 16 }
 0x22d   : > { %6941 = vst [vmem:[#allocation69_spill] sm:$0xff] %v5180_v44  ;;  %v5183_v49 = vpop.eup %4059  ;;  %v821_v3 = vpop.xlane.xlu1 %820  ;;  %1194 = vadd.xlane.f32.xlu0 %v5180_v44  ;;  %v3289_v55 = vshrl.u32 %v1654_v57, 16 }
 0x22e   : > { %6942 = vst [vmem:[#allocation70_spill] sm:$0xff] %v5183_v49  ;;  %4069 = vpow2.f32 %v1094_v45  ;;  %v996_v31 = vmul.f32 0.088388346, %v932_v29  ;;  %v933_v30 = vsub.f32 %v4951_v4, %v821_v3  ;;  %v1096_v8 = vmul.f32 1.442695, %v1007_v33 }
 0x22f   : > { %1216 = vadd.xlane.f32.xlu1 %v5183_v49  ;;  %v851_v24 = vpop.xlane.xlu0 %850  ;;  %4071 = vpow2.f32 %v1064_v56  ;;  %v1589_v29 = vadd.s32 %v1525_v25, %v5146_v53  ;;  %v1845_v56 = vxor.u32 %v3288_v35, %v1653_v23  ;;  %v1656_v23 = vadd.s32 %v5164_v59, %v1590_v40 }
 0x230   : > { %v5189_v36 = vpop.eup %4061  ;;  %v1074_v62 = vmul.f32 1.442695, %v996_v31  ;;  %v997_v54 = vmul.f32 0.088388346, %v933_v30  ;;  %v948_v44 = vsub.f32 %v4949_v2, %v851_v24 }
 0x231   : > { %6943 = vst [vmem:[#allocation71_spill] sm:$0xff] %v5189_v36  ;;  %v853_v48 = vpop.xlane.xlu1 %852  ;;  %1226 = vadd.xlane.f32.xlu0 %v5189_v36  ;;  %v5194_v4 = vpop.eup %4063 }
 0x232   : > { %6944 = vst [vmem:[#allocation72_spill] sm:$0xff] %v5194_v4  ;;  %4073 = vpow2.f32 %v1074_v62  ;;  %v1012_v33 = vmul.f32 0.088388346, %v948_v44  ;;  %v949_v37 = vsub.f32 %v4958_v9, %v853_v48  ;;  %v1076_v45 = vmul.f32 1.442695, %v997_v54 }
 0x233   : > { %4075 = vpow2.f32 %v1096_v8  ;;  %1196 = vadd.xlane.f32.xlu1 %v5194_v4  ;;  %v815_v30 = vpop.xlane.xlu0 %814  ;;  %v1846_v9 = vxor.u32 %v3289_v55, %v1654_v57  ;;  %v1655_v48 = vadd.s32 %v5164_v59, %v1589_v29  ;;  %v1909_v54 = vmul.u32 2146121005, %v1845_v56 }
 0x234   : > { %v5199_v2 = vpop.eup %4065  ;;  %v1106_v3 = vmul.f32 1.442695, %v1012_v33  ;;  %v1013_v31 = vmul.f32 0.088388346, %v949_v37  ;;  %v930_v25 = vsub.f32 %v4947_v63, %v815_v30 }
 0x235   : > { %6945 = vst [vmem:[#allocation73_spill] sm:$0xff] %v5199_v2  ;;  %v5202_v24 = vpop.eup %4067  ;;  %v817_v62 = vpop.xlane.xlu1 %816  ;;  %1190 = vadd.xlane.f32.xlu0 %v5199_v2  ;;  %v1910_v29 = vmul.u32 2146121005, %v1846_v9  ;;  %v3290_v30 = vshrl.u32 %v1655_v48, 16 }
 0x236   : > { %6946 = vst [vmem:[#allocation74_spill] sm:$0xff] %v5202_v24  ;;  %4077 = vpow2.f32 %v1106_v3  ;;  %v994_v8 = vmul.f32 0.088388346, %v930_v25  ;;  %v931_v44 = vsub.f32 %v4956_v6, %v817_v62  ;;  %v1108_v21 = vmul.f32 1.442695, %v1013_v31 }
 0x237   : > { %1228 = vadd.xlane.f32.xlu1 %v5202_v24  ;;  %v847_v35 = vpop.xlane.xlu0 %846  ;;  %4079 = vpow2.f32 %v1076_v45  ;;  %v3291_v31 = vshrl.u32 %v1656_v23, 16  ;;  %v3352_v45 = vshrl.u32 %v1909_v54, 15  ;;  %v1433_v25 = vadd.s32 1, %v5116_v47 }
 0x238   : > { %v5209_v63 = vpop.eup %4069  ;;  %v1070_v33 = vmul.f32 1.442695, %v994_v8  ;;  %v995_v37 = vmul.f32 0.088388346, %v931_v44  ;;  %v946_v57 = vsub.f32 %v4953_v5, %v847_v35 }
 0x239   : > { %6947 = vst [vmem:[#allocation75_spill] sm:$0xff] %v5209_v63  ;;  %v849_v55 = vpop.xlane.xlu1 %848  ;;  %1222 = vadd.xlane.f32.xlu0 %v5209_v63  ;;  %v5213_v6 = vpop.eup %4071 }
 0x23a   : > { %6948 = vst [vmem:[#allocation76_spill] sm:$0xff] %v5213_v6  ;;  %4081 = vpow2.f32 %v1070_v33  ;;  %v1010_v40 = vmul.f32 0.088388346, %v946_v57  ;;  %v947_v3 = vsub.f32 %v4960_v10, %v849_v55  ;;  %v1072_v62 = vmul.f32 1.442695, %v995_v37 }
 0x23b   : > { %4083 = vpow2.f32 %v1108_v21  ;;  %1192 = vadd.xlane.f32.xlu1 %v5213_v6  ;;  %v859_v56 = vpop.xlane.xlu0 %858  ;;  %v3353_v10 = vshrl.u32 %v1910_v29, 15  ;;  %v1847_v21 = vxor.u32 %v3290_v30, %v1655_v48  ;;  %v5224_v57 = vmul.u32 128, %v1433_v25 }
 0x23c   : > { %v5218_v5 = vpop.eup %4073  ;;  %v1102_v8 = vmul.f32 1.442695, %v1010_v40  ;;  %v1011_v9 = vmul.f32 0.088388346, %v947_v3  ;;  %v952_v44 = vsub.f32 %v4980_v12, %v859_v56  ;;  %v5227_v6 = vxor.u32 %v3291_v31, %v1656_v23 }
 0x23d   : > { %6949 = vst [vmem:[#allocation77_spill] sm:$0xff] %v5218_v5  ;;  %v5221_v35 = vpop.eup %4075  ;;  %v861_v33 = vpop.xlane.xlu1 %860  ;;  %1202 = vadd.xlane.f32.xlu0 %v5218_v5  ;;  %v5230_v12 = vxor.u32 %v3352_v45, %v1909_v54  ;;  %v1475_v3 = vadd.s32 %v5224_v57, %v5118_v18  ;;  %v1911_v23 = vmul.u32 2146121005, %v1847_v21  ;;  %v1476_v54 = vadd.s32 %v5224_v57, %v5127_v46 }
 0x23e   : > { %6950 = vst [vmem:[#allocation78_spill] sm:$0xff] %v5221_v35  ;;  %4085 = vpow2.f32 %v1102_v8  ;;  %v1016_v55 = vmul.f32 0.088388346, %v952_v44  ;;  %v953_v63 = vsub.f32 %v4987_v51, %v861_v33  ;;  %v1104_v37 = vmul.f32 1.442695, %v1011_v9 }
 0x23f   : > { %1224 = vadd.xlane.f32.xlu1 %v5221_v35  ;;  %v891_v40 = vpop.xlane.xlu0 %890  ;;  %4087 = vpow2.f32 %v1072_v62  ;;  %v5238_v51 = vxor.u32 %v3353_v10, %v1910_v29  ;;  %v1912_v62 = vmul.u32 2146121005, %v5227_v6  ;;  %v1539_v29 = vmul.u32 128, %v1475_v3 }
 0x240   : > { %v5234_v56 = vpop.eup %4077  ;;  %v1114_v48 = vmul.f32 1.442695, %v1016_v55  ;;  %v1017_v30 = vmul.f32 0.088388346, %v953_v63  ;;  %v968_v25 = vsub.f32 %v4982_v13, %v891_v40  ;;  %v2165_v63 = vmul.u32 2221532811, %v5230_v12 }
 0x241   : > { %6951 = vst [vmem:[#allocation79_spill] sm:$0xff] %v5234_v56  ;;  %v893_v8 = vpop.xlane.xlu1 %892  ;;  %1234 = vadd.xlane.f32.xlu0 %v5234_v56  ;;  %v5242_v31 = vpop.eup %4079  ;;  %v3354_v6 = vshrl.u32 %v1911_v23, 15  ;;  %v1477_v12 = vadd.s32 %v5224_v57, %v5156_v58 }
 0x242   : > { %6952 = vst [vmem:[#allocation80_spill] sm:$0xff] %v5242_v31  ;;  %4089 = vpow2.f32 %v1114_v48  ;;  %v1032_v45 = vmul.f32 0.088388346, %v968_v25  ;;  %v969_v9 = vsub.f32 %v4991_v60, %v893_v8  ;;  %v1116_v33 = vmul.f32 1.442695, %v1017_v30 }
 0x243   : > { %4091 = vpow2.f32 %v1104_v37  ;;  %1204 = vadd.xlane.f32.xlu1 %v5242_v31  ;;  %v855_v13 = vpop.xlane.xlu0 %854  ;;  %v2166_v60 = vmul.u32 2221532811, %v5238_v51  ;;  %v1540_v37 = vmul.u32 128, %v1476_v54  ;;  %v1478_v25 = vadd.s32 %v5224_v57, %v5160_v17 }
 0x244   : > { %v5248_v44 = vpop.eup %4081  ;;  %v1146_v10 = vmul.f32 1.442695, %v1032_v45  ;;  %v1033_v21 = vmul.f32 0.088388346, %v969_v9  ;;  %v950_v55 = vsub.f32 %v4985_v61, %v855_v13  ;;  %v3416_v45 = vshrl.u32 %v2165_v63, 16 }
 0x245   : > { %6953 = vst [vmem:[#allocation81_spill] sm:$0xff] %v5248_v44  ;;  %v5251_v40 = vpop.eup %4083  ;;  %v857_v48 = vpop.xlane.xlu1 %856  ;;  %1198 = vadd.xlane.f32.xlu0 %v5248_v44  ;;  %v3355_v9 = vshrl.u32 %v1912_v62, 15  ;;  %v1603_v51 = vadd.s32 %v1539_v29, %v5146_v53 }
 0x246   : > { %6954 = vst [vmem:[#allocation82_spill] sm:$0xff] %v5251_v40  ;;  %4093 = vpow2.f32 %v1146_v10  ;;  %v1014_v3 = vmul.f32 0.088388346, %v950_v55  ;;  %v951_v30 = vsub.f32 %v4994_v27, %v857_v48  ;;  %v1148_v61 = vmul.f32 1.442695, %v1033_v21 }
 0x247   : > { %1236 = vadd.xlane.f32.xlu1 %v5251_v40  ;;  %v887_v8 = vpop.xlane.xlu0 %886  ;;  %4095 = vpow2.f32 %v1116_v33  ;;  %v3417_v27 = vshrl.u32 %v2166_v60, 16  ;;  %v5266_v48 = vxor.u32 %v3354_v6, %v1911_v23  ;;  %v1604_v21 = vadd.s32 %v1540_v37, %v5146_v53 }
 0x248   : > { %v5262_v13 = vpop.eup %4085  ;;  %v1110_v54 = vmul.f32 1.442695, %v1014_v3  ;;  %v1015_v56 = vmul.f32 0.088388346, %v951_v30  ;;  %v966_v10 = vsub.f32 %v4989_v43, %v887_v8  ;;  %v1541_v40 = vmul.u32 128, %v1477_v12 }
 0x249   : > { %6955 = vst [vmem:[#allocation83_spill] sm:$0xff] %v5262_v13  ;;  %v889_v55 = vpop.xlane.xlu1 %888  ;;  %1230 = vadd.xlane.f32.xlu0 %v5262_v13  ;;  %v5269_v44 = vpop.eup %4087  ;;  %v1542_v33 = vmul.u32 128, %v1478_v25  ;;  %v5273_v3 = vxor.u32 %v3416_v45, %v2165_v63  ;;  %v5275_v30 = vxor.u32 %v3355_v9, %v1912_v62  ;;  %v1669_v23 = vadd.s32 %v5164_v59, %v1603_v51  ;;  %v6982_v13 = vld [vmem:[#allocation44_spill] sm:$0xff] }
 0x24a   : > { %6956 = vst [vmem:[#allocation84_spill] sm:$0xff] %v5269_v44  ;;  %4097 = vpow2.f32 %v1110_v54  ;;  %v1030_v29 = vmul.f32 0.088388346, %v966_v10  ;;  %v967_v17 = vsub.f32 %v4996_v1, %v889_v55  ;;  %v1112_v37 = vmul.f32 1.442695, %v1015_v56 }
 0x24b   : > { %4099 = vpow2.f32 %v1148_v61  ;;  %1200 = vadd.xlane.f32.xlu1 %v5269_v44  ;;  %v867_v43 = vpop.xlane.xlu0 %866  ;;  %v5284_v25 = vxor.u32 %v3417_v27, %v2166_v60  ;;  %v6806_v63 = vmul.u32 2221532811, %v5266_v48  ;;  %v1670_v62 = vadd.s32 %v5164_v59, %v1604_v21  ;;  %v6997_v44 = vld [vmem:[#allocation53_spill] sm:$0xff] }
 0x24c   : > { %v5278_v6 = vpop.eup %4089  ;;  %v1142_v12 = vmul.f32 1.442695, %v1030_v29  ;;  %v1031_v8 = vmul.f32 0.088388346, %v967_v17  ;;  %v956_v54 = vsub.f32 %v5000_v50, %v867_v43  ;;  %v1605_v61 = vadd.s32 %v1541_v40, %v5146_v53 }
 0x24d   : > { %6957 = vst [vmem:[#allocation85_spill] sm:$0xff] %v5278_v6  ;;  %v5281_v10 = vpop.eup %4091  ;;  %v869_v1 = vpop.xlane.xlu1 %868  ;;  %1242 = vadd.xlane.f32.xlu0 %v5278_v6  ;;  %v1606_v17 = vadd.s32 %v1542_v33, %v5146_v53  ;;  %v2168_v51 = vmul.u32 2221532811, %v5275_v30  ;;  %v3304_v60 = vshrl.u32 %v1669_v23, 16  ;;  %v3305_v43 = vshrl.u32 %v1670_v62, 16  ;;  %v6979_v6 = vld [vmem:[#allocation49_spill] sm:$0xff] }
 0x24e   : > { %6958 = vst [vmem:[#allocation86_spill] sm:$0xff] %v5281_v10  ;;  %4101 = vpow2.f32 %v1142_v12  ;;  %v1020_v45 = vmul.f32 0.088388346, %v956_v54  ;;  %v957_v56 = vsub.f32 %v5007_v15, %v869_v1  ;;  %v1144_v50 = vmul.f32 1.442695, %v1031_v8 }
 0x24f   : > { %1232 = vadd.xlane.f32.xlu1 %v5281_v10  ;;  %v899_v9 = vpop.xlane.xlu0 %898  ;;  %4103 = vpow2.f32 %v1112_v37  ;;  %v1671_v12 = vadd.s32 %v5164_v59, %v1605_v61  ;;  %v1672_v54 = vadd.s32 %v5164_v59, %v1606_v17  ;;  %v5305_v1 = vxor.u32 %v3304_v60, %v1669_v23 }
 0x250   : > { %v5293_v55 = vpop.eup %4093  ;;  %v1122_v27 = vmul.f32 1.442695, %v1020_v45  ;;  %v1021_v21 = vmul.f32 0.088388346, %v957_v56  ;;  %v972_v40 = vsub.f32 %v5005_v39, %v899_v9  ;;  %v5308_v45 = vadd.s32 32, %v5118_v18 }
 0x251   : > { %6959 = vst [vmem:[#allocation87_spill] sm:$0xff] %v5293_v55  ;;  %v901_v29 = vpop.xlane.xlu1 %900  ;;  %1274 = vadd.xlane.f32.xlu0 %v5293_v55  ;;  %v5300_v8 = vpop.eup %4095  ;;  %v5311_v56 = vadd.s32 40, %v5118_v18  ;;  %v3418_v23 = vshrl.u32 %v6806_v63, 16  ;;  %v3419_v60 = vshrl.u32 %v2168_v51, 16  ;;  %v3306_v33 = vshrl.u32 %v1671_v12, 16 }
 0x252   : > { %6960 = vst [vmem:[#allocation88_spill] sm:$0xff] %v5300_v8  ;;  %4105 = vpow2.f32 %v1122_v27  ;;  %v1036_v30 = vmul.f32 0.088388346, %v972_v40  ;;  %v973_v37 = vsub.f32 %v5014_v38, %v901_v29  ;;  %6961 = vst [vmem:[#allocation89_spill] sm:$0xff] %v5308_v45  ;;  %v1124_v9 = vmul.f32 1.442695, %v1021_v21 }
 0x253   : > { %4107 = vpow2.f32 %v1144_v50  ;;  %1244 = vadd.xlane.f32.xlu1 %v5300_v8  ;;  %v863_v39 = vpop.xlane.xlu0 %862  ;;  %6962 = vst [vmem:[#allocation90_spill] sm:$0xff] %v5311_v56  ;;  %v5321_v29 = vxor.u32 %v3305_v43, %v1670_v62  ;;  %v1463_v55 = vadd.s32 %v5130_v16, %v5308_v45  ;;  %v1464_v63 = vadd.s32 %v5130_v16, %v5311_v56 }
 0x254   : > { %v5313_v61 = vpop.eup %4097  ;;  %v1154_v27 = vmul.f32 1.442695, %v1036_v30  ;;  %v1037_v40 = vmul.f32 0.088388346, %v973_v37  ;;  %v954_v38 = vsub.f32 %v5003_v42, %v863_v39  ;;  %v3307_v30 = vshrl.u32 %v1672_v54, 16 }
 0x255   : > { %6963 = vst [vmem:[#allocation91_spill] sm:$0xff] %v5313_v61  ;;  %v5316_v17 = vpop.eup %4099  ;;  %v865_v50 = vpop.xlane.xlu1 %864  ;;  %1238 = vadd.xlane.f32.xlu0 %v5313_v61  ;;  %v5338_v39 = vxor.u32 %v3419_v60, %v2168_v51  ;;  %v5341_v61 = vxor.u32 %v3306_v33, %v1671_v12  ;;  %v1527_v60 = vmul.u32 128, %v1463_v55 }
 0x256   : > { %6964 = vst [vmem:[#allocation92_spill] sm:$0xff] %v5316_v17  ;;  %4109 = vpow2.f32 %v1154_v27  ;;  %v1018_v15 = vmul.f32 0.088388346, %v954_v38  ;;  %v955_v21 = vsub.f32 %v5012_v0, %v865_v50  ;;  %v1156_v37 = vmul.f32 1.442695, %v1037_v40 }
 0x257   : > { %1276 = vadd.xlane.f32.xlu1 %v5316_v17  ;;  %v895_v42 = vpop.xlane.xlu0 %894  ;;  %4111 = vpow2.f32 %v1124_v9  ;;  %v6966_v40 = vmul.u32 2221532811, %v5266_v48 }
 0x258   : > { %v5330_v62 = vpop.eup %4101  ;;  %v1118_v43 = vmul.f32 1.442695, %v1018_v15  ;;  %v1019_v27 = vmul.f32 0.088388346, %v955_v21  ;;  %v970_v0 = vsub.f32 %v5009_v26, %v895_v42  ;;  %v5346_v26 = vxor.u32 %v3307_v30, %v1672_v54 }
 0x259   : > { %6965 = vst [vmem:[#allocation93_spill] sm:$0xff] %v5330_v62  ;;  %v897_v38 = vpop.xlane.xlu1 %896  ;;  %1270 = vadd.xlane.f32.xlu0 %v5330_v62  ;;  %v5336_v50 = vxor.u32 %v3418_v23, %v6966_v40  ;;  %v5343_v8 = vpop.eup %4103  ;;  %v6968_v23 = vmul.u32 2146121005, %v5305_v1  ;;  %v1528_v21 = vmul.u32 128, %v1464_v63  ;;  %v5362_v63 = vadd.s32 48, %v5118_v18 }
 0x25a   : > { %6967 = vst [vmem:[#allocation94_spill] sm:$0xff] %v5343_v8  ;;  %4113 = vpow2.f32 %v1118_v43  ;;  %v1034_v15 = vmul.f32 0.088388346, %v970_v0  ;;  %v971_v9 = vsub.f32 %v5016_v14, %v897_v38  ;;  %v1120_v33 = vmul.f32 1.442695, %v1019_v27  ;;  %v6970_v43 = vld [vmem:[#allocation43_spill] sm:$0xff] }
 0x25b   : > { %4115 = vpow2.f32 %v1156_v37  ;;  %1240 = vadd.xlane.f32.xlu1 %v5343_v8  ;;  %v875_v48 = vpop.xlane.xlu0 %874  ;;  %v3368_v51 = vshrl.u32 %v6968_v23, 15  ;;  %v6972_v54 = vmul.u32 2146121005, %v5321_v29  ;;  %v1591_v37 = vadd.s32 %v1527_v60, %v5146_v53  ;;  %6973 = vst [vmem:[#allocation96_spill] sm:$0xff] %v5362_v63  ;;  %v6974_v38 = vld [vmem:[#allocation46_spill] sm:$0xff] }
 0x25c   : > { %v5351_v42 = vpop.eup %4105  ;;  %v1150_v12 = vmul.f32 1.442695, %v1034_v15  ;;  %v1035_v40 = vmul.f32 0.088388346, %v971_v9  ;;  %v960_v0 = vsub.f32 %v6970_v43, %v875_v48  ;;  %v1592_v55 = vadd.s32 %v1528_v21, %v5146_v53 }
 0x25d   : > { %6969 = vst [vmem:[#allocation95_spill] sm:$0xff] %v5351_v42  ;;  %v5354_v17 = vpop.eup %4107  ;;  %v877_v14 = vpop.xlane.xlu1 %876  ;;  %1250 = vadd.xlane.f32.xlu0 %v5351_v42  ;;  %v3369_v30 = vshrl.u32 %v6972_v54, 15  ;;  %v1657_v43 = vadd.s32 %v5164_v59, %v1591_v37  ;;  %v5369_v54 = vadd.s32 56, %v5118_v18  ;;  %v1465_v60 = vadd.s32 %v5130_v16, %v5362_v63 }
 0x25e   : > { %6971 = vst [vmem:[#allocation43_spill] sm:$0xff] %v5354_v17  ;;  %4117 = vpow2.f32 %v1150_v12  ;;  %v1024_v27 = vmul.f32 0.088388346, %v960_v0  ;;  %v961_v15 = vsub.f32 %v6974_v38, %v877_v14  ;;  %v1152_v48 = vmul.f32 1.442695, %v1035_v40  ;;  %v6977_v14 = vld [vmem:[#allocation45_spill] sm:$0xff] }
 0x25f   : > { %1272 = vadd.xlane.f32.xlu1 %v5354_v17  ;;  %v907_v23 = vpop.xlane.xlu0 %906  ;;  %6975 = vst [vmem:[#allocation46_spill] sm:$0xff] %v5369_v54  ;;  %4119 = vpow2.f32 %v1120_v33  ;;  %v1658_v40 = vadd.s32 %v5164_v59, %v1592_v55  ;;  %v3292_v42 = vshrl.u32 %v1657_v43, 16  ;;  %v1466_v37 = vadd.s32 %v5130_v16, %v5369_v54 }
 0x260   : > { %v5373_v21 = vpop.eup %4109  ;;  %v1130_v12 = vmul.f32 1.442695, %v1024_v27  ;;  %v1025_v0 = vmul.f32 0.088388346, %v961_v15  ;;  %v976_v38 = vsub.f32 %v6977_v14, %v907_v23  ;;  %v1529_v17 = vmul.u32 128, %v1465_v60 }
 0x261   : > { %6976 = vst [vmem:[#allocation97_spill] sm:$0xff] %v5373_v21  ;;  %v909_v9 = vpop.xlane.xlu1 %908  ;;  %1282 = vadd.xlane.f32.xlu0 %v5373_v21  ;;  %v5380_v62 = vpop.eup %4111  ;;  %v1928_v27 = vmul.u32 2146121005, %v5346_v26  ;;  %v6980_v23 = vmul.u32 2146121005, %v5305_v1 }
 0x262   : > { %6978 = vst [vmem:[#allocation45_spill] sm:$0xff] %v5380_v62  ;;  %4121 = vpow2.f32 %v1130_v12  ;;  %v1040_v8 = vmul.f32 0.088388346, %v976_v38  ;;  %v977_v33 = vsub.f32 %v6979_v6, %v909_v9  ;;  %v1530_v14 = vmul.u32 128, %v1466_v37 }
 0x263   : > { %4123 = vpow2.f32 %v1152_v48  ;;  %1252 = vadd.xlane.f32.xlu1 %v5380_v62  ;;  %v871_v15 = vpop.xlane.xlu0 %870  ;;  %v5387_v55 = vxor.u32 %v3368_v51, %v6980_v23  ;;  %v1593_v21 = vadd.s32 %v1529_v17, %v5146_v53  ;;  %v1132_v10 = vmul.f32 1.442695, %v1025_v0 }
 0x264   : > { %v5390_v60 = vpop.eup %4113  ;;  %v1162_v12 = vmul.f32 1.442695, %v1040_v8  ;;  %v1041_v38 = vmul.f32 0.088388346, %v977_v33  ;;  %v958_v6 = vsub.f32 %v6982_v13, %v871_v15  ;;  %v6984_v48 = vmul.u32 2146121005, %v5321_v29 }
 0x265   : > { %6981 = vst [vmem:[#allocation49_spill] sm:$0xff] %v5390_v60  ;;  %v5393_v9 = vpop.eup %4115  ;;  %v873_v26 = vpop.xlane.xlu1 %872  ;;  %1246 = vadd.xlane.f32.xlu0 %v5390_v60  ;;  %v3293_v51 = vshrl.u32 %v1658_v40, 16  ;;  %v5400_v37 = vxor.u32 %v3292_v42, %v1657_v43  ;;  %v1594_v17 = vadd.s32 %v1530_v14, %v5146_v53  ;;  %v6985_v8 = vld [vmem:[#allocation48_spill] sm:$0xff]  ;;  %v1659_v13 = vadd.s32 %v5164_v59, %v1593_v21 }
 0x266   : > { %6983 = vst [vmem:[#allocation44_spill] sm:$0xff] %v5393_v9  ;;  %v5398_v1 = vxor.u32 %v3369_v30, %v6984_v48  ;;  %4125 = vpow2.f32 %v1162_v12  ;;  %v1022_v0 = vmul.f32 0.088388346, %v958_v6  ;;  %v959_v33 = vsub.f32 %v6985_v8, %v873_v26  ;;  %v6988_v12 = vld [vmem:[#allocation47_spill] sm:$0xff] }
 0x267   : > { %v1164_v15 = vmul.f32 1.442695, %v1041_v38  ;;  %1284 = vadd.xlane.f32.xlu1 %v5393_v9  ;;  %v903_v23 = vpop.xlane.xlu0 %902  ;;  %v2181_v62 = vmul.u32 2221532811, %v5387_v55  ;;  %v6986_v29 = vmul.u32 2146121005, %v5341_v61  ;;  %4127 = vpow2.f32 %v1132_v10 }
 0x268   : > { %v3371_v48 = vshrl.u32 %v1928_v27, 15  ;;  %v5409_v42 = vpop.eup %4117  ;;  %v1126_v43 = vmul.f32 1.442695, %v1022_v0  ;;  %v1023_v14 = vmul.f32 0.088388346, %v959_v33  ;;  %v974_v6 = vsub.f32 %v6988_v12, %v903_v23  ;;  %v6990_v10 = vld [vmem:[#allocation50_spill] sm:$0xff] }
 0x269   : > { %v3370_v30 = vshrl.u32 %v6986_v29, 15  ;;  %6987 = vst [vmem:[#allocation48_spill] sm:$0xff] %v5409_v42  ;;  %v905_v26 = vpop.xlane.xlu1 %904  ;;  %1278 = vadd.xlane.f32.xlu0 %v5409_v42  ;;  %v2182_v21 = vmul.u32 2221532811, %v5398_v1  ;;  %v5414_v38 = vxor.u32 %v3293_v51, %v1658_v40  ;;  %v1913_v55 = vmul.u32 2146121005, %v5400_v37  ;;  %v5418_v29 = vpop.eup %4119 }
 0x26a   : > { %v1660_v8 = vadd.s32 %v5164_v59, %v1594_v17  ;;  %6989 = vst [vmem:[#allocation47_spill] sm:$0xff] %v5418_v29  ;;  %4129 = vpow2.f32 %v1126_v43  ;;  %v1038_v9 = vmul.f32 0.088388346, %v974_v6  ;;  %v975_v0 = vsub.f32 %v6990_v10, %v905_v26  ;;  %v6993_v6 = vld [vmem:[#allocation51_spill] sm:$0xff] }
 0x26b   : > { %v3294_v33 = vshrl.u32 %v1659_v13, 16  ;;  %4131 = vpow2.f32 %v1164_v15  ;;  %1248 = vadd.xlane.f32.xlu1 %v5418_v29  ;;  %v883_v23 = vpop.xlane.xlu0 %882  ;;  %v3432_v12 = vshrl.u32 %v2181_v62, 16  ;;  %v6991_v1 = vmul.u32 2146121005, %v5341_v61 }
 0x26c   : > { %v5426_v51 = vxor.u32 %v3371_v48, %v1928_v27  ;;  %v5428_v37 = vpop.eup %4121  ;;  %v1128_v17 = vmul.f32 1.442695, %v1023_v14  ;;  %v1158_v42 = vmul.f32 1.442695, %v1038_v9  ;;  %v1039_v43 = vmul.f32 0.088388346, %v975_v0 }
 0x26d   : > { %v5424_v40 = vxor.u32 %v3370_v30, %v6991_v1  ;;  %6992 = vst [vmem:[#allocation50_spill] sm:$0xff] %v5428_v37  ;;  %v964_v60 = vsub.f32 %v6993_v6, %v883_v23  ;;  %v5431_v26 = vpop.eup %4123  ;;  %1258 = vadd.xlane.f32.xlu0 %v5428_v37  ;;  %v885_v15 = vpop.xlane.xlu1 %884  ;;  %v1914_v61 = vmul.u32 2146121005, %v5414_v38  ;;  %v3356_v30 = vshrl.u32 %v1913_v55, 15  ;;  %v6995_v48 = vld [vmem:[#allocation54_spill] sm:$0xff] }
 0x26e   : > { %6994 = vst [vmem:[#allocation51_spill] sm:$0xff] %v5431_v26  ;;  %v3295_v1 = vshrl.u32 %v1660_v8, 16  ;;  %4133 = vpow2.f32 %v1158_v42  ;;  %v965_v29 = vsub.f32 %v6995_v48, %v885_v15  ;;  %v5437_v14 = vxor.u32 %v3294_v33, %v1659_v13 }
 0x26f   : > { %v1028_v27 = vmul.f32 0.088388346, %v964_v60  ;;  %1280 = vadd.xlane.f32.xlu1 %v5431_v26  ;;  %v915_v9 = vpop.xlane.xlu0 %914  ;;  %v3433_v0 = vshrl.u32 %v2182_v21, 16  ;;  %v5440_v23 = vxor.u32 %v3432_v12, %v2181_v62  ;;  %v6825_v6 = vmul.u32 2221532811, %v5424_v40 }
 0x270   : > { %v5444_v37 = vpop.eup %4125  ;;  %4135 = vpow2.f32 %v1128_v17  ;;  %v1160_v38 = vmul.f32 1.442695, %v1039_v43  ;;  %v1029_v60 = vmul.f32 0.088388346, %v965_v29  ;;  %v980_v15 = vsub.f32 %v6997_v44, %v915_v9 }
 0x271   : > { %6996 = vst [vmem:[#allocation54_spill] sm:$0xff] %v5444_v37  ;;  %v1138_v42 = vmul.f32 1.442695, %v1028_v27  ;;  %1290 = vadd.xlane.f32.xlu0 %v5444_v37  ;;  %v917_v13 = vpop.xlane.xlu1 %916  ;;  %v3357_v33 = vshrl.u32 %v1914_v61, 15  ;;  %v5448_v48 = vxor.u32 %v3356_v30, %v1913_v55  ;;  %v1479_v62 = vadd.s32 %v5224_v57, %v5308_v45  ;;  %v5452_v12 = vpop.eup %4127 }
 0x272   : > { %6998 = vst [vmem:[#allocation53_spill] sm:$0xff] %v5452_v12  ;;  %v5455_v17 = vxor.u32 %v3295_v1, %v1660_v8  ;;  %v5459_v43 = vxor.u32 %v3433_v0, %v2182_v21  ;;  %v5463_v55 = vshrl.u32 %v6825_v6, 16  ;;  %v6999_v30 = vmul.u32 2221532811, %v5426_v51 }
 0x273   : > { %4137 = vpow2.f32 %v1138_v42  ;;  %1260 = vadd.xlane.f32.xlu1 %v5452_v12  ;;  %v879_v44 = vpop.xlane.xlu0 %878  ;;  %v1480_v9 = vadd.s32 %v5224_v57, %v5311_v56  ;;  %v1140_v1 = vmul.f32 1.442695, %v1029_v60  ;;  %v7001_v42 = vld [vmem:[#allocation52_spill] sm:$0xff]  ;;  %v1044_v29 = vmul.f32 0.088388346, %v980_v15 }
 0x274   : > { %v5467_v27 = vshrl.u32 %v6999_v30, 16  ;;  %v5471_v8 = vpop.eup %4129  ;;  %4139 = vpow2.f32 %v1160_v38  ;;  %v962_v10 = vsub.f32 %v7001_v42, %v879_v44  ;;  %v5478_v37 = vxor.u32 %v3357_v33, %v1914_v61  ;;  %v7003_v56 = vld [vmem:[#allocation56_spill] sm:$0xff]  ;;  %v7005_v42 = vld [vmem:[#allocation57_spill] sm:$0xff] }
 0x275   : > { %7000 = vst [vmem:[#allocation98_spill] sm:$0xff] %v5471_v8  ;;  %v5475_v0 = vpop.eup %4131  ;;  %1254 = vadd.xlane.f32.xlu0 %v5471_v8  ;;  %v881_v6 = vpop.xlane.xlu1 %880  ;;  %v1543_v12 = vmul.u32 128, %v1479_v62  ;;  %v7004_v60 = vmul.u32 2146121005, %v5437_v14  ;;  %v981_v21 = vsub.f32 %v7005_v42, %v917_v13  ;;  %v1481_v33 = vadd.s32 %v5224_v57, %v5362_v63  ;;  %v7007_v62 = vld [vmem:[#allocation55_spill] sm:$0xff] }
 0x276   : > { %7002 = vst [vmem:[#allocation52_spill] sm:$0xff] %v5475_v0  ;;  %v1026_v26 = vmul.f32 0.088388346, %v962_v10  ;;  %v963_v45 = vsub.f32 %v7003_v56, %v881_v6  ;;  %v1544_v8 = vmul.u32 128, %v1480_v9  ;;  %4141 = vpow2.f32 %v1140_v1 }
 0x277   : > { %v5485_v44 = vshrl.u32 %v7004_v60, 15  ;;  %1292 = vadd.xlane.f32.xlu1 %v5475_v0  ;;  %v911_v15 = vpop.xlane.xlu0 %910  ;;  %v1607_v61 = vadd.s32 %v1543_v12, %v5146_v53  ;;  %v1170_v60 = vmul.f32 1.442695, %v1044_v29  ;;  %v1482_v12 = vadd.s32 %v5224_v57, %v5369_v54 }
 0x278   : > { %v5492_v10 = vpop.eup %4133  ;;  %v1134_v56 = vmul.f32 1.442695, %v1026_v26  ;;  %v1027_v6 = vmul.f32 0.088388346, %v963_v45  ;;  %v978_v30 = vsub.f32 %v7007_v62, %v911_v15  ;;  %v1608_v42 = vadd.s32 %v1544_v8, %v5146_v53  ;;  %v7009_v26 = vld [vmem:[#allocation58_spill] sm:$0xff] }
 0x279   : > { %7006 = vst [vmem:[#allocation56_spill] sm:$0xff] %v5492_v10  ;;  %1286 = vadd.xlane.f32.xlu0 %v5492_v10  ;;  %v913_v13 = vpop.xlane.xlu1 %912  ;;  %v1673_v9 = vadd.s32 %v5164_v59, %v1607_v61  ;;  %v1045_v63 = vmul.f32 0.088388346, %v981_v21  ;;  %v7010_v29 = vmul.u32 2146121005, %v5455_v17 }
 0x27a   : > { %v5500_v38 = vpop.eup %4135  ;;  %4143 = vpow2.f32 %v1134_v56  ;;  %v1136_v0 = vmul.f32 1.442695, %v1027_v6  ;;  %v1042_v1 = vmul.f32 0.088388346, %v978_v30  ;;  %v979_v45 = vsub.f32 %v7009_v26, %v913_v13 }
 0x27b   : > { %7008 = vst [vmem:[#allocation57_spill] sm:$0xff] %v5500_v38  ;;  %1256 = vadd.xlane.f32.xlu1 %v5500_v38  ;;  %v5506_v15 = vshrl.u32 %v7010_v29, 15  ;;  %v1674_v8 = vadd.s32 %v5164_v59, %v1608_v42  ;;  %v3308_v61 = vshrl.u32 %v1673_v9, 16  ;;  %v1545_v56 = vmul.u32 128, %v1481_v33 }
 0x27c   : > { %4145 = vpow2.f32 %v1136_v0  ;;  %v1166_v10 = vmul.f32 1.442695, %v1042_v1  ;;  %v1043_v54 = vmul.f32 0.088388346, %v979_v45  ;;  %v1546_v6 = vmul.u32 128, %v1482_v12 }
 0x27d   : > { %v5509_v62 = vpop.eup %4137  ;;  %4147 = vpow2.f32 %v1170_v60  ;;  %v3309_v30 = vshrl.u32 %v1674_v8, 16  ;;  %v1865_v21 = vxor.u32 %v3308_v61, %v1673_v9  ;;  %v1609_v29 = vadd.s32 %v1545_v56, %v5146_v53 }
 0x27e   : > { %7011 = vst [vmem:[#allocation55_spill] sm:$0xff] %v5509_v62  ;;  %1266 = vadd.xlane.f32.xlu0 %v5509_v62  ;;  %v5512_v13 = vpop.eup %4139  ;;  %4149 = vpow2.f32 %v1166_v10  ;;  %v1168_v26 = vmul.f32 1.442695, %v1043_v54  ;;  %v5516_v42 = vadd.s32 64, %v5118_v18  ;;  %v1172_v38 = vmul.f32 1.442695, %v1045_v63 }
 0x27f   : > { %7012 = vst [vmem:[#allocation58_spill] sm:$0xff] %v5512_v13  ;;  %1288 = vadd.xlane.f32.xlu1 %v5512_v13  ;;  %v1866_v0 = vxor.u32 %v3309_v30, %v1674_v8  ;;  %v1610_v33 = vadd.s32 %v1546_v6, %v5146_v53  ;;  %v5521_v60 = vadd.s32 72, %v5118_v18  ;;  %v1675_v9 = vadd.s32 %v5164_v59, %v1609_v29 }
 0x280   : > { %7013 = vst [vmem:[#allocation99_spill] sm:$0xff] %v5516_v42  ;;  %4151 = vpow2.f32 %v1168_v26  ;;  %v1467_v54 = vadd.s32 %v5130_v16, %v5516_v42  ;;  %v5527_v10 = vadd.s32 80, %v5118_v18  ;;  %v1929_v12 = vmul.u32 2146121005, %v1865_v21  ;;  %v5532_v8 = vpop.eup %4141 }
 0x281   : > { %7014 = vst [vmem:[#allocation100_spill] sm:$0xff] %v5521_v60  ;;  %v1930_v1 = vmul.u32 2146121005, %v1866_v0  ;;  %v1676_v63 = vadd.s32 %v5164_v59, %v1610_v33  ;;  %v1468_v45 = vadd.s32 %v5130_v16, %v5521_v60  ;;  %7016 = vst [vmem:[#allocation102_spill] sm:$0xff] %v5532_v8  ;;  %v3310_v61 = vshrl.u32 %v1675_v9, 16 }
 0x282   : > { %7015 = vst [vmem:[#allocation101_spill] sm:$0xff] %v5527_v10  ;;  %v1531_v56 = vmul.u32 128, %v1467_v54  ;;  %v5535_v30 = vadd.s32 88, %v5118_v18  ;;  %v1469_v6 = vadd.s32 %v5130_v16, %v5527_v10  ;;  %4153 = vpow2.f32 %v1172_v38 }
 0x283   : > { %1268 = vadd.xlane.f32.xlu1 %v5532_v8  ;;  %v7018_v21 = vmul.u32 2146121005, %v5437_v14  ;;  %v3311_v29 = vshrl.u32 %v1676_v63, 16  ;;  %v1532_v0 = vmul.u32 128, %v1468_v45  ;;  %v1867_v62 = vxor.u32 %v3310_v61, %v1675_v9 }
 0x284   : > { %7017 = vst [vmem:[#allocation103_spill] sm:$0xff] %v5535_v30  ;;  %v5545_v33 = vpop.eup %4143  ;;  %v1595_v54 = vadd.s32 %v1531_v56, %v5146_v53  ;;  %v1470_v13 = vadd.s32 %v5130_v16, %v5535_v30  ;;  %v1533_v31 = vmul.u32 128, %v1469_v6  ;;  %v3372_v38 = vshrl.u32 %v1929_v12, 15 }
 0x285   : > { %v5543_v26 = vxor.u32 %v5485_v44, %v7018_v21  ;;  %7019 = vst [vmem:[#allocation104_spill] sm:$0xff] %v5545_v33  ;;  %1262 = vadd.xlane.f32.xlu0 %v5545_v33  ;;  %v3373_v8 = vshrl.u32 %v1930_v1, 15  ;;  %v1868_v5 = vxor.u32 %v3311_v29, %v1676_v63  ;;  %v1596_v14 = vadd.s32 %v1532_v0, %v5146_v53 }
 0x286   : > { %v5552_v44 = vpop.eup %4145  ;;  %v1931_v21 = vmul.u32 2146121005, %v1867_v62  ;;  %v1661_v45 = vadd.s32 %v5164_v59, %v1595_v54  ;;  %v1534_v58 = vmul.u32 128, %v1470_v13  ;;  %v1597_v9 = vadd.s32 %v1533_v31, %v5146_v53 }
 0x287   : > { %7020 = vst [vmem:[#allocation105_spill] sm:$0xff] %v5552_v44  ;;  %v5556_v61 = vpop.eup %4147  ;;  %1264 = vadd.xlane.f32.xlu1 %v5552_v44  ;;  %v7022_v56 = vmul.u32 2221532811, %v5424_v40  ;;  %v2170_v63 = vmul.u32 2221532811, %v5478_v37  ;;  %v1662_v0 = vadd.s32 %v5164_v59, %v1596_v14  ;;  %v2121_v37 = vxor.u32 %v3372_v38, %v1929_v12 }
 0x288   : > { %7021 = vst [vmem:[#allocation106_spill] sm:$0xff] %v5556_v61  ;;  %v1932_v29 = vmul.u32 2146121005, %v1868_v5  ;;  %v5566_v62 = vpop.eup %4149  ;;  %v7024_v13 = vmul.u32 2146121005, %v5455_v17  ;;  %v3296_v54 = vshrl.u32 %v1661_v45, 16  ;;  %v1598_v33 = vadd.s32 %v1534_v58, %v5146_v53 }
 0x289   : > { %v5562_v6 = vxor.u32 %v5463_v55, %v7022_v56  ;;  %7023 = vst [vmem:[#allocation107_spill] sm:$0xff] %v5566_v62  ;;  %v1663_v44 = vadd.s32 %v5164_v59, %v1597_v9  ;;  %1294 = vadd.xlane.f32.xlu0 %v5566_v62  ;;  %v7025_v40 = vmul.u32 2221532811, %v5448_v48  ;;  %v2171_v5 = vmul.u32 2221532811, %v5543_v26 }
 0x28a   : > { %v2108_v31 = vxor.u32 %v5506_v15, %v7024_v13  ;;  %v3297_v14 = vshrl.u32 %v1662_v0, 16  ;;  %v5577_v56 = vpop.eup %4151  ;;  %v2122_v35 = vxor.u32 %v3373_v8, %v1930_v1  ;;  %v3374_v17 = vshrl.u32 %v1931_v21, 15 }
 0x28b   : > { %v3420_v55 = vshrl.u32 %v7025_v40, 16  ;;  %7026 = vst [vmem:[#allocation108_spill] sm:$0xff] %v5577_v56  ;;  %v1853_v46 = vxor.u32 %v3296_v54, %v1661_v45  ;;  %v1664_v15 = vadd.s32 %v5164_v59, %v1598_v33  ;;  %1296 = vadd.xlane.f32.xlu1 %v5577_v56  ;;  %v7027_v9 = vmul.u32 2221532811, %v5426_v51 }
 0x28c   : > { %v3421_v40 = vshrl.u32 %v2170_v63, 16  ;;  %v3375_v26 = vshrl.u32 %v1932_v29, 15  ;;  %v2172_v12 = vmul.u32 2221532811, %v2108_v31  ;;  %v1854_v38 = vxor.u32 %v3297_v14, %v1662_v0  ;;  %v5587_v1 = vpop.eup %4153 }
 0x28d   : > { %v5585_v13 = vxor.u32 %v5467_v27, %v7027_v9  ;;  %v1917_v62 = vmul.u32 2146121005, %v1853_v46  ;;  %v3298_v24 = vshrl.u32 %v1663_v44, 16  ;;  %7028 = vst [vmem:[#allocation109_spill] sm:$0xff] %v5587_v1  ;;  %1298 = vadd.xlane.f32.xlu0 %v5556_v61  ;;  %v3422_v33 = vshrl.u32 %v2171_v5, 16 }
 0x28e   : > { %v3299_v45 = vshrl.u32 %v1664_v15, 16  ;;  %v1483_v51 = vadd.s32 %v5224_v57, %v5516_v42  ;;  %v7029_v27 = vmul.u32 2221532811, %v5448_v48  ;;  %v2185_v9 = vmul.u32 2221532811, %v2121_v37 }
 0x28f   : > { %v2186_v31 = vmul.u32 2221532811, %v2122_v35  ;;  %v2123_v0 = vxor.u32 %v3374_v17, %v1931_v21  ;;  %1300 = vadd.xlane.f32.xlu1 %v5587_v1  ;;  %v5599_v14 = vxor.u32 %v3421_v40, %v2170_v63  ;;  %v2124_v58 = vxor.u32 %v3375_v26, %v1932_v29 }
 0x290   : > { %v5595_v54 = vxor.u32 %v3420_v55, %v7029_v27  ;;  %v1484_v8 = vadd.s32 %v5224_v57, %v5521_v60  ;;  %v3423_v61 = vshrl.u32 %v2172_v12, 16  ;;  %v1918_v56 = vmul.u32 2146121005, %v1854_v38 }
 0x291   : > { %v3360_v42 = vshrl.u32 %v1917_v62, 15  ;;  %v1855_v2 = vxor.u32 %v3298_v24, %v1663_v44  ;;  %v5603_v48 = vxor.u32 %v3422_v33, %v2171_v5  ;;  %v1856_v55 = vxor.u32 %v3299_v45, %v1664_v15 }
 0x292   : > { %v1547_v37 = vmul.u32 128, %v1483_v51  ;;  %v1548_v35 = vmul.u32 128, %v1484_v8  ;;  %v3436_v17 = vshrl.u32 %v2185_v9, 16  ;;  %v3437_v27 = vshrl.u32 %v2186_v31, 16 }
 0x293   : > { %v2187_v46 = vmul.u32 2221532811, %v2123_v0  ;;  %v2188_v29 = vmul.u32 2221532811, %v2124_v58  ;;  %v5609_v38 = vxor.u32 %v3423_v61, %v2172_v12  ;;  %v3361_v24 = vshrl.u32 %v1918_v56, 15 }
 0x294   : > { %v1611_v40 = vadd.s32 %v1547_v37, %v5146_v53  ;;  %v1612_v26 = vadd.s32 %v1548_v35, %v5146_v53  ;;  %v2109_v44 = vxor.u32 %v3360_v42, %v1917_v62  ;;  %v1919_v5 = vmul.u32 2146121005, %v1855_v2 }
 0x295   : > { %v1920_v8 = vmul.u32 2146121005, %v1856_v55  ;;  %v5614_v51 = vxor.u32 %v3436_v17, %v2185_v9  ;;  %v5616_v0 = vxor.u32 %v3437_v27, %v2186_v31  ;;  %v3438_v58 = vshrl.u32 %v2187_v46, 16 }
 0x296   : > { %v1677_v33 = vadd.s32 %v5164_v59, %v1611_v40  ;;  %v1678_v45 = vadd.s32 %v5164_v59, %v1612_v26  ;;  %v1485_v37 = vadd.s32 %v5224_v57, %v5527_v10  ;;  %v3439_v61 = vshrl.u32 %v2188_v29, 16 }
 0x297   : > { %v1486_v2 = vadd.s32 %v5224_v57, %v5535_v30  ;;  %v5622_v42 = vxor.u32 %v3361_v24, %v1918_v56  ;;  %v2173_v62 = vmul.u32 2221532811, %v2109_v44  ;;  %v3362_v55 = vshrl.u32 %v1919_v5, 15 }
 0x298   : > { %v3312_v12 = vshrl.u32 %v1677_v33, 16  ;;  %v3313_v35 = vshrl.u32 %v1678_v45, 16  ;;  %v1549_v40 = vmul.u32 128, %v1485_v37  ;;  %v3363_v26 = vshrl.u32 %v1920_v8, 15 }
 0x299   : > { %v1550_v31 = vmul.u32 128, %v1486_v2  ;;  %v5628_v10 = vxor.u32 %v3438_v58, %v2187_v46  ;;  %v5630_v56 = vxor.u32 %v3439_v61, %v2188_v29  ;;  %v2174_v37 = vmul.u32 2221532811, %v5622_v42 }
 0x29a   : > { %v1869_v9 = vxor.u32 %v3312_v12, %v1677_v33  ;;  %v1870_v17 = vxor.u32 %v3313_v35, %v1678_v45  ;;  %v1179_v27 = vpop.xlane.xlu0 %1178  ;;  %v1613_v1 = vadd.s32 %v1549_v40, %v5146_v53  ;;  %v5633_v33 = vxor.u32 %v3362_v55, %v1919_v5 }
 0x29b   : > { %v1614_v45 = vadd.s32 %v1550_v31, %v5146_v53  ;;  %v3424_v35 = vshrl.u32 %v2173_v62, 16  ;;  %v2112_v2 = vxor.u32 %v3363_v26, %v1920_v8  ;;  %v5638_v21 = vadd.s32 96, %v5118_v18 }
 0x29c   : > { %v1933_v24 = vmul.u32 2146121005, %v1869_v9  ;;  %v1934_v44 = vmul.u32 2146121005, %v1870_v17  ;;  %v1679_v12 = vadd.s32 %v5164_v59, %v1613_v1  ;;  %v5642_v40 = vadd.s32 104, %v5118_v18 }
 0x29d   : > { %v1680_v29 = vadd.s32 %v5164_v59, %v1614_v45  ;;  %4155 = vrcp.f32 %v1179_v27  ;;  %v1471_v1 = vadd.s32 %v5130_v16, %v5638_v21  ;;  %v2175_v55 = vmul.u32 2221532811, %v5633_v33 }
 0x29e   : > { %v3376_v63 = vshrl.u32 %v1933_v24, 15  ;;  %v1211_v46 = vpop.xlane.xlu0 %1210  ;;  %v3377_v58 = vshrl.u32 %v1934_v44, 15  ;;  %v3314_v61 = vshrl.u32 %v1679_v12, 16  ;;  %v1472_v17 = vadd.s32 %v5130_v16, %v5642_v40 }
 0x29f   : > { %v3315_v26 = vshrl.u32 %v1680_v29, 16  ;;  %v3425_v31 = vshrl.u32 %v2174_v37, 16  ;;  %v5652_v45 = vxor.u32 %v3424_v35, %v2173_v62  ;;  %v2176_v27 = vmul.u32 2221532811, %v2112_v2 }
 0x2a0   : > { %v5645_v42 = vxor.u32 %v3376_v63, %v1933_v24  ;;  %v1181_v8 = vpop.xlane.xlu1 %1180  ;;  %v1871_v9 = vxor.u32 %v3314_v61, %v1679_v12  ;;  %v5654_v5 = vxor.u32 %v3377_v58, %v1934_v44  ;;  %v1535_v30 = vmul.u32 128, %v1471_v1 }
 0x2a1   : > { %4157 = vrcp.f32 %v1181_v8  ;;  %v1872_v63 = vxor.u32 %v3315_v26, %v1680_v29  ;;  %v1536_v36 = vmul.u32 128, %v1472_v17  ;;  %v5658_v33 = vadd.s32 112, %v5118_v18 }
 0x2a2   : > { %v1175_v15 = vpop.xlane.xlu0 %1174  ;;  %v1935_v24 = vmul.u32 2146121005, %v1871_v9  ;;  %v2189_v60 = vmul.u32 2221532811, %v5645_v42  ;;  %v5661_v12 = vadd.s32 120, %v5118_v18  ;;  %v1599_v2 = vadd.s32 %v1535_v30, %v5146_v53 }
 0x2a3   : > { %7030 = vst [vmem:[#allocation110_spill] sm:$0xff] %v5658_v33  ;;  %4159 = vrcp.f32 %v1175_v15  ;;  %v1936_v62 = vmul.u32 2146121005, %v1872_v63  ;;  %v3426_v44 = vshrl.u32 %v2175_v55, 16  ;;  %v3427_v58 = vshrl.u32 %v2176_v27, 16 }
 0x2a4   : > { %7031 = vst [vmem:[#allocation111_spill] sm:$0xff] %v5661_v12  ;;  %v1213_v61 = vpop.xlane.xlu1 %1212  ;;  %v3378_v35 = vshrl.u32 %v1935_v24, 15  ;;  %4161 = vrcp.f32 %v1211_v46  ;;  %v1600_v29 = vadd.s32 %v1536_v36, %v5146_v53  ;;  %v2190_v1 = vmul.u32 2221532811, %v5654_v5 }
 0x2a5   : > { %4163 = vrcp.f32 %v1213_v61  ;;  %v3379_v8 = vshrl.u32 %v1936_v62, 15  ;;  %v1665_v26 = vadd.s32 %v5164_v59, %v1599_v2  ;;  %v1473_v9 = vadd.s32 %v5130_v16, %v5658_v33 }
 0x2a6   : > { %v1207_v42 = vpop.xlane.xlu0 %1206  ;;  %v1666_v15 = vadd.s32 %v5164_v59, %v1600_v29  ;;  %v1474_v30 = vadd.s32 %v5130_v16, %v5661_v12  ;;  %v3440_v17 = vshrl.u32 %v2189_v60, 16  ;;  %v5672_v63 = vxor.u32 %v3378_v35, %v1935_v24 }
 0x2a7   : > { %4165 = vrcp.f32 %v1207_v42  ;;  %v5674_v36 = vxor.u32 %v3379_v8, %v1936_v62  ;;  %v3300_v61 = vshrl.u32 %v1665_v26, 16  ;;  %v4156_v5 = vpop.eup %4155  ;;  %v2444_v2 = vand.u32 2147483647, %v5630_v56 }
 0x2a8   : > { %v1177_v46 = vpop.xlane.xlu1 %1176  ;;  %v5677_v42 = vxor.u32 %v3425_v31, %v2174_v37  ;;  %v3301_v29 = vshrl.u32 %v1666_v15, 16  ;;  %v2429_v4 = vand.u32 2147483647, %v5652_v45  ;;  %v5680_v47 = vxor.u32 %v3426_v44, %v2175_v55 }
 0x2a9   : > { %4167 = vrcp.f32 %v1177_v46  ;;  %v5682_v16 = vxor.u32 %v3427_v58, %v2176_v27  ;;  %v1857_v49 = vxor.u32 %v3300_v61, %v1665_v26  ;;  %v3441_v35 = vshrl.u32 %v2190_v1, 16 }
 0x2aa   : > { %v1187_v18 = vpop.xlane.xlu0 %1186  ;;  %v1858_v62 = vxor.u32 %v3301_v29, %v1666_v15  ;;  %v1537_v8 = vmul.u32 128, %v1473_v9  ;;  %v1538_v12 = vmul.u32 128, %v1474_v30  ;;  %v7032_v46 = vand.u32 2147483647, %v5273_v3 }
 0x2ab   : > { %v4158_v24 = vpop.eup %4157  ;;  %v7035_v31 = vand.u32 2147483647, %v5284_v25  ;;  %v1368_v27 = vmul.f32 %v4156_v5, %v5084_v20  ;;  %v5697_v44 = vxor.u32 %v3440_v17, %v2189_v60  ;;  %v2191_v58 = vmul.u32 2221532811, %v5672_v63  ;;  %v7068_v17 = vld [vmem:[#allocation63_spill] sm:$0xff] }
 0x2ac   : > { %v1209_v33 = vpop.xlane.xlu1 %1208  ;;  %vm5686_vm0 = vcmp.ge.s32.totalorder %v7032_v46, 214748364  ;;  %v2192_v26 = vmul.u32 2221532811, %v5674_v36  ;;  %v1921_v15 = vmul.u32 2146121005, %v1857_v49  ;;  %v1369_v61 = vmul.f32 %v4158_v24, %v5093_v7 }
 0x2ad   : > { %vm5692_vm1 = vcmp.ge.s32.totalorder %v7035_v31, 214748364  ;;  %4169 = vrcp.f32 %v1209_v33  ;;  %v1922_v9 = vmul.u32 2146121005, %v1858_v62  ;;  %v4160_v30 = vpop.eup %4159  ;;  %v7038_v29 = vand.u32 2147483647, %v5336_v50 }
 0x2ae   : > { %4171 = vrcp.f32 %v1187_v18  ;;  %v1219_v25 = vpop.xlane.xlu0 %1218  ;;  %v7041_v60 = vand.u32 2147483647, %v5338_v39  ;;  %v1601_v33 = vadd.s32 %v1537_v8, %v5146_v53  ;;  %v4162_v18 = vpop.eup %4161  ;;  %v3364_v7 = vshrl.u32 %v1921_v15, 15  ;;  %vm3480_vm8 = vmpackc.low %vm5692_vm1, %vm5686_vm0 }
 0x2af   : > { %vm5705_vm2 = vcmp.ge.s32.totalorder %v7038_v29, 214748364  ;;  %v3365_v36 = vshrl.u32 %v1922_v9, 15  ;;  %v1602_v50 = vadd.s32 %v1538_v12, %v5146_v53  ;;  %v4164_v5 = vpop.eup %4163  ;;  %v2551_v62 = vmul.f32 1.1111112, %v1368_v27 }
 0x2b0   : > { %vm5711_vm3 = vcmp.ge.s32.totalorder %v7041_v60, 214748364  ;;  %v1189_v24 = vpop.xlane.xlu1 %1188  ;;  %v7044_v39 = vand.u32 2147483647, %v5440_v23  ;;  %v7047_v31 = vand.u32 2147483647, %v5459_v43  ;;  %v5731_v29 = vxor.u32 %v3441_v35, %v2190_v1 }
 0x2b1   : > { %v2445_v60 = vand.u32 2147483647, %v5697_v44  ;;  %v3442_v12 = vshrl.u32 %v2191_v58, 16  ;;  %v4166_v63 = vpop.eup %4165  ;;  %4173 = vrcp.f32 %v1189_v24  ;;  %v1366_v27 = vmul.f32 %v4160_v30, %v5097_v19  ;;  %vm3483_vm9 = vmpackc.low %vm5711_vm3, %vm5705_vm2 }
 0x2b2   : > { %vm5721_vm4 = vcmp.ge.s32.totalorder %v7044_v39, 214748364  ;;  %vm5727_vm5 = vcmp.ge.s32.totalorder %v7047_v31, 214748364  ;;  %v3443_v23 = vshrl.u32 %v2192_v26, 16  ;;  %v5735_v39 = vxor.u32 %v3364_v7, %v1921_v15  ;;  %v1183_v49 = vpop.xlane.xlu0 %1182 }
 0x2b3   : > { %4175 = vrcp.f32 %v1219_v25  ;;  %v2552_v3 = vmul.f32 1.1111112, %v1369_v61  ;;  %v7050_v43 = vand.u32 2147483647, %v5562_v6  ;;  %v7053_v1 = vand.u32 2147483647, %v5585_v13  ;;  %v4168_v15 = vpop.eup %4167  ;;  %vm3504_vm10 = vmpackc.low %vm5727_vm5, %vm5721_vm4 }
 0x2b4   : > { %v5749_v24 = vxor.u32 %v3365_v36, %v1922_v9  ;;  %v1667_v19 = vadd.s32 %v5164_v59, %v1601_v33  ;;  %4177 = vrcp.f32 %v1183_v49  ;;  %v1382_v30 = vmul.f32 %v4166_v63, %v5104_v34  ;;  %v1221_v61 = vpop.xlane.xlu1 %1220 }
 0x2b5   : > { %vm5739_vm6 = vcmp.ge.s32.totalorder %v7050_v43, 214748364  ;;  %vm5745_vm7 = vcmp.ge.s32.totalorder %v7053_v1, 214748364  ;;  %v1385_v6 = vmul.f32 %v4164_v5, %v5101_v11  ;;  %v1668_v25 = vadd.s32 %v5164_v59, %v1602_v50 }
 0x2b6   : > { %v1367_v7 = vmul.f32 %v4168_v15, %v5107_v52  ;;  %v1384_v13 = vmul.f32 %v4162_v18, %v5089_v41  ;;  %v5757_v43 = vxor.u32 %v3442_v12, %v2191_v58  ;;  %v3302_v1 = vshrl.u32 %v1667_v19, 16  ;;  %v1215_v34 = vpop.xlane.xlu0 %1214  ;;  %vm3507_vm13 = vmpackc.low %vm5745_vm7, %vm5739_vm6 }
 0x2b7   : > { %v2549_v9 = vmul.f32 1.1111112, %v1366_v27  ;;  %v5759_v36 = vxor.u32 %v3443_v23, %v2192_v26  ;;  %v2177_v33 = vmul.u32 2221532811, %v5735_v39  ;;  %v3303_v49 = vshrl.u32 %v1668_v25, 16  ;;  %v4170_v5 = vpop.eup %4169 }
 0x2b8   : > { %4179 = vrcp.f32 %v1221_v61  ;;  %v2550_v63 = vmul.f32 1.1111112, %v1367_v7  ;;  %v2178_v11 = vmul.u32 2221532811, %v5749_v24  ;;  %v1859_v50 = vxor.u32 %v3302_v1, %v1667_v19  ;;  %v4172_v18 = vpop.eup %4171  ;;  %v1185_v12 = vpop.xlane.xlu1 %1184 }
 0x2b9   : > { %v3484_v41 = vpack.c.bf16 %v2552_v3, %v2551_v62  ;;  %v2565_v52 = vmul.f32 1.1111112, %v1382_v30  ;;  %v2568_v58 = vmul.f32 1.1111112, %v1385_v6  ;;  %v1860_v26 = vxor.u32 %v3303_v49, %v1668_v25 }
 0x2ba   : > { %4181 = vrcp.f32 %v1215_v34  ;;  %v3481_v27 = vpack.c.bf16 %v2550_v63, %v2549_v9  ;;  %v1383_v23 = vmul.f32 %v4170_v5, %v5123_v28  ;;  %v1923_v39 = vmul.u32 2146121005, %v1859_v50  ;;  %v1195_v62 = vpop.xlane.xlu0 %1194 }
 0x2bb   : > { %4183 = vrcp.f32 %v1185_v12  ;;  %v3428_v24 = vshrl.u32 %v2177_v33, 16  ;;  %v1924_v19 = vmul.u32 2146121005, %v1860_v26  ;;  %v1487_v3 = vadd.s32 %v5224_v57, %v5638_v21  ;;  %v4174_v25 = vpop.eup %4173 }
 0x2bc   : > { %3844 = vmatprep.subr.msk.bf16.mxu0 %vm3480_vm8, %v3481_v27  ;;  %v2566_v28 = vmul.f32 1.1111112, %v1383_v23  ;;  %v3429_v15 = vshrl.u32 %v2178_v11, 16  ;;  %v3366_v30 = vshrl.u32 %v1923_v39, 15  ;;  %v1488_v6 = vadd.s32 %v5224_v57, %v5642_v40  ;;  %v1217_v37 = vpop.xlane.xlu1 %1216 }
 0x2bd   : > { %3845 = vmatpush3.bf16.msk.msra.mxu0 %vm3480_vm8, %v3481_v27  ;;  %v2567_v61 = vmul.f32 1.1111112, %v1384_v13  ;;  %v1372_v7 = vmul.f32 %v4172_v18, %v5120_v32  ;;  %v2446_v1 = vand.u32 2147483647, %v5731_v29  ;;  %v3367_v9 = vshrl.u32 %v1924_v19, 15  ;;  %v4176_v49 = vpop.eup %4175 }
 0x2be   : > { %3846 = vmatprep.subr.msk.bf16.mxu0 %vm3483_vm9, %v3484_v41  ;;  %v3505_v55 = vpack.c.bf16 %v2566_v28, %v2565_v52  ;;  %v7056_v34 = vand.u32 2147483647, %v5595_v54  ;;  %v7059_v32 = vand.u32 2147483647, %v5599_v14  ;;  %v2447_v50 = vand.u32 2147483647, %v5757_v43  ;;  %v4178_v18 = vpop.eup %4177  ;;  %v1227_v12 = vpop.xlane.xlu0 %1226 }
 0x2bf   : > { %v2448_v5 = vand.u32 2147483647, %v5759_v36  ;;  %v5811_v26 = vxor.u32 %v3366_v30, %v1923_v39  ;;  %4185 = vrcp.f32 %v1217_v37  ;;  %v5817_v54 = vxor.u32 %v3367_v9, %v1924_v19  ;;  %v7111_v43 = vld [vmem:[#allocation74_spill] sm:$0xff] }
 0x2c0   : > { %vm5799_vm11 = vcmp.ge.s32.totalorder %v7056_v34, 214748364  ;;  %vm5805_vm12 = vcmp.ge.s32.totalorder %v7059_v32, 214748364  ;;  %v1551_v14 = vmul.u32 128, %v1487_v3  ;;  %v1552_v52 = vmul.u32 128, %v1488_v6  ;;  %3876 = vmatprep.subr.msk.bf16.mxu1 %vm3504_vm10, %v3505_v55  ;;  %v1197_v20 = vpop.xlane.xlu1 %1196 }
 0x2c1   : > { %v3508_v27 = vpack.c.bf16 %v2568_v58, %v2567_v61  ;;  %v1373_v23 = vmul.f32 %v4174_v25, %v5142_v22  ;;  %v7062_v39 = vand.u32 2147483647, %v5603_v48  ;;  %v7065_v19 = vand.u32 2147483647, %v5609_v38  ;;  %3847 = vmatpush3.bf16.msk.msra.mxu0 %vm3483_vm9, %v3484_v41  ;;  %3877 = vmatpush3.bf16.msk.msra.mxu1 %vm3504_vm10, %v3505_v55  ;;  %vm3486_vm4 = vmpackc.low %vm5805_vm12, %vm5799_vm11  ;;  %v7102_v3 = vld [vmem:[#allocation73_spill] sm:$0xff]  ;;  %v7145_v58 = vld [vmem:[#allocation91_spill] sm:$0xff] }
 0x2c2   : > { %v5837_v30 = vxor.u32 %v3428_v24, %v2177_v33  ;;  %v5839_v6 = vxor.u32 %v3429_v15, %v2178_v11  ;;  %4187 = vrcp.f32 %v1195_v62  ;;  %v2555_v22 = vmul.f32 1.1111112, %v1372_v7  ;;  %v4180_v33 = vpop.eup %4179  ;;  %v7075_v24 = vld [vmem:[#allocation62_spill] sm:$0xff]  ;;  %v1191_v9 = vpop.xlane.xlu0 %1190 }
 0x2c3   : > { %vm5827_vm14 = vcmp.ge.s32.totalorder %v7062_v39, 214748364  ;;  %vm5833_vm15 = vcmp.ge.s32.totalorder %v7065_v19, 214748364  ;;  %v1615_v48 = vadd.s32 %v1551_v14, %v5146_v53  ;;  %v1616_v38 = vadd.s32 %v1552_v52, %v5146_v53  ;;  %3878 = vmatprep.subr.msk.bf16.mxu1 %vm3507_vm13, %v3508_v27 }
 0x2c4   : > { %4189 = vrcp.f32 %v1227_v12  ;;  %v1370_v8 = vmul.f32 %v4178_v18, %v7068_v17  ;;  %v7069_v46 = vand.u32 2147483647, %v5614_v51  ;;  %v7072_v41 = vand.u32 2147483647, %v5616_v0  ;;  %v4182_v7 = vpop.eup %4181  ;;  %v1229_v12 = vpop.xlane.xlu1 %1228  ;;  %vm3489_vm5 = vmpackc.low %vm5833_vm15, %vm5827_vm14 }
 0x2c5   : > { %v1388_v62 = vmul.f32 %v4176_v49, %v7075_v24  ;;  %v2179_v15 = vmul.u32 2221532811, %v5811_v26  ;;  %4191 = vrcp.f32 %v1197_v20  ;;  %v2180_v25 = vmul.u32 2221532811, %v5817_v54  ;;  %v7081_v26 = vld [vmem:[#allocation110_spill] sm:$0xff]  ;;  %v4184_v14 = vpop.eup %4183  ;;  %3879 = vmatpush3.bf16.msk.msra.mxu1 %vm3507_vm13, %v3508_v27 }
 0x2c6   : > { %vm5861_vm0 = vcmp.ge.s32.totalorder %v7069_v46, 214748364  ;;  %vm5867_vm1 = vcmp.ge.s32.totalorder %v7072_v41, 214748364  ;;  %v1681_v61 = vadd.s32 %v5164_v59, %v1615_v48  ;;  %v1682_v51 = vadd.s32 %v5164_v59, %v1616_v38  ;;  %v7084_v38 = vld [vmem:[#allocation111_spill] sm:$0xff]  ;;  %v1223_v27 = vpop.xlane.xlu0 %1222 }
 0x2c7   : > { %v2556_v37 = vmul.f32 1.1111112, %v1373_v23  ;;  %v7076_v0 = vand.u32 2147483647, %v5628_v10  ;;  %vm5884_vm3 = vcmp.ge.s32.totalorder %v2444_v2, 214748364  ;;  %v1489_v18 = vadd.s32 %v5224_v57, %v7081_v26  ;;  %vm3510_vm6 = vmpackc.low %vm5867_vm1, %vm5861_vm0 }
 0x2c8   : > { %v2433_v34 = vand.u32 2147483647, %v5837_v30  ;;  %v2434_v32 = vand.u32 2147483647, %v5839_v6  ;;  %4193 = vrcp.f32 %v1191_v9  ;;  %v7082_v10 = vld [vmem:[#allocation64_spill] sm:$0xff]  ;;  %v3316_v2 = vshrl.u32 %v1681_v61, 16 }
 0x2c9   : > { %vm5878_vm2 = vcmp.ge.s32.totalorder %v7076_v0, 214748364  ;;  %v1389_v56 = vmul.f32 %v4180_v33, %v7082_v10  ;;  %v3317_v52 = vshrl.u32 %v1682_v51, 16  ;;  %v7083_v23 = vld [vmem:[#allocation68_spill] sm:$0xff]  ;;  %v2553_v19 = vmul.f32 1.1111112, %v1370_v8  ;;  %v4186_v0 = vpop.eup %4185  ;;  %v1193_v10 = vpop.xlane.xlu1 %1192 }
 0x2ca   : > { %v1371_v39 = vmul.f32 %v4184_v14, %v7083_v23  ;;  %v2571_v48 = vmul.f32 1.1111112, %v1388_v62  ;;  %v1490_v20 = vadd.s32 %v5224_v57, %v7084_v38  ;;  %v3430_v17 = vshrl.u32 %v2179_v15, 16  ;;  %v7085_v33 = vld [vmem:[#allocation67_spill] sm:$0xff]  ;;  %vm3513_vm9 = vmpackc.low %vm5884_vm3, %vm5878_vm2 }
 0x2cb   : > { %v3431_v35 = vshrl.u32 %v2180_v25, 16  ;;  %v1873_v46 = vxor.u32 %v3316_v2, %v1681_v61  ;;  %v1874_v31 = vxor.u32 %v3317_v52, %v1682_v51  ;;  %4195 = vrcp.f32 %v1229_v12  ;;  %v7086_v51 = vld [vmem:[#allocation70_spill] sm:$0xff] }
 0x2cc   : > { %v2554_v41 = vmul.f32 1.1111112, %v1371_v39  ;;  %v1386_v24 = vmul.f32 %v4182_v7, %v7085_v33  ;;  %v1553_v9 = vmul.u32 128, %v1489_v18  ;;  %v3490_v8 = vpack.c.bf16 %v2556_v37, %v2555_v22  ;;  %v4188_v12 = vpop.eup %4187 }
 0x2cd   : > { %v2572_v57 = vmul.f32 1.1111112, %v1389_v56  ;;  %v1937_v62 = vmul.u32 2146121005, %v1873_v46  ;;  %v1938_v14 = vmul.u32 2146121005, %v1874_v31  ;;  %4197 = vrcp.f32 %v1223_v27  ;;  %v1203_v56 = vpop.xlane.xlu0 %1202  ;;  %v1225_v63 = vpop.xlane.xlu1 %1224 }
 0x2ce   : > { %v3487_v61 = vpack.c.bf16 %v2554_v41, %v2553_v19  ;;  %v1387_v2 = vmul.f32 %v4186_v0, %v7086_v51  ;;  %v1554_v52 = vmul.u32 128, %v1490_v20  ;;  %4199 = vrcp.f32 %v1193_v10  ;;  %v4190_v37 = vpop.eup %4189  ;;  %v7093_v0 = vld [vmem:[#allocation72_spill] sm:$0xff] }
 0x2cf   : > { %v3380_v7 = vshrl.u32 %v1937_v62, 15  ;;  %v3381_v18 = vshrl.u32 %v1938_v14, 15  ;;  %v1617_v22 = vadd.s32 %v1553_v9, %v5146_v53  ;;  %v2569_v23 = vmul.f32 1.1111112, %v1386_v24  ;;  %v4192_v46 = vpop.eup %4191 }
 0x2d0   : > { %3848 = vmatprep.subr.msk.bf16.mxu0 %vm3486_vm4, %v3487_v61  ;;  %v2570_v39 = vmul.f32 1.1111112, %v1387_v2  ;;  %v5919_v19 = vxor.u32 %v3430_v17, %v2179_v15  ;;  %v1618_v20 = vadd.s32 %v1554_v52, %v5146_v53  ;;  %v7087_v17 = vld [vmem:[#allocation59_spill] sm:$0xff]  ;;  %vm5944_vm7 = vcmp.ge.s32.totalorder %v2429_v4, 214748364 }
 0x2d1   : > { %3849 = vmatpush3.bf16.msk.msra.mxu0 %vm3486_vm4, %v3487_v61  ;;  %v5931_v31 = vxor.u32 %v3380_v7, %v1937_v62  ;;  %v5933_v27 = vxor.u32 %v3381_v18, %v1938_v14  ;;  %v1683_v15 = vadd.s32 %v5164_v59, %v1617_v22  ;;  %v1434_v41 = vadd.s32 2, %v7087_v17  ;;  %v1235_v54 = vpop.xlane.xlu0 %1234  ;;  %v7101_v22 = vld [vmem:[#allocation71_spill] sm:$0xff]  ;;  %v1205_v28 = vpop.xlane.xlu1 %1204 }
 0x2d2   : > { %3850 = vmatprep.subr.msk.bf16.mxu0 %vm3489_vm5, %v3490_v8  ;;  %v3511_v13 = vpack.c.bf16 %v2570_v39, %v2569_v23  ;;  %v7090_v24 = vand.u32 2147483647, %v5677_v42  ;;  %v1377_v62 = vmul.f32 %v4192_v46, %v7093_v0  ;;  %v5957_v14 = vxor.u32 %v3431_v35, %v2180_v25  ;;  %v4194_v61 = vpop.eup %4193  ;;  %v7094_v35 = vld [vmem:[#allocation69_spill] sm:$0xff]  ;;  %v7113_v0 = vld [vmem:[#allocation76_spill] sm:$0xff] }
 0x2d3   : > { %v1684_v10 = vadd.s32 %v5164_v59, %v1618_v20  ;;  %4201 = vrcp.f32 %v1225_v63  ;;  %v2193_v4 = vmul.u32 2221532811, %v5931_v31  ;;  %v2194_v45 = vmul.u32 2221532811, %v5933_v27 }
 0x2d4   : > { %vm5950_vm8 = vcmp.ge.s32.totalorder %v7090_v24, 214748364  ;;  %v3318_v42 = vshrl.u32 %v1683_v15, 16  ;;  %3880 = vmatprep.subr.msk.bf16.mxu1 %vm3510_vm6, %v3511_v13  ;;  %v3514_v25 = vpack.c.bf16 %v2572_v57, %v2571_v48  ;;  %v1376_v51 = vmul.f32 %v4188_v12, %v7094_v35  ;;  %v7112_v24 = vld [vmem:[#allocation60_spill] sm:$0xff]  ;;  %v7114_v35 = vld [vmem:[#allocation75_spill] sm:$0xff] }
 0x2d5   : > { %v7095_v2 = vand.u32 2147483647, %v5680_v47  ;;  %v7098_v7 = vand.u32 2147483647, %v5682_v16  ;;  %v1392_v23 = vmul.f32 %v4190_v37, %v7101_v22  ;;  %v3319_v39 = vshrl.u32 %v1684_v10, 16  ;;  %3851 = vmatpush3.bf16.msk.msra.mxu0 %vm3489_vm5, %v3490_v8  ;;  %3881 = vmatpush3.bf16.msk.msra.mxu1 %vm3510_vm6, %v3511_v13  ;;  %v4196_v57 = vpop.eup %4195  ;;  %v1199_v44 = vpop.xlane.xlu0 %1198  ;;  %v7115_v22 = vld [vmem:[#allocation61_spill] sm:$0xff]  ;;  %vm3492_vm0 = vmpackc.low %vm5950_vm8, %vm5944_vm7 }
 0x2d6   : > { %4203 = vrcp.f32 %v1203_v56  ;;  %v2435_v47 = vand.u32 2147483647, %v5919_v19  ;;  %v1875_v16 = vxor.u32 %v3318_v42, %v1683_v15  ;;  %v5996_v48 = vmul.u32 128, %v1434_v41  ;;  %3882 = vmatprep.subr.msk.bf16.mxu1 %vm3513_vm9, %v3514_v25 }
 0x2d7   : > { %vm5974_vm10 = vcmp.ge.s32.totalorder %v7095_v2, 214748364  ;;  %vm5980_vm11 = vcmp.ge.s32.totalorder %v7098_v7, 214748364  ;;  %v1374_v8 = vmul.f32 %v4194_v61, %v7102_v3  ;;  %vm6006_vm12 = vcmp.ge.s32.totalorder %v2445_v60, 214748364  ;;  %v4198_v27 = vpop.eup %4197 }
 0x2d8   : > { %vm6012_vm13 = vcmp.ge.s32.totalorder %v2446_v1, 214748364  ;;  %v2436_v12 = vand.u32 2147483647, %v5957_v14  ;;  %v3444_v37 = vshrl.u32 %v2193_v4, 16  ;;  %v1876_v56 = vxor.u32 %v3319_v39, %v1684_v10  ;;  %v4200_v63 = vpop.eup %4199  ;;  %v7116_v3 = vld [vmem:[#allocation78_spill] sm:$0xff]  ;;  %vm3495_vm1 = vmpackc.low %vm5980_vm11, %vm5974_vm10 }
 0x2d9   : > { %4205 = vrcp.f32 %v1205_v28  ;;  %v2560_v20 = vmul.f32 1.1111112, %v1377_v62  ;;  %v3445_v46 = vshrl.u32 %v2194_v45, 16  ;;  %v1939_v31 = vmul.u32 2146121005, %v1875_v16  ;;  %3883 = vmatpush3.bf16.msk.msra.mxu1 %vm3513_vm9, %v3514_v25  ;;  %v1231_v25 = vpop.xlane.xlu0 %1230  ;;  %vm3516_vm2 = vmpackc.low %vm6012_vm13, %vm6006_vm12 }
 0x2da   : > { %4207 = vrcp.f32 %v1235_v54  ;;  %v2559_v60 = vmul.f32 1.1111112, %v1376_v51  ;;  %vm6019_vm14 = vcmp.ge.s32.totalorder %v2447_v50, 214748364  ;;  %vm6025_vm15 = vcmp.ge.s32.totalorder %v2448_v5, 214748364  ;;  %v1237_v5 = vpop.xlane.xlu1 %1236 }
 0x2db   : > { %v6029_v15 = vmul.f32 1.1111112, %v1392_v23  ;;  %v1940_v41 = vmul.u32 2146121005, %v1876_v56  ;;  %4209 = vrcp.f32 %v1199_v44  ;;  %v1393_v50 = vmul.f32 %v4196_v57, %v7111_v43  ;;  %v7117_v43 = vld [vmem:[#allocation65_spill] sm:$0xff]  ;;  %vm3519_vm5 = vmpackc.low %vm6025_vm15, %vm6019_vm14 }
 0x2dc   : > { %v3382_v13 = vshrl.u32 %v1939_v31, 15  ;;  %v1491_v36 = vadd.s32 %v5996_v48, %v7112_v24  ;;  %v1375_v62 = vmul.f32 %v4200_v63, %v7113_v0  ;;  %v2557_v10 = vmul.f32 1.1111112, %v1374_v8 }
 0x2dd   : > { %v6040_v61 = vxor.u32 %v3444_v37, %v2193_v4  ;;  %v3383_v42 = vshrl.u32 %v1940_v41, 15  ;;  %v3496_v54 = vpack.c.bf16 %v2560_v20, %v2559_v60  ;;  %v1390_v49 = vmul.f32 %v4198_v27, %v7114_v35  ;;  %v4202_v39 = vpop.eup %4201  ;;  %v1243_v44 = vpop.xlane.xlu0 %1242  ;;  %v7122_v35 = vld [vmem:[#allocation77_spill] sm:$0xff] }
 0x2de   : > { %v6043_v51 = vxor.u32 %v3445_v46, %v2194_v45  ;;  %v2131_v55 = vxor.u32 %v3382_v13, %v1939_v31  ;;  %4211 = vrcp.f32 %v1237_v5  ;;  %v2558_v2 = vmul.f32 1.1111112, %v1375_v62  ;;  %v1201_v45 = vpop.xlane.xlu1 %1200 }
 0x2df   : > { %v2132_v7 = vxor.u32 %v3383_v42, %v1940_v41  ;;  %v1492_v23 = vadd.s32 %v5996_v48, %v7115_v22  ;;  %4213 = vrcp.f32 %v1231_v25  ;;  %v2576_v4 = vmul.f32 1.1111112, %v1393_v50  ;;  %v7124_v25 = vld [vmem:[#allocation66_spill] sm:$0xff] }
 0x2e0   : > { %v2195_v16 = vmul.u32 2221532811, %v2131_v55  ;;  %v1555_v57 = vmul.u32 128, %v1491_v36  ;;  %v3493_v28 = vpack.c.bf16 %v2558_v2, %v2557_v10  ;;  %v1391_v8 = vmul.f32 %v4202_v39, %v7116_v3  ;;  %v4204_v20 = vpop.eup %4203  ;;  %v7125_v39 = vld [vmem:[#allocation81_spill] sm:$0xff] }
 0x2e1   : > { %v2449_v37 = vand.u32 2147483647, %v6040_v61  ;;  %v2196_v56 = vmul.u32 2221532811, %v2132_v7  ;;  %4215 = vrcp.f32 %v1201_v45  ;;  %v1556_v31 = vmul.u32 128, %v1492_v23 }
 0x2e2   : > { %v3446_v46 = vshrl.u32 %v2195_v16, 16  ;;  %v1619_v27 = vadd.s32 %v1555_v57, %v5146_v53  ;;  %3852 = vmatprep.subr.msk.bf16.mxu0 %vm3492_vm0, %v3493_v28  ;;  %v2573_v60 = vmul.f32 1.1111112, %v1390_v49  ;;  %v2574_v41 = vmul.f32 1.1111112, %v1391_v8  ;;  %v1233_v33 = vpop.xlane.xlu1 %1232 }
 0x2e3   : > { %v3447_v63 = vshrl.u32 %v2196_v56, 16  ;;  %v1493_v50 = vadd.s32 %v5996_v48, %v7117_v43  ;;  %v4206_v13 = vpop.eup %4205  ;;  %3853 = vmatpush3.bf16.msk.msra.mxu0 %vm3492_vm0, %v3493_v28  ;;  %v2450_v36 = vand.u32 2147483647, %v6043_v51  ;;  %v1620_v0 = vadd.s32 %v1556_v31, %v5146_v53  ;;  %v7123_v51 = vld [vmem:[#allocation80_spill] sm:$0xff] }
 0x2e4   : > { %v2387_v5 = vxor.u32 %v3446_v46, %v2195_v16  ;;  %v1685_v62 = vadd.s32 %v5164_v59, %v1619_v27  ;;  %v4208_v10 = vpop.eup %4207  ;;  %3854 = vmatprep.subr.msk.bf16.mxu0 %vm3495_vm1, %v3496_v54  ;;  %v3517_v9 = vpack.c.bf16 %v2574_v41, %v2573_v60  ;;  %vm6084_vm3 = vcmp.ge.s32.totalorder %v2433_v34, 214748364 }
 0x2e5   : > { %vm6090_vm4 = vcmp.ge.s32.totalorder %v2434_v32, 214748364  ;;  %v1380_v49 = vmul.f32 %v4204_v20, %v7122_v35  ;;  %v1381_v55 = vmul.f32 %v4206_v13, %v7123_v51  ;;  %v1494_v2 = vadd.s32 %v5996_v48, %v7124_v25  ;;  %v4210_v7 = vpop.eup %4209  ;;  %v6108_v32 = vpop.xlane.xlu0 %1274 }
 0x2e6   : > { %4217 = vrcp.f32 %v1233_v33  ;;  %v2388_v30 = vxor.u32 %v3447_v63, %v2196_v56  ;;  %v1686_v6 = vadd.s32 %v5164_v59, %v1620_v0  ;;  %v3320_v34 = vshrl.u32 %v1685_v62, 16  ;;  %3884 = vmatprep.subr.msk.bf16.mxu1 %vm3516_vm2, %v3517_v9  ;;  %v1245_v19 = vpop.xlane.xlu1 %1244  ;;  %v7137_v63 = vld [vmem:[#allocation82_spill] sm:$0xff]  ;;  %v7139_v33 = vld [vmem:[#allocation83_spill] sm:$0xff]  ;;  %vm3498_vm12 = vmpackc.low %vm6090_vm4, %vm6084_vm3 }
 0x2e7   : > { %v3520_v23 = vpack.c.bf16 %v2576_v4, %v6029_v15  ;;  %v1378_v16 = vmul.f32 %v4210_v7, %v7125_v39  ;;  %v2451_v57 = vand.u32 2147483647, %v2387_v5  ;;  %v1557_v45 = vmul.u32 128, %v1493_v50  ;;  %3855 = vmatpush3.bf16.msk.msra.mxu0 %vm3495_vm1, %v3496_v54  ;;  %3885 = vmatpush3.bf16.msk.msra.mxu1 %vm3516_vm2, %v3517_v9 }
 0x2e8   : > { %vm6124_vm6 = vcmp.ge.s32.totalorder %v2435_v47, 214748364  ;;  %vm6130_vm7 = vcmp.ge.s32.totalorder %v2436_v12, 214748364  ;;  %v3321_v52 = vshrl.u32 %v1686_v6, 16  ;;  %v1877_v54 = vxor.u32 %v3320_v34, %v1685_v62  ;;  %v4212_v4 = vpop.eup %4211  ;;  %v7134_v12 = vld [vmem:[#allocation79_spill] sm:$0xff] }
 0x2e9   : > { %4219 = vrcp.f32 %v1243_v44  ;;  %3886 = vmatprep.subr.msk.bf16.mxu1 %vm3519_vm5, %v3520_v23  ;;  %v2563_v47 = vmul.f32 1.1111112, %v1380_v49  ;;  %v2564_v11 = vmul.f32 1.1111112, %v1381_v55  ;;  %vm6139_vm8 = vcmp.ge.s32.totalorder %v2449_v37, 214748364  ;;  %v4214_v3 = vpop.eup %4213  ;;  %v1239_v31 = vpop.xlane.xlu0 %1238  ;;  %vm3501_vm13 = vmpackc.low %vm6130_vm7, %vm6124_vm6 }
 0x2ea   : > { %vm6143_vm9 = vcmp.ge.s32.totalorder %v2450_v36, 214748364  ;;  %v1396_v28 = vmul.f32 %v4208_v10, %v7134_v12  ;;  %v2452_v8 = vand.u32 2147483647, %v2388_v30  ;;  %v1878_v56 = vxor.u32 %v3321_v52, %v1686_v6  ;;  %v6161_v0 = vpop.xlane.xlu1 %1276  ;;  %v7138_v62 = vld [vmem:[#allocation84_spill] sm:$0xff]  ;;  %v7142_v52 = vld [vmem:[#allocation86_spill] sm:$0xff] }
 0x2eb   : > { %v1941_v20 = vmul.u32 2146121005, %v1877_v54  ;;  %v1558_v46 = vmul.u32 128, %v1494_v2  ;;  %4221 = vrcp.f32 %v1245_v19  ;;  %v2561_v27 = vmul.f32 1.1111112, %v1378_v16  ;;  %v4216_v41 = vpop.eup %4215  ;;  %3887 = vmatpush3.bf16.msk.msra.mxu1 %vm3519_vm5, %v3520_v23  ;;  %vm3522_vm14 = vmpackc.low %vm6143_vm9, %vm6139_vm8 }
 0x2ec   : > { %vm6148_vm10 = vcmp.ge.s32.totalorder %v2451_v57, 214748364  ;;  %v1621_v37 = vadd.s32 %v1557_v45, %v5146_v53  ;;  %v1435_v60 = vadd.s32 3, %v7087_v17  ;;  %v1397_v50 = vmul.f32 %v4212_v4, %v7137_v63 }
 0x2ed   : > { %v1942_v13 = vmul.u32 2146121005, %v1878_v56  ;;  %v3384_v36 = vshrl.u32 %v1941_v20, 15  ;;  %v1622_v5 = vadd.s32 %v1558_v46, %v5146_v53  ;;  %4223 = vrcp.f32 %v1239_v31  ;;  %v1271_v51 = vpop.xlane.xlu0 %1270 }
 0x2ee   : > { %v1379_v10 = vmul.f32 %v4216_v41, %v7138_v62  ;;  %v1394_v17 = vmul.f32 %v4214_v3, %v7139_v33  ;;  %v1687_v9 = vadd.s32 %v5164_v59, %v1621_v37  ;;  %v3502_v1 = vpack.c.bf16 %v2564_v11, %v2563_v47  ;;  %v1241_v57 = vpop.xlane.xlu1 %1240 }
 0x2ef   : > { %v3385_v35 = vshrl.u32 %v1942_v13, 15  ;;  %v2133_v29 = vxor.u32 %v3384_v36, %v1941_v20  ;;  %v1688_v49 = vadd.s32 %v5164_v59, %v1622_v5  ;;  %vm6167_vm11 = vcmp.ge.s32.totalorder %v2452_v8, 214748364  ;;  %v7143_v5 = vld [vmem:[#allocation85_spill] sm:$0xff] }
 0x2f0   : > { %v2562_v55 = vmul.f32 1.1111112, %v1379_v10  ;;  %v3322_v7 = vshrl.u32 %v1687_v9, 16  ;;  %v6171_v30 = vmul.u32 128, %v1435_v60  ;;  %v4218_v6 = vpop.eup %4217  ;;  %v2580_v34 = vmul.f32 1.1111112, %v1397_v50  ;;  %vm3525_vm15 = vmpackc.low %vm6167_vm11, %vm6148_vm10 }
 0x2f1   : > { %v2134_v23 = vxor.u32 %v3385_v35, %v1942_v13  ;;  %v2197_v39 = vmul.u32 2221532811, %v2133_v29  ;;  %v3323_v16 = vshrl.u32 %v1688_v49, 16  ;;  %v1395_v54 = vmul.f32 %v4218_v6, %v7142_v52  ;;  %v6187_v8 = vpop.xlane.xlu0 %1250  ;;  %v7146_v6 = vld [vmem:[#allocation13_spill] sm:$0xff] }
 0x2f2   : > { %v3499_v45 = vpack.c.bf16 %v2562_v55, %v2561_v27  ;;  %v2577_v4 = vmul.f32 1.1111112, %v1394_v17  ;;  %v1879_v19 = vxor.u32 %v3322_v7, %v1687_v9  ;;  %4225 = vrcp.f32 %v1241_v57  ;;  %v7144_v9 = vld [vmem:[#allocation88_spill] sm:$0xff] }
 0x2f3   : > { %v2198_v47 = vmul.u32 2221532811, %v2134_v23  ;;  %v3448_v11 = vshrl.u32 %v2197_v39, 16  ;;  %v1880_v12 = vxor.u32 %v3323_v16, %v1688_v49  ;;  %v4220_v3 = vpop.eup %4219  ;;  %v2578_v56 = vmul.f32 1.1111112, %v1395_v54  ;;  %v7149_v54 = vld [vmem:[#allocation15_spill] sm:$0xff] }
 0x2f4   : > { %3856 = vmatprep.subr.msk.bf16.mxu0 %vm3498_vm12, %v3499_v45  ;;  %v1943_v20 = vmul.u32 2146121005, %v1879_v19  ;;  %v1507_v46 = vadd.s32 %v6171_v30, %v7112_v24  ;;  %v1508_v31 = vadd.s32 %v6171_v30, %v7115_v22  ;;  %v2579_v27 = vmul.f32 1.1111112, %v1396_v28  ;;  %v1273_v24 = vpop.xlane.xlu1 %1272  ;;  %v7150_v19 = vld [vmem:[#allocation94_spill] sm:$0xff] }
 0x2f5   : > { %3857 = vmatpush3.bf16.msk.msra.mxu0 %vm3498_vm12, %v3499_v45  ;;  %v3449_v37 = vshrl.u32 %v2198_v47, 16  ;;  %v2389_v60 = vxor.u32 %v3448_v11, %v2197_v39  ;;  %v1944_v41 = vmul.u32 2146121005, %v1880_v12  ;;  %v4222_v63 = vpop.eup %4221  ;;  %4227 = vrcp.f32 %v6108_v32  ;;  %v1283_v32 = vpop.xlane.xlu0 %1282  ;;  %v7167_v11 = vld [vmem:[#allocation18_spill] sm:$0xff] }
 0x2f6   : > { %3858 = vmatprep.subr.msk.bf16.mxu0 %vm3501_vm13, %v3502_v1  ;;  %v3523_v22 = vpack.c.bf16 %v2578_v56, %v2577_v4  ;;  %v3386_v61 = vshrl.u32 %v1943_v20, 15  ;;  %v1571_v42 = vmul.u32 128, %v1507_v46  ;;  %4229 = vrcp.f32 %v1271_v51 }
 0x2f7   : > { %v2390_v28 = vxor.u32 %v3449_v37, %v2198_v47  ;;  %v3387_v50 = vshrl.u32 %v1944_v41, 15  ;;  %v4224_v13 = vpop.eup %4223  ;;  %v3526_v36 = vpack.c.bf16 %v2580_v34, %v2579_v27  ;;  %v1400_v62 = vmul.f32 %v4220_v3, %v7143_v5 }
 0x2f8   : > { %3888 = vmatprep.subr.msk.bf16.mxu1 %vm3522_vm14, %v3523_v22  ;;  %v2135_v10 = vxor.u32 %v3386_v61, %v1943_v20  ;;  %v1572_v33 = vmul.u32 128, %v1508_v31  ;;  %4231 = vrcp.f32 %v1273_v24  ;;  %v2453_v17 = vand.u32 2147483647, %v2389_v60  ;;  %v1253_v15 = vpop.xlane.xlu1 %1252 }
 0x2f9   : > { %3859 = vmatpush3.bf16.msk.msra.mxu0 %vm3501_vm13, %v3502_v1  ;;  %3889 = vmatpush3.bf16.msk.msra.mxu1 %vm3522_vm14, %v3523_v22  ;;  %v1401_v35 = vmul.f32 %v4222_v63, %v7144_v9  ;;  %v2136_v29 = vxor.u32 %v3387_v50, %v1944_v41  ;;  %4233 = vrcp.f32 %v6161_v0  ;;  %v2454_v18 = vand.u32 2147483647, %v2390_v28  ;;  %v1247_v7 = vpop.xlane.xlu0 %1246  ;;  %v7153_v41 = vld [vmem:[#allocation14_spill] sm:$0xff]  ;;  %v7169_v50 = vld [vmem:[#allocation21_spill] sm:$0xff] }
 0x2fa   : > { %3890 = vmatprep.subr.msk.bf16.mxu1 %vm3525_vm15, %v3526_v36  ;;  %v2199_v1 = vmul.u32 2221532811, %v2135_v10  ;;  %v1635_v14 = vadd.s32 %v1571_v42, %v5146_v53  ;;  %v1398_v49 = vmul.f32 %v4224_v13, %v7145_v58  ;;  %v1636_v55 = vadd.s32 %v1572_v33, %v5146_v53  ;;  %v7154_v42 = vld [vmem:[#allocation16_spill] sm:$0xff]  ;;  %v7159_v33 = vld [vmem:[#allocation93_spill] sm:$0xff] }
 0x2fb   : > { %v2200_v51 = vmul.u32 2221532811, %v2136_v29  ;;  %v2583_v34 = vmul.f32 1.1111112, %v1400_v62  ;;  %vm6245_vm0 = vcmp.ge.s32.totalorder %v2453_v17, 214748364  ;;  %v1509_v20 = vadd.s32 %v6171_v30, %v7117_v43 }
 0x2fc   : > { %3861 = vmatmul.mubr.bf16.vlgmr.msra.gmra.mrb[32].mxu0 %v7146_v6  ;;  %v3450_v0 = vshrl.u32 %v2199_v1, 16  ;;  %v1701_v23 = vadd.s32 %v5164_v59, %v1635_v14  ;;  %v4226_v39 = vpop.eup %4225  ;;  %v2584_v45 = vmul.f32 1.1111112, %v1401_v35  ;;  %v1702_v52 = vadd.s32 %v5164_v59, %v1636_v55  ;;  %v1285_v4 = vpop.xlane.xlu1 %1284  ;;  %v7160_v29 = vld [vmem:[#allocation17_spill] sm:$0xff]  ;;  %v7161_v14 = vld [vmem:[#allocation87_spill] sm:$0xff] }
 0x2fd   : > { %3891 = vmatpush3.bf16.msk.msra.mxu1 %vm3525_vm15, %v3526_v36  ;;  %v3451_v57 = vshrl.u32 %v2200_v51, 16  ;;  %3864 = vmatprep.mubr.bf16.mxu0 %v7149_v54  ;;  %v1399_v47 = vmul.f32 %v4226_v39, %v7150_v19  ;;  %vm6252_vm1 = vcmp.ge.s32.totalorder %v2454_v18, 214748364  ;;  %v2581_v12 = vmul.f32 1.1111112, %v1398_v49  ;;  %v6258_v31 = vpop.xlane.xlu0 %1278  ;;  %v7165_v39 = vld [vmem:[#allocation92_spill] sm:$0xff] }
 0x2fe   : > { %v2391_v44 = vxor.u32 %v3450_v0, %v2199_v1  ;;  %v3336_v2 = vshrl.u32 %v1701_v23, 16  ;;  %v3337_v56 = vshrl.u32 %v1702_v52, 16  ;;  %v1510_v63 = vadd.s32 %v6171_v30, %v7124_v25  ;;  %vm3528_vm2 = vmpackc.low %vm6252_vm1, %vm6245_vm0  ;;  %v7164_v0 = vld [vmem:[#allocation89_spill] sm:$0xff]  ;;  %v7166_v19 = vld [vmem:[#allocation90_spill] sm:$0xff] }
 0x2ff   : > { %v2392_v3 = vxor.u32 %v3451_v57, %v2200_v51  ;;  %v4228_v46 = vpop.eup %4227  ;;  %v2582_v27 = vmul.f32 1.1111112, %v1399_v47  ;;  %4235 = vrcp.f32 %v6187_v8  ;;  %v1573_v61 = vmul.u32 128, %v1509_v20  ;;  %v7162_v51 = vld [vmem:[#allocation19_spill] sm:$0xff] }
 0x300   : > { %v2455_v37 = vand.u32 2147483647, %v2391_v44  ;;  %v1893_v60 = vxor.u32 %v3336_v2, %v1701_v23  ;;  %3893 = vmatmul.mubr.bf16.vlgmr.msra.gmra.mrb[32].mxu1 %v7153_v41  ;;  %v4230_v24 = vpop.eup %4229  ;;  %v1894_v22 = vxor.u32 %v3337_v56, %v1702_v52  ;;  %4237 = vrcp.f32 %v1247_v7  ;;  %v1249_v8 = vpop.xlane.xlu1 %1248  ;;  %v7168_v56 = vld [vmem:[#allocation20_spill] sm:$0xff] }
 0x301   : > { %v2456_v43 = vand.u32 2147483647, %v2392_v3  ;;  %3896 = vmatprep.mubr.bf16.mxu1 %v7154_v42  ;;  %v3529_v28 = vpack.c.bf16 %v2582_v27, %v2581_v12  ;;  %4239 = vrcp.f32 %v1283_v32  ;;  %v1574_v62 = vmul.u32 128, %v1510_v63  ;;  %v1259_v18 = vpop.xlane.xlu0 %1258 }
 0x302   : > { %vm6269_vm3 = vcmp.ge.s32.totalorder %v2455_v37, 214748364  ;;  %v1957_v25 = vmul.u32 2146121005, %v1893_v60  ;;  %v4232_v13 = vpop.eup %4231  ;;  %v1958_v5 = vmul.u32 2146121005, %v1894_v22  ;;  %v3532_v32 = vpack.c.bf16 %v2584_v45, %v2583_v34 }
 0x303   : > { %vm6273_vm4 = vcmp.ge.s32.totalorder %v2456_v43, 214748364  ;;  %v4234_v10 = vpop.eup %4233  ;;  %3908 = vmatprep.subr.msk.bf16.mxu0 %vm3528_vm2, %v3529_v28  ;;  %v1414_v17 = vmul.f32 %v4230_v24, %v7159_v33  ;;  %v1637_v35 = vadd.s32 %v1573_v61, %v5146_v53  ;;  %4241 = vrcp.f32 %v1253_v15  ;;  %v7163_v15 = vld [vmem:[#allocation43_spill] sm:$0xff] }
 0x304   : > { %vm3531_vm5 = vmpackc.low %vm6273_vm4, %vm6269_vm3  ;;  %v3400_v9 = vshrl.u32 %v1957_v25, 15  ;;  %3865 = vmatmul.mubr.bf16.gmra.mrb[36].mxu0 %v7160_v29  ;;  %v3401_v1 = vshrl.u32 %v1958_v5, 15  ;;  %v1416_v58 = vmul.f32 %v4228_v46, %v7161_v14  ;;  %v1638_v49 = vadd.s32 %v1574_v62, %v5146_v53  ;;  %v1281_v44 = vpop.xlane.xlu1 %1280 }
 0x305   : > { %3909 = vmatpush3.bf16.msk.msra.mxu0 %vm3528_vm2, %v3529_v28  ;;  %3868 = vmatprep.mubr.bf16.mxu0 %v7162_v51  ;;  %v1415_v55 = vmul.f32 %v4232_v13, %v7163_v15  ;;  %v1703_v6 = vadd.s32 %v5164_v59, %v1637_v35  ;;  %v1495_v34 = vadd.s32 %v5996_v48, %v7164_v0  ;;  %4243 = vrcp.f32 %v1249_v8  ;;  %v1291_v41 = vpop.xlane.xlu0 %1290 }
 0x306   : > { %3910 = vmatprep.subr.msk.bf16.mxu0 %vm3531_vm5, %v3532_v32  ;;  %v2149_v7 = vxor.u32 %v3400_v9, %v1957_v25  ;;  %v2150_v23 = vxor.u32 %v3401_v1, %v1958_v5  ;;  %v1417_v16 = vmul.f32 %v4234_v10, %v7165_v39  ;;  %v1704_v57 = vadd.s32 %v5164_v59, %v1638_v49  ;;  %v7170_v5 = vld [vmem:[#allocation23_spill] sm:$0xff]  ;;  %v7171_v1 = vld [vmem:[#allocation49_spill] sm:$0xff] }
 0x307   : > { %v2597_v52 = vmul.f32 1.1111112, %v1414_v17  ;;  %v3338_v54 = vshrl.u32 %v1703_v6, 16  ;;  %v1496_v47 = vadd.s32 %v5996_v48, %v7166_v19  ;;  %4245 = vrcp.f32 %v1285_v4 }
 0x308   : > { %v2213_v45 = vmul.u32 2221532811, %v2149_v7  ;;  %3897 = vmatmul.mubr.bf16.gmra.mrb[36].mxu1 %v7167_v11  ;;  %v2214_v2 = vmul.u32 2221532811, %v2150_v23  ;;  %v3339_v12 = vshrl.u32 %v1704_v57, 16  ;;  %4247 = vrcp.f32 %v6258_v31  ;;  %v1261_v29 = vpop.xlane.xlu1 %1260 }
 0x309   : > { %3911 = vmatpush3.bf16.msk.msra.mxu0 %vm3531_vm5, %v3532_v32  ;;  %v1559_v3 = vmul.u32 128, %v1495_v34  ;;  %3900 = vmatprep.mubr.bf16.mxu1 %v7168_v56  ;;  %v2598_v46 = vmul.f32 1.1111112, %v1415_v55  ;;  %v1895_v27 = vxor.u32 %v3338_v54, %v1703_v6  ;;  %v1560_v37 = vmul.u32 128, %v1496_v47  ;;  %v6317_v60 = vpop.eup %4235  ;;  %v7174_v55 = vld [vmem:[#allocation22_spill] sm:$0xff]  ;;  %v1255_v23 = vpop.xlane.xlu0 %1254 }
 0x30a   : > { %v3464_v20 = vshrl.u32 %v2213_v45, 16  ;;  %v3465_v4 = vshrl.u32 %v2214_v2, 16  ;;  %v1896_v63 = vxor.u32 %v3339_v12, %v1704_v57  ;;  %v4238_v43 = vpop.eup %4237  ;;  %v2599_v42 = vmul.f32 1.1111112, %v1416_v58 }
 0x30b   : > { %v1623_v24 = vadd.s32 %v1559_v3, %v5146_v53  ;;  %v1959_v61 = vmul.u32 2146121005, %v1895_v27  ;;  %v1624_v28 = vadd.s32 %v1560_v37, %v5146_v53  ;;  %v6323_v25 = vpop.eup %4239  ;;  %v2600_v36 = vmul.f32 1.1111112, %v1417_v16  ;;  %v7177_v16 = vld [vmem:[#allocation24_spill] sm:$0xff]  ;;  %v7179_v3 = vld [vmem:[#allocation47_spill] sm:$0xff] }
 0x30c   : > { %v2405_v22 = vxor.u32 %v3464_v20, %v2213_v45  ;;  %3869 = vmatmul.mubr.bf16.gmra.mrb[40].mxu0 %v7169_v50  ;;  %v2406_v13 = vxor.u32 %v3465_v4, %v2214_v2  ;;  %v1960_v8 = vmul.u32 2146121005, %v1896_v63  ;;  %v3553_v10 = vpack.c.bf16 %v2598_v46, %v2597_v52  ;;  %v7180_v46 = vld [vmem:[#allocation46_spill] sm:$0xff]  ;;  %v7181_v37 = vld [vmem:[#allocation25_spill] sm:$0xff]  ;;  %v1293_v63 = vpop.xlane.xlu1 %1292 }
 0x30d   : > { %v1689_v31 = vadd.s32 %v5164_v59, %v1623_v24  ;;  %3872 = vmatprep.mubr.bf16.mxu0 %v7170_v5  ;;  %v3402_v32 = vshrl.u32 %v1959_v61, 15  ;;  %v1690_v33 = vadd.s32 %v5164_v59, %v1624_v28  ;;  %v6328_v17 = vpop.eup %4241  ;;  %v1402_v14 = vmul.f32 %v4238_v43, %v7171_v1  ;;  %v7183_v28 = vld [vmem:[#allocation95_spill] sm:$0xff] }
 0x30e   : > { %v2469_v62 = vand.u32 2147483647, %v2405_v22  ;;  %v2470_v9 = vand.u32 2147483647, %v2406_v13  ;;  %v3403_v35 = vshrl.u32 %v1960_v8, 15  ;;  %4249 = vrcp.f32 %v1259_v18  ;;  %v7182_v22 = vld [vmem:[#allocation27_spill] sm:$0xff] }
 0x30f   : > { %v3324_v58 = vshrl.u32 %v1689_v31, 16  ;;  %v2151_v51 = vxor.u32 %v3402_v32, %v1959_v61  ;;  %v3325_v15 = vshrl.u32 %v1690_v33, 16  ;;  %v4244_v7 = vpop.eup %4243  ;;  %4251 = vrcp.f32 %v1281_v44  ;;  %v7178_v44 = vld [vmem:[#allocation96_spill] sm:$0xff] }
 0x310   : > { %vm6331_vm6 = vcmp.ge.s32.totalorder %v2469_v62, 214748364  ;;  %3901 = vmatmul.mubr.bf16.gmra.mrb[40].mxu1 %v7174_v55  ;;  %vm6336_vm7 = vcmp.ge.s32.totalorder %v2470_v9, 214748364  ;;  %v2152_v34 = vxor.u32 %v3403_v35, %v1960_v8  ;;  %4253 = vrcp.f32 %v1291_v41  ;;  %v7184_v9 = vld [vmem:[#allocation26_spill] sm:$0xff] }
 0x311   : > { %v1881_v39 = vxor.u32 %v3324_v58, %v1689_v31  ;;  %3904 = vmatprep.mubr.bf16.mxu1 %v7177_v16  ;;  %vm3552_vm8 = vmpackc.low %vm6336_vm7, %vm6331_vm6  ;;  %v2215_v18 = vmul.u32 2221532811, %v2151_v51  ;;  %v6345_v57 = vpack.c.bf16 %v2600_v36, %v2599_v42  ;;  %v1882_v45 = vxor.u32 %v3325_v15, %v1690_v33  ;;  %v6347_v52 = vpop.eup %4245  ;;  %v1287_v36 = vpop.xlane.xlu0 %1286 }
 0x312   : > { %3940 = vmatprep.subr.msk.bf16.mxu1 %vm3552_vm8, %v3553_v10  ;;  %v2216_v54 = vmul.u32 2221532811, %v2152_v34  ;;  %v2585_v11 = vmul.f32 1.1111112, %v1402_v14  ;;  %v1497_v2 = vadd.s32 %v5996_v48, %v7178_v44  ;;  %v1403_v56 = vmul.f32 %v4244_v7, %v7179_v3  ;;  %v6355_v4 = vpop.eup %4247  ;;  %v1257_v7 = vpop.xlane.xlu1 %1256 }
 0x313   : > { %v1945_v47 = vmul.u32 2146121005, %v1881_v39  ;;  %3941 = vmatpush3.bf16.msk.msra.mxu1 %vm3552_vm8, %v3553_v10  ;;  %v3466_v12 = vshrl.u32 %v2215_v18, 16  ;;  %v1946_v20 = vmul.u32 2146121005, %v1882_v45  ;;  %v1498_v27 = vadd.s32 %v5996_v48, %v7180_v46 }
 0x314   : > { %3873 = vmatmul.mubr.bf16.gmra.mrb[44].mxu0 %v7181_v37  ;;  %v3467_v41 = vshrl.u32 %v2216_v54, 16  ;;  %4255 = vrcp.f32 %v1261_v29  ;;  %v1561_v43 = vmul.u32 128, %v1497_v2  ;;  %v1404_v50 = vmul.f32 %v6317_v60, %v7183_v28  ;;  %v7185_v60 = vld [vmem:[#allocation28_spill] sm:$0xff] }
 0x315   : > { %v3388_v24 = vshrl.u32 %v1945_v47, 15  ;;  %3924 = vmatprep.mubr.bf16.mxu0 %v7182_v22  ;;  %v2407_v61 = vxor.u32 %v3466_v12, %v2215_v18  ;;  %v3389_v42 = vshrl.u32 %v1946_v20, 15  ;;  %v1562_v13 = vmul.u32 128, %v1498_v27  ;;  %v1267_v2 = vpop.xlane.xlu0 %1266  ;;  %v7190_v12 = vld [vmem:[#allocation45_spill] sm:$0xff] }
 0x316   : > { %v2408_v8 = vxor.u32 %v3467_v41, %v2216_v54  ;;  %4257 = vrcp.f32 %v1255_v23  ;;  %v1625_v5 = vadd.s32 %v1561_v43, %v5146_v53  ;;  %v2586_v32 = vmul.f32 1.1111112, %v1403_v56  ;;  %v1289_v28 = vpop.xlane.xlu1 %1288 }
 0x317   : > { %v2137_v31 = vxor.u32 %v3388_v24, %v1945_v47  ;;  %v2471_v62 = vand.u32 2147483647, %v2407_v61  ;;  %v2138_v10 = vxor.u32 %v3389_v42, %v1946_v20  ;;  %v1626_v33 = vadd.s32 %v1562_v13, %v5146_v53 }
 0x318   : > { %3905 = vmatmul.mubr.bf16.gmra.mrb[44].mxu1 %v7184_v9  ;;  %v2472_v35 = vand.u32 2147483647, %v2408_v8  ;;  %4259 = vrcp.f32 %v1293_v63  ;;  %v1691_v1 = vadd.s32 %v5164_v59, %v1625_v5  ;;  %v6365_v14 = vpop.eup %4249  ;;  %v1511_v23 = vadd.s32 %v6171_v30, %v7164_v0 }
 0x319   : > { %v2201_v29 = vmul.u32 2221532811, %v2137_v31  ;;  %3956 = vmatprep.mubr.bf16.mxu1 %v7185_v60  ;;  %vm6367_vm9 = vcmp.ge.s32.totalorder %v2471_v62, 214748364  ;;  %4261 = vrcp.f32 %v1287_v36  ;;  %v2202_v49 = vmul.u32 2221532811, %v2138_v10  ;;  %v4252_v15 = vpop.eup %4251 }
 0x31a   : > { %v1692_v51 = vadd.s32 %v5164_v59, %v1626_v33  ;;  %vm6372_vm10 = vcmp.ge.s32.totalorder %v2472_v35, 214748364  ;;  %v3326_v34 = vshrl.u32 %v1691_v1, 16  ;;  %v6378_v39 = vpop.eup %4253  ;;  %v3535_v18 = vpack.c.bf16 %v2586_v32, %v2585_v11  ;;  %v7195_v60 = vld [vmem:[#allocation48_spill] sm:$0xff] }
 0x31b   : > { %v3452_v6 = vshrl.u32 %v2201_v29, 16  ;;  %vm3555_vm11 = vmpackc.low %vm6372_vm10, %vm6367_vm9  ;;  %v3453_v16 = vshrl.u32 %v2202_v49, 16  ;;  %v1512_v54 = vadd.s32 %v6171_v30, %v7166_v19  ;;  %v1405_v0 = vmul.f32 %v6328_v17, %v7190_v12 }
 0x31c   : > { %v3327_v45 = vshrl.u32 %v1692_v51, 16  ;;  %3942 = vmatprep.subr.msk.bf16.mxu1 %vm3555_vm11, %v6345_v57  ;;  %v1883_v3 = vxor.u32 %v3326_v34, %v1691_v1  ;;  %v1575_v56 = vmul.u32 128, %v1511_v23  ;;  %4263 = vrcp.f32 %v1257_v7  ;;  %v7196_v7 = vld [vmem:[#allocation51_spill] sm:$0xff] }
 0x31d   : > { %v2393_v47 = vxor.u32 %v3452_v6, %v2201_v29  ;;  %3943 = vmatpush3.bf16.msk.msra.mxu1 %vm3555_vm11, %v6345_v57  ;;  %v2394_v20 = vxor.u32 %v3453_v16, %v2202_v49  ;;  %v1576_v37 = vmul.u32 128, %v1512_v54  ;;  %v2587_v19 = vmul.f32 1.1111112, %v1404_v50 }
 0x31e   : > { %v1884_v27 = vxor.u32 %v3327_v45, %v1692_v51  ;;  %v6390_v11 = vpop.eup %4255  ;;  %v1947_v63 = vmul.u32 2146121005, %v1883_v3  ;;  %v1639_v24 = vadd.s32 %v1575_v56, %v5146_v53  ;;  %4265 = vrcp.f32 %v1267_v2 }
 0x31f   : > { %v2457_v41 = vand.u32 2147483647, %v2393_v47  ;;  %v2458_v43 = vand.u32 2147483647, %v2394_v20  ;;  %v1640_v17 = vadd.s32 %v1576_v37, %v5146_v53  ;;  %v1513_v50 = vadd.s32 %v6171_v30, %v7178_v44 }
 0x320   : > { %v1948_v22 = vmul.u32 2146121005, %v1884_v27  ;;  %v6394_v61 = vpop.eup %4257  ;;  %v3390_v42 = vshrl.u32 %v1947_v63, 15  ;;  %v1705_v13 = vadd.s32 %v5164_v59, %v1639_v24  ;;  %v1514_v5 = vadd.s32 %v6171_v30, %v7180_v46 }
 0x321   : > { %vm6396_vm12 = vcmp.ge.s32.totalorder %v2457_v41, 214748364  ;;  %vm6403_vm13 = vcmp.ge.s32.totalorder %v2458_v43, 214748364  ;;  %v1706_v31 = vadd.s32 %v5164_v59, %v1640_v17  ;;  %v2588_v32 = vmul.f32 1.1111112, %v1405_v0 }
 0x322   : > { %v3391_v36 = vshrl.u32 %v1948_v22, 15  ;;  %v6410_v62 = vpop.eup %4259  ;;  %vm3534_vm14 = vmpackc.low %vm6403_vm13, %vm6396_vm12  ;;  %v2139_v10 = vxor.u32 %v3390_v42, %v1947_v63  ;;  %v3340_v44 = vshrl.u32 %v1705_v13, 16  ;;  %v1577_v33 = vmul.u32 128, %v1513_v50  ;;  %v7197_v0 = vld [vmem:[#allocation44_spill] sm:$0xff]  ;;  %v7198_v17 = vld [vmem:[#allocation97_spill] sm:$0xff] }
 0x323   : > { %v6416_v9 = vpop.eup %4261  ;;  %3912 = vmatprep.subr.msk.bf16.mxu0 %vm3534_vm14, %v3535_v18  ;;  %4267 = vrcp.f32 %v1289_v28  ;;  %v3341_v29 = vshrl.u32 %v1706_v31, 16  ;;  %v1578_v1 = vmul.u32 128, %v1514_v5  ;;  %v1418_v58 = vmul.f32 %v6355_v4, %v7195_v60  ;;  %v7201_v5 = vld [vmem:[#allocation99_spill] sm:$0xff] }
 0x324   : > { %v2140_v35 = vxor.u32 %v3391_v36, %v1948_v22  ;;  %3913 = vmatpush3.bf16.msk.msra.mxu0 %vm3534_vm14, %v3535_v18  ;;  %v2203_v46 = vmul.u32 2221532811, %v2139_v10  ;;  %v1897_v49 = vxor.u32 %v3340_v44, %v1705_v13  ;;  %v1641_v51 = vadd.s32 %v1577_v33, %v5146_v53 }
 0x325   : > { %v1419_v6 = vmul.f32 %v4252_v15, %v7196_v7  ;;  %v1898_v34 = vxor.u32 %v3341_v29, %v1706_v31  ;;  %v1642_v23 = vadd.s32 %v1578_v1, %v5146_v53  ;;  %v3538_v45 = vpack.c.bf16 %v2588_v32, %v2587_v19  ;;  %v7204_v29 = vld [vmem:[#allocation100_spill] sm:$0xff] }
 0x326   : > { %v2204_v55 = vmul.u32 2221532811, %v2140_v35  ;;  %v3454_v16 = vshrl.u32 %v2203_v46, 16  ;;  %v1961_v54 = vmul.u32 2146121005, %v1897_v49  ;;  %v1707_v47 = vadd.s32 %v5164_v59, %v1641_v51  ;;  %v4264_v2 = vpop.eup %4263  ;;  %v1269_v35 = vpop.xlane.xlu1 %1268 }
 0x327   : > { %v1962_v12 = vmul.u32 2146121005, %v1898_v34  ;;  %v1421_v4 = vmul.f32 %v6347_v52, %v7197_v0  ;;  %v1708_v3 = vadd.s32 %v5164_v59, %v1642_v23  ;;  %v2601_v27 = vmul.f32 1.1111112, %v1418_v58 }
 0x328   : > { %v3455_v18 = vshrl.u32 %v2204_v55, 16  ;;  %v2395_v56 = vxor.u32 %v3454_v16, %v2203_v46  ;;  %v3404_v20 = vshrl.u32 %v1961_v54, 15  ;;  %v3342_v15 = vshrl.u32 %v1707_v47, 16  ;;  %v6427_v37 = vpop.eup %4265 }
 0x329   : > { %v3405_v63 = vshrl.u32 %v1962_v12, 15  ;;  %v2602_v19 = vmul.f32 1.1111112, %v1419_v6  ;;  %v3343_v24 = vshrl.u32 %v1708_v3, 16  ;;  %v1420_v57 = vmul.f32 %v6323_v25, %v7198_v17 }
 0x32a   : > { %v2396_v41 = vxor.u32 %v3455_v18, %v2204_v55  ;;  %v2459_v43 = vand.u32 2147483647, %v2395_v56  ;;  %v2153_v22 = vxor.u32 %v3404_v20, %v1961_v54  ;;  %v1899_v42 = vxor.u32 %v3342_v15, %v1707_v47 }
 0x32b   : > { %v2154_v52 = vxor.u32 %v3405_v63, %v1962_v12  ;;  %v1900_v13 = vxor.u32 %v3343_v24, %v1708_v3  ;;  %v2604_v50 = vmul.f32 1.1111112, %v1421_v4  ;;  %v1499_v10 = vadd.s32 %v5996_v48, %v7201_v5  ;;  %v7205_v3 = vld [vmem:[#allocation98_spill] sm:$0xff] }
 0x32c   : > { %v2460_v28 = vand.u32 2147483647, %v2396_v41  ;;  %vm6431_vm15 = vcmp.ge.s32.totalorder %v2459_v43, 214748364  ;;  %v2217_v36 = vmul.u32 2221532811, %v2153_v22  ;;  %v1500_v1 = vadd.s32 %v5996_v48, %v7204_v29  ;;  %v1263_v41 = vpop.xlane.xlu0 %1262  ;;  %v1265_v22 = vpop.xlane.xlu1 %1264 }
 0x32d   : > { %v1963_v31 = vmul.u32 2146121005, %v1899_v42  ;;  %v6437_v32 = vpop.eup %4267  ;;  %v2218_v25 = vmul.u32 2221532811, %v2154_v52  ;;  %v3559_v60 = vpack.c.bf16 %v2602_v19, %v2601_v27  ;;  %v2603_v7 = vmul.f32 1.1111112, %v1420_v57 }
 0x32e   : > { %vm6439_vm0 = vcmp.ge.s32.totalorder %v2460_v28, 214748364  ;;  %v1964_v33 = vmul.u32 2146121005, %v1900_v13  ;;  %v3468_v46 = vshrl.u32 %v2217_v36, 16  ;;  %v1563_v49 = vmul.u32 128, %v1499_v10 }
 0x32f   : > { %vm3537_vm1 = vmpackc.low %vm6439_vm0, %vm6431_vm15  ;;  %v3406_v58 = vshrl.u32 %v1963_v31, 15  ;;  %v3469_v51 = vshrl.u32 %v2218_v25, 16  ;;  %v1564_v6 = vmul.u32 128, %v1500_v1  ;;  %4269 = vrcp.f32 %v1269_v35  ;;  %v7209_v57 = vld [vmem:[#allocation101_spill] sm:$0xff]  ;;  %v7210_v52 = vld [vmem:[#allocation103_spill] sm:$0xff] }
 0x330   : > { %3914 = vmatprep.subr.msk.bf16.mxu0 %vm3537_vm1, %v3538_v45  ;;  %v3407_v55 = vshrl.u32 %v1964_v33, 15  ;;  %v2409_v34 = vxor.u32 %v3468_v46, %v2217_v36  ;;  %v1627_v16 = vadd.s32 %v1563_v49, %v5146_v53  ;;  %v3562_v18 = vpack.c.bf16 %v2604_v50, %v2603_v7  ;;  %v1295_v7 = vpop.xlane.xlu0 %1294 }
 0x331   : > { %3915 = vmatpush3.bf16.msk.msra.mxu0 %vm3537_vm1, %v3538_v45  ;;  %v2155_v23 = vxor.u32 %v3406_v58, %v1963_v31  ;;  %v2410_v54 = vxor.u32 %v3469_v51, %v2218_v25  ;;  %v1628_v12 = vadd.s32 %v1564_v6, %v5146_v53  ;;  %v1406_v56 = vmul.f32 %v6394_v61, %v7205_v3  ;;  %v7206_v45 = vld [vmem:[#allocation57_spill] sm:$0xff] }
 0x332   : > { %v2156_v47 = vxor.u32 %v3407_v55, %v1964_v33  ;;  %v2473_v0 = vand.u32 2147483647, %v2409_v34  ;;  %v1693_v20 = vadd.s32 %v5164_v59, %v1627_v16  ;;  %v1407_v63 = vmul.f32 %v4264_v2, %v7206_v45  ;;  %v7213_v34 = vld [vmem:[#allocation50_spill] sm:$0xff] }
 0x333   : > { %v2219_v4 = vmul.u32 2221532811, %v2155_v23  ;;  %v2474_v27 = vand.u32 2147483647, %v2410_v54  ;;  %v1694_v19 = vadd.s32 %v5164_v59, %v1628_v12  ;;  %v1501_v42 = vadd.s32 %v5996_v48, %v7209_v57  ;;  %v7214_v54 = vld [vmem:[#allocation53_spill] sm:$0xff] }
 0x334   : > { %v2220_v15 = vmul.u32 2221532811, %v2156_v47  ;;  %vm6456_vm2 = vcmp.ge.s32.totalorder %v2473_v0, 214748364  ;;  %v3328_v17 = vshrl.u32 %v1693_v20, 16  ;;  %v1502_v13 = vadd.s32 %v5996_v48, %v7210_v52 }
 0x335   : > { %v3470_v43 = vshrl.u32 %v2219_v4, 16  ;;  %vm2538_vm3 = vcmp.ge.s32.totalorder %v2474_v27, 214748364  ;;  %v3329_v28 = vshrl.u32 %v1694_v19, 16  ;;  %4271 = vrcp.f32 %v1263_v41 }
 0x336   : > { %v3471_v61 = vshrl.u32 %v2220_v15, 16  ;;  %vm3558_vm4 = vmpackc.low %vm2538_vm3, %vm6456_vm2  ;;  %v1885_v50 = vxor.u32 %v3328_v17, %v1693_v20  ;;  %v1565_v8 = vmul.u32 128, %v1501_v42  ;;  %4273 = vrcp.f32 %v1265_v22 }
 0x337   : > { %v2411_v2 = vxor.u32 %v3470_v43, %v2219_v4  ;;  %3944 = vmatprep.subr.msk.bf16.mxu1 %vm3558_vm4, %v3559_v60  ;;  %v1886_v31 = vxor.u32 %v3329_v28, %v1694_v19  ;;  %v1566_v10 = vmul.u32 128, %v1502_v13  ;;  %v2589_v33 = vmul.f32 1.1111112, %v1406_v56 }
 0x338   : > { %v2412_v36 = vxor.u32 %v3471_v61, %v2220_v15  ;;  %3945 = vmatpush3.bf16.msk.msra.mxu1 %vm3558_vm4, %v3559_v60  ;;  %v1949_v25 = vmul.u32 2146121005, %v1885_v50  ;;  %v1629_v35 = vadd.s32 %v1565_v8, %v5146_v53  ;;  %v2590_v58 = vmul.f32 1.1111112, %v1407_v63 }
 0x339   : > { %v2475_v44 = vand.u32 2147483647, %v2411_v2  ;;  %v1950_v46 = vmul.u32 2146121005, %v1886_v31  ;;  %v1630_v49 = vadd.s32 %v1566_v10, %v5146_v53  ;;  %v6468_v51 = vpop.eup %4269  ;;  %v1408_v60 = vmul.f32 %v6365_v14, %v7213_v34 }
 0x33a   : > { %v2476_v1 = vand.u32 2147483647, %v2412_v36  ;;  %v3392_v6 = vshrl.u32 %v1949_v25, 15  ;;  %v1695_v23 = vadd.s32 %v5164_v59, %v1629_v35  ;;  %v1409_v47 = vmul.f32 %v6390_v11, %v7214_v54 }
 0x33b   : > { %vm6470_vm5 = vcmp.ge.s32.totalorder %v2475_v44, 214748364  ;;  %v3393_v16 = vshrl.u32 %v1950_v46, 15  ;;  %v1696_v12 = vadd.s32 %v5164_v59, %v1630_v49  ;;  %v1515_v3 = vadd.s32 %v6171_v30, %v7201_v5 }
 0x33c   : > { %vm2540_vm6 = vcmp.ge.s32.totalorder %v2476_v1, 214748364  ;;  %v2141_v0 = vxor.u32 %v3392_v6, %v1949_v25  ;;  %v3330_v4 = vshrl.u32 %v1695_v23, 16  ;;  %v1516_v14 = vadd.s32 %v6171_v30, %v7204_v29 }
 0x33d   : > { %vm3561_vm7 = vmpackc.low %vm2540_vm6, %vm6470_vm5  ;;  %4275 = vrcp.f32 %v1295_v7  ;;  %v2142_v56 = vxor.u32 %v3393_v16, %v1950_v46  ;;  %v3331_v20 = vshrl.u32 %v1696_v12, 16  ;;  %v3541_v11 = vpack.c.bf16 %v2590_v58, %v2589_v33  ;;  %v1297_v7 = vpop.xlane.xlu1 %1296 }
 0x33e   : > { %3946 = vmatprep.subr.msk.bf16.mxu1 %vm3561_vm7, %v3562_v18  ;;  %v2205_v27 = vmul.u32 2221532811, %v2141_v0  ;;  %v1887_v15 = vxor.u32 %v3330_v4, %v1695_v23  ;;  %v1579_v41 = vmul.u32 128, %v1515_v3  ;;  %v2591_v19 = vmul.f32 1.1111112, %v1408_v60  ;;  %v7217_v0 = vld [vmem:[#allocation58_spill] sm:$0xff] }
 0x33f   : > { %3947 = vmatpush3.bf16.msk.msra.mxu1 %vm3561_vm7, %v3562_v18  ;;  %v2206_v45 = vmul.u32 2221532811, %v2142_v56  ;;  %v1888_v63 = vxor.u32 %v3331_v20, %v1696_v12  ;;  %v1580_v24 = vmul.u32 128, %v1516_v14  ;;  %v6486_v43 = vpop.eup %4271  ;;  %v2592_v17 = vmul.f32 1.1111112, %v1409_v47 }
 0x340   : > { %v3456_v22 = vshrl.u32 %v2205_v27, 16  ;;  %v1951_v5 = vmul.u32 2146121005, %v1887_v15  ;;  %v1643_v29 = vadd.s32 %v1579_v41, %v5146_v53  ;;  %v6489_v42 = vpop.eup %4273  ;;  %v1517_v13 = vadd.s32 %v6171_v30, %v7209_v57 }
 0x341   : > { %v3457_v61 = vshrl.u32 %v2206_v45, 16  ;;  %v1952_v28 = vmul.u32 2146121005, %v1888_v63  ;;  %v1644_v18 = vadd.s32 %v1580_v24, %v5146_v53  ;;  %v1518_v36 = vadd.s32 %v6171_v30, %v7210_v52 }
 0x342   : > { %v2397_v2 = vxor.u32 %v3456_v22, %v2205_v27  ;;  %v3394_v50 = vshrl.u32 %v1951_v5, 15  ;;  %v1709_v8 = vadd.s32 %v5164_v59, %v1643_v29  ;;  %v1581_v25 = vmul.u32 128, %v1517_v13  ;;  %v7218_v22 = vld [vmem:[#allocation56_spill] sm:$0xff] }
 0x343   : > { %v2398_v31 = vxor.u32 %v3457_v61, %v2206_v45  ;;  %v3395_v10 = vshrl.u32 %v1952_v28, 15  ;;  %v1710_v44 = vadd.s32 %v5164_v59, %v1644_v18  ;;  %v1582_v46 = vmul.u32 128, %v1518_v36 }
 0x344   : > { %v2461_v33 = vand.u32 2147483647, %v2397_v2  ;;  %v2143_v35 = vxor.u32 %v3394_v50, %v1951_v5  ;;  %v3344_v1 = vshrl.u32 %v1709_v8, 16  ;;  %v1645_v57 = vadd.s32 %v1581_v25, %v5146_v53 }
 0x345   : > { %v2462_v58 = vand.u32 2147483647, %v2398_v31  ;;  %v2144_v49 = vxor.u32 %v3395_v10, %v1952_v28  ;;  %v3345_v55 = vshrl.u32 %v1710_v44, 16  ;;  %v1646_v60 = vadd.s32 %v1582_v46, %v5146_v53  ;;  %v1299_v31 = vpop.xlane.xlu0 %1298 }
 0x346   : > { %vm6499_vm8 = vcmp.ge.s32.totalorder %v2461_v33, 214748364  ;;  %v2207_v52 = vmul.u32 2221532811, %v2143_v35  ;;  %v1901_v34 = vxor.u32 %v3344_v1, %v1709_v8  ;;  %v1711_v47 = vadd.s32 %v5164_v59, %v1645_v57  ;;  %v7223_v35 = vld [vmem:[#allocation52_spill] sm:$0xff] }
 0x347   : > { %v6504_v23 = vpop.eup %4275  ;;  %vm2526_vm9 = vcmp.ge.s32.totalorder %v2462_v58, 214748364  ;;  %v2208_v16 = vmul.u32 2221532811, %v2144_v49  ;;  %v1902_v54 = vxor.u32 %v3345_v55, %v1710_v44  ;;  %v1423_v4 = vmul.f32 %v6437_v32, %v7217_v0 }
 0x348   : > { %vm3540_vm10 = vmpackc.low %vm2526_vm9, %vm6499_vm8  ;;  %v3458_v12 = vshrl.u32 %v2207_v52, 16  ;;  %v1965_v3 = vmul.u32 2146121005, %v1901_v34  ;;  %v1712_v14 = vadd.s32 %v5164_v59, %v1646_v60  ;;  %4277 = vrcp.f32 %v1297_v7 }
 0x349   : > { %3916 = vmatprep.subr.msk.bf16.mxu0 %vm3540_vm10, %v3541_v11  ;;  %v3459_v56 = vshrl.u32 %v2208_v16, 16  ;;  %v1966_v20 = vmul.u32 2146121005, %v1902_v54  ;;  %v3346_v27 = vshrl.u32 %v1711_v47, 16  ;;  %v3544_v41 = vpack.c.bf16 %v2592_v17, %v2591_v19  ;;  %v7228_v19 = vld [vmem:[#allocation104_spill] sm:$0xff] }
 0x34a   : > { %3917 = vmatpush3.bf16.msk.msra.mxu0 %vm3540_vm10, %v3541_v11  ;;  %v2399_v15 = vxor.u32 %v3458_v12, %v2207_v52  ;;  %v3408_v45 = vshrl.u32 %v1965_v3, 15  ;;  %v3347_v63 = vshrl.u32 %v1712_v14, 16  ;;  %v1422_v5 = vmul.f32 %v6416_v9, %v7218_v22  ;;  %v7224_v52 = vld [vmem:[#allocation54_spill] sm:$0xff] }
 0x34b   : > { %v2400_v24 = vxor.u32 %v3459_v56, %v2208_v16  ;;  %v3409_v29 = vshrl.u32 %v1966_v20, 15  ;;  %v1903_v61 = vxor.u32 %v3346_v27, %v1711_v47  ;;  %v2606_v18 = vmul.f32 1.1111112, %v1423_v4 }
 0x34c   : > { %v2463_v32 = vand.u32 2147483647, %v2399_v15  ;;  %v2157_v28 = vxor.u32 %v3408_v45, %v1965_v3  ;;  %v1904_v13 = vxor.u32 %v3347_v63, %v1712_v14  ;;  %v1503_v11 = vadd.s32 %v5996_v48, %v5638_v21 }
 0x34d   : > { %v2464_v2 = vand.u32 2147483647, %v2400_v24  ;;  %v2158_v50 = vxor.u32 %v3409_v29, %v1966_v20  ;;  %v1967_v8 = vmul.u32 2146121005, %v1903_v61  ;;  %v1504_v9 = vadd.s32 %v5996_v48, %v5642_v40 }
 0x34e   : > { %vm6516_vm11 = vcmp.ge.s32.totalorder %v2463_v32, 214748364  ;;  %v2221_v17 = vmul.u32 2221532811, %v2157_v28  ;;  %v1968_v36 = vmul.u32 2146121005, %v1904_v13  ;;  %v1425_v1 = vmul.f32 %v6410_v62, %v7223_v35 }
 0x34f   : > { %vm6522_vm12 = vcmp.ge.s32.totalorder %v2464_v2, 214748364  ;;  %v2222_v10 = vmul.u32 2221532811, %v2158_v50  ;;  %v3410_v44 = vshrl.u32 %v1967_v8, 15  ;;  %v1567_v25 = vmul.u32 128, %v1503_v11 }
 0x350   : > { %vm3543_vm13 = vmpackc.low %vm6522_vm12, %vm6516_vm11  ;;  %v3472_v33 = vshrl.u32 %v2221_v17, 16  ;;  %v3411_v46 = vshrl.u32 %v1968_v36, 15  ;;  %v1568_v58 = vmul.u32 128, %v1504_v9  ;;  %v2605_v55 = vmul.f32 1.1111112, %v1422_v5  ;;  %v7227_v32 = vld [vmem:[#allocation105_spill] sm:$0xff] }
 0x351   : > { %3918 = vmatprep.subr.msk.bf16.mxu0 %vm3543_vm13, %v3544_v41  ;;  %v3473_v49 = vshrl.u32 %v2222_v10, 16  ;;  %v2159_v57 = vxor.u32 %v3410_v44, %v1967_v8  ;;  %v1631_v7 = vadd.s32 %v1567_v25, %v5146_v53  ;;  %v1424_v34 = vmul.f32 %v6378_v39, %v7224_v52 }
 0x352   : > { %v2413_v6 = vxor.u32 %v3472_v33, %v2221_v17  ;;  %3919 = vmatpush3.bf16.msk.msra.mxu0 %vm3543_vm13, %v3544_v41  ;;  %v2160_v60 = vxor.u32 %v3411_v46, %v1968_v36  ;;  %v1632_v16 = vadd.s32 %v1568_v58, %v5146_v53  ;;  %v6536_v54 = vpop.eup %4277  ;;  %v3565_v62 = vpack.c.bf16 %v2606_v18, %v2605_v55  ;;  %v1301_v33 = vpop.xlane.xlu1 %1300 }
 0x353   : > { %v2414_v47 = vxor.u32 %v3473_v49, %v2222_v10  ;;  %v2223_v12 = vmul.u32 2221532811, %v2159_v57  ;;  %v1697_v0 = vadd.s32 %v5164_v59, %v1631_v7  ;;  %v2608_v14 = vmul.f32 1.1111112, %v1425_v1 }
 0x354   : > { %v2477_v4 = vand.u32 2147483647, %v2413_v6  ;;  %v2224_v3 = vmul.u32 2221532811, %v2160_v60  ;;  %v1698_v56 = vadd.s32 %v5164_v59, %v1632_v16  ;;  %v1505_v39 = vadd.s32 %v5996_v48, %v7081_v26 }
 0x355   : > { %v2478_v20 = vand.u32 2147483647, %v2414_v47  ;;  %v3474_v27 = vshrl.u32 %v2223_v12, 16  ;;  %v3332_v15 = vshrl.u32 %v1697_v0, 16  ;;  %v1506_v24 = vadd.s32 %v5996_v48, %v7084_v38 }
 0x356   : > { %vm6542_vm14 = vcmp.ge.s32.totalorder %v2477_v4, 214748364  ;;  %v3475_v45 = vshrl.u32 %v2224_v3, 16  ;;  %v3333_v63 = vshrl.u32 %v1698_v56, 16  ;;  %v1569_v29 = vmul.u32 128, %v1505_v39 }
 0x357   : > { %vm2542_vm15 = vcmp.ge.s32.totalorder %v2478_v20, 214748364  ;;  %v2415_v22 = vxor.u32 %v3474_v27, %v2223_v12  ;;  %v1889_v5 = vxor.u32 %v3332_v15, %v1697_v0  ;;  %v1411_v28 = vmul.f32 %v6489_v42, %v7227_v32 }
 0x358   : > { %vm3564_vm0 = vmpackc.low %vm2542_vm15, %vm6542_vm14  ;;  %v2416_v61 = vxor.u32 %v3475_v45, %v2224_v3  ;;  %v1890_v18 = vxor.u32 %v3333_v63, %v1698_v56  ;;  %v1570_v13 = vmul.u32 128, %v1506_v24  ;;  %v2607_v50 = vmul.f32 1.1111112, %v1424_v34  ;;  %v7233_v3 = vld [vmem:[#allocation102_spill] sm:$0xff] }
 0x359   : > { %3948 = vmatprep.subr.msk.bf16.mxu1 %vm3564_vm0, %v3565_v62  ;;  %v2479_v2 = vand.u32 2147483647, %v2415_v22  ;;  %v1953_v8 = vmul.u32 2146121005, %v1889_v5  ;;  %v1633_v11 = vadd.s32 %v1569_v29, %v5146_v53  ;;  %v1410_v17 = vmul.f32 %v6486_v43, %v7228_v19 }
 0x35a   : > { %3949 = vmatpush3.bf16.msk.msra.mxu1 %vm3564_vm0, %v3565_v62  ;;  %v2480_v48 = vand.u32 2147483647, %v2416_v61  ;;  %v1954_v36 = vmul.u32 2146121005, %v1890_v18  ;;  %v1634_v9 = vadd.s32 %v1570_v13, %v5146_v53  ;;  %v3568_v42 = vpack.c.bf16 %v2608_v14, %v2607_v50 }
 0x35b   : > { %vm6556_vm1 = vcmp.ge.s32.totalorder %v2479_v2, 214748364  ;;  %v3396_v44 = vshrl.u32 %v1953_v8, 15  ;;  %v1699_v25 = vadd.s32 %v5164_v59, %v1633_v11  ;;  %v2594_v46 = vmul.f32 1.1111112, %v1411_v28 }
 0x35c   : > { %vm6561_vm2 = vcmp.ge.s32.totalorder %v2480_v48, 214748364  ;;  %v3397_v1 = vshrl.u32 %v1954_v36, 15  ;;  %v1700_v43 = vadd.s32 %v5164_v59, %v1634_v9  ;;  %v1519_v55 = vadd.s32 %v6171_v30, %v5638_v21  ;;  %v7236_v9 = vld [vmem:[#allocation55_spill] sm:$0xff] }
 0x35d   : > { %vm3567_vm3 = vmpackc.low %vm6561_vm2, %vm6556_vm1  ;;  %v2145_v58 = vxor.u32 %v3396_v44, %v1953_v8  ;;  %v3334_v49 = vshrl.u32 %v1699_v25, 16  ;;  %v1520_v57 = vadd.s32 %v6171_v30, %v5642_v40  ;;  %4279 = vrcp.f32 %v1299_v31 }
 0x35e   : > { %3950 = vmatprep.subr.msk.bf16.mxu1 %vm3567_vm3, %v3568_v42  ;;  %v2146_v7 = vxor.u32 %v3397_v1, %v1954_v36  ;;  %v2593_v6 = vmul.f32 1.1111112, %v1410_v17  ;;  %v3335_v52 = vshrl.u32 %v1700_v43, 16  ;;  %4281 = vrcp.f32 %v1301_v33 }
 0x35f   : > { %3951 = vmatpush3.bf16.msk.msra.mxu1 %vm3567_vm3, %v3568_v42  ;;  %v2209_v34 = vmul.u32 2221532811, %v2145_v58  ;;  %v1891_v60 = vxor.u32 %v3334_v49, %v1699_v25  ;;  %v1583_v16 = vmul.u32 128, %v1519_v55  ;;  %v1413_v21 = vmul.f32 %v6468_v51, %v7233_v3 }
 0x360   : > { %v2210_v47 = vmul.u32 2221532811, %v2146_v7  ;;  %v3547_v62 = vpack.c.bf16 %v2594_v46, %v2593_v6  ;;  %v1892_v12 = vxor.u32 %v3335_v52, %v1700_v43  ;;  %v1584_v0 = vmul.u32 128, %v1520_v57 }
 0x361   : > { %v3460_v4 = vshrl.u32 %v2209_v34, 16  ;;  %v1955_v14 = vmul.u32 2146121005, %v1891_v60  ;;  %v1647_v40 = vadd.s32 %v1583_v16, %v5146_v53  ;;  %v1521_v15 = vadd.s32 %v6171_v30, %v7081_v26 }
 0x362   : > { %v3461_v56 = vshrl.u32 %v2210_v47, 16  ;;  %v1956_v20 = vmul.u32 2146121005, %v1892_v12  ;;  %v1648_v27 = vadd.s32 %v1584_v0, %v5146_v53  ;;  %v1522_v63 = vadd.s32 %v6171_v30, %v7084_v38 }
 0x363   : > { %v2401_v39 = vxor.u32 %v3460_v4, %v2209_v34  ;;  %v3398_v41 = vshrl.u32 %v1955_v14, 15  ;;  %v1713_v45 = vadd.s32 %v5164_v59, %v1647_v40  ;;  %v1585_v5 = vmul.u32 128, %v1521_v15  ;;  %v7237_v34 = vld [vmem:[#allocation108_spill] sm:$0xff] }
 0x364   : > { %v2402_v24 = vxor.u32 %v3461_v56, %v2210_v47  ;;  %v3399_v22 = vshrl.u32 %v1956_v20, 15  ;;  %v1714_v51 = vadd.s32 %v5164_v59, %v1648_v27  ;;  %v1586_v28 = vmul.u32 128, %v1522_v63 }
 0x365   : > { %v2465_v29 = vand.u32 2147483647, %v2401_v39  ;;  %v2147_v61 = vxor.u32 %v3398_v41, %v1955_v14  ;;  %v3348_v32 = vshrl.u32 %v1713_v45, 16  ;;  %v1649_v26 = vadd.s32 %v1585_v5, %v5146_v53  ;;  %v7241_v39 = vld [vmem:[#allocation109_spill] sm:$0xff] }
 0x366   : > { %v2466_v18 = vand.u32 2147483647, %v2402_v24  ;;  %v2148_v13 = vxor.u32 %v3399_v22, %v1956_v20  ;;  %v3349_v2 = vshrl.u32 %v1714_v51, 16  ;;  %v1650_v30 = vadd.s32 %v1586_v28, %v5146_v53 }
 0x367   : > { %vm6585_vm4 = vcmp.ge.s32.totalorder %v2465_v29, 214748364  ;;  %v2211_v8 = vmul.u32 2221532811, %v2147_v61  ;;  %v1905_v38 = vxor.u32 %v3348_v32, %v1713_v45  ;;  %v4280_v11 = vpop.eup %4279  ;;  %v1715_v17 = vadd.s32 %v5164_v59, %v1649_v26  ;;  %v7244_v26 = vld [vmem:[#allocation31_spill] sm:$0xff] }
 0x368   : > { %vm2530_vm5 = vcmp.ge.s32.totalorder %v2466_v18, 214748364  ;;  %v2212_v48 = vmul.u32 2221532811, %v2148_v13  ;;  %v1906_v19 = vxor.u32 %v3349_v2, %v1714_v51  ;;  %v4282_v36 = vpop.eup %4281  ;;  %v1412_v31 = vmul.f32 %v6427_v37, %v7236_v9  ;;  %v7242_v51 = vld [vmem:[#allocation106_spill] sm:$0xff]  ;;  %v7243_v18 = vld [vmem:[#allocation29_spill] sm:$0xff] }
 0x369   : > { %vm3546_vm6 = vmpackc.low %vm2530_vm5, %vm6585_vm4  ;;  %v3462_v10 = vshrl.u32 %v2211_v8, 16  ;;  %v1969_v42 = vmul.u32 2146121005, %v1905_v38  ;;  %v1716_v44 = vadd.s32 %v5164_v59, %v1650_v30  ;;  %v3350_v33 = vshrl.u32 %v1715_v17, 16  ;;  %v7248_v9 = vld [vmem:[#allocation32_spill] sm:$0xff] }
 0x36a   : > { %3920 = vmatprep.subr.msk.bf16.mxu0 %vm3546_vm6, %v3547_v62  ;;  %v3463_v25 = vshrl.u32 %v2212_v48, 16  ;;  %v1970_v53 = vmul.u32 2146121005, %v1906_v19  ;;  %v2596_v58 = vmul.f32 1.1111112, %v1413_v21  ;;  %v1427_v59 = vmul.f32 %v6536_v54, %v7237_v34  ;;  %v7245_v19 = vld [vmem:[#allocation33_spill] sm:$0xff] }
 0x36b   : > { %3921 = vmatpush3.bf16.msk.msra.mxu0 %vm3546_vm6, %v3547_v62  ;;  %v2403_v35 = vxor.u32 %v3462_v10, %v2211_v8  ;;  %v3412_v1 = vshrl.u32 %v1969_v42, 15  ;;  %v3351_v46 = vshrl.u32 %v1716_v44, 16  ;;  %v1907_v55 = vxor.u32 %v3350_v33, %v1715_v17  ;;  %v7240_v62 = vld [vmem:[#allocation107_spill] sm:$0xff]  ;;  %v7255_v33 = vld [vmem:[#allocation40_spill] sm:$0xff] }
 0x36c   : > { %v2404_v43 = vxor.u32 %v3463_v25, %v2212_v48  ;;  %v3413_v49 = vshrl.u32 %v1970_v53, 15  ;;  %v2595_v7 = vmul.f32 1.1111112, %v1412_v31  ;;  %v1426_v12 = vmul.f32 %v6504_v23, %v7240_v62  ;;  %v7246_v17 = vld [vmem:[#allocation35_spill] sm:$0xff]  ;;  %v7249_v31 = vld [vmem:[#allocation37_spill] sm:$0xff] }
 0x36d   : > { %v2467_v57 = vand.u32 2147483647, %v2403_v35  ;;  %v2161_v6 = vxor.u32 %v3412_v1, %v1969_v42  ;;  %v1908_v37 = vxor.u32 %v3351_v46, %v1716_v44  ;;  %v1971_v16 = vmul.u32 2146121005, %v1907_v55  ;;  %v7250_v10 = vld [vmem:[#allocation39_spill] sm:$0xff]  ;;  %v7251_v42 = vld [vmem:[#allocation34_spill] sm:$0xff] }
 0x36e   : > { %v2468_v52 = vand.u32 2147483647, %v2404_v43  ;;  %v2162_v60 = vxor.u32 %v3413_v49, %v1970_v53  ;;  %v3550_v3 = vpack.c.bf16 %v2596_v58, %v2595_v7  ;;  %v2610_v20 = vmul.f32 1.1111112, %v1427_v59  ;;  %v7252_v44 = vld [vmem:[#allocation36_spill] sm:$0xff]  ;;  %v7253_v25 = vld [vmem:[#allocation41_spill] sm:$0xff] }
 0x36f   : > { %vm6598_vm7 = vcmp.ge.s32.totalorder %v2467_v57, 214748364  ;;  %v2225_v0 = vmul.u32 2221532811, %v2161_v6  ;;  %v1972_v4 = vmul.u32 2146121005, %v1908_v37  ;;  %v1429_v41 = vmul.f32 %v4282_v36, %v7241_v39 }
 0x370   : > { %vm2532_vm8 = vcmp.ge.s32.totalorder %v2468_v52, 214748364  ;;  %v2226_v21 = vmul.u32 2221532811, %v2162_v60  ;;  %v3414_v14 = vshrl.u32 %v1971_v16, 15  ;;  %v1428_v5 = vmul.f32 %v4280_v11, %v7242_v51  ;;  %v7247_v36 = vld [vmem:[#allocation30_spill] sm:$0xff] }
 0x371   : > { %vm3549_vm9 = vmpackc.low %vm2532_vm8, %vm6598_vm7  ;;  %v3476_v40 = vshrl.u32 %v2225_v0, 16  ;;  %v3415_v54 = vshrl.u32 %v1972_v4, 15  ;;  %v2609_v63 = vmul.f32 1.1111112, %v1426_v12  ;;  %v2612_v2 = vmul.f32 1.1111112, %v1429_v41 }
 0x372   : > { %3922 = vmatprep.subr.msk.bf16.mxu0 %vm3549_vm9, %v3550_v3  ;;  %v3477_v56 = vshrl.u32 %v2226_v21, 16  ;;  %v2163_v27 = vxor.u32 %v3414_v14, %v1971_v16  ;;  %v2611_v38 = vmul.f32 1.1111112, %v1428_v5  ;;  %v7254_v53 = vld [vmem:[#allocation38_spill] sm:$0xff] }
 0x373   : > { %v2417_v15 = vxor.u32 %v3476_v40, %v2225_v0  ;;  %3923 = vmatpush3.bf16.msk.msra.mxu0 %vm3549_vm9, %v3550_v3  ;;  %v2164_v23 = vxor.u32 %v3415_v54, %v1972_v4  ;;  %v3571_v32 = vpack.c.bf16 %v2610_v20, %v2609_v63  ;;  %v7256_v35 = vld [vmem:[#allocation42_spill] sm:$0xff] }
 0x374   : > { %v2418_v45 = vxor.u32 %v3477_v56, %v2226_v21  ;;  %v2227_v24 = vmul.u32 2221532811, %v2163_v27  ;;  %v3574_v48 = vpack.c.bf16 %v2612_v2, %v2611_v38 }
 0x375   : > { %v2481_v22 = vand.u32 2147483647, %v2417_v15  ;;  %v2228_v29 = vmul.u32 2221532811, %v2164_v23 }
 0x376   : > { %v2482_v61 = vand.u32 2147483647, %v2418_v45  ;;  %v3478_v28 = vshrl.u32 %v2227_v24, 16  ;;  %3925 = vmatmul.mubr.bf16.vlgmr.msra.gmra.mrb[48].mxu0 %v7243_v18 }
 0x377   : > { %vm2545_vm10 = vcmp.ge.s32.totalorder %v2481_v22, 214748364  ;;  %v3479_v13 = vshrl.u32 %v2228_v29, 16  ;;  %3928 = vmatprep.mubr.bf16.mxu0 %v7244_v26 }
 0x378   : > { %vm2546_vm11 = vcmp.ge.s32.totalorder %v2482_v61, 214748364  ;;  %v2419_v50 = vxor.u32 %v3478_v28, %v2227_v24 }
 0x379   : > { %vm3570_vm12 = vmpackc.low %vm2546_vm11, %vm2545_vm10  ;;  %v2420_v8 = vxor.u32 %v3479_v13, %v2228_v29 }
 0x37a   : > { %3952 = vmatprep.subr.msk.bf16.mxu1 %vm3570_vm12, %v3571_v32  ;;  %v2483_v30 = vand.u32 2147483647, %v2419_v50 }
 0x37b   : > { %3953 = vmatpush3.bf16.msk.msra.mxu1 %vm3570_vm12, %v3571_v32  ;;  %v2484_v11 = vand.u32 2147483647, %v2420_v8 }
 0x37c   : > { %vm2547_vm13 = vcmp.ge.s32.totalorder %v2483_v30, 214748364 }
 0x37d   : > { %vm2548_vm14 = vcmp.ge.s32.totalorder %v2484_v11, 214748364 }
 0x37e   : > { %vm3573_vm15 = vmpackc.low %vm2548_vm14, %vm2547_vm13  ;;  %3929 = vmatmul.mubr.bf16.gmra.mrb[52].mxu0 %v7245_v19 }
 0x37f   : > { %3954 = vmatprep.subr.msk.bf16.mxu1 %vm3573_vm15, %v3574_v48  ;;  %3932 = vmatprep.mubr.bf16.mxu0 %v7246_v17 }
 0x380   : > { %3955 = vmatpush3.bf16.msk.msra.mxu1 %vm3573_vm15, %v3574_v48 }
 0x383   : > { %3957 = vmatmul.mubr.bf16.vlgmr.msra.gmra.mrb[48].mxu1 %v7247_v36 }
 0x384   : > { %3960 = vmatprep.mubr.bf16.mxu1 %v7248_v9 }
 0x386   : > { %3933 = vmatmul.mubr.bf16.gmra.mrb[56].mxu0 %v7249_v31 }
 0x387   : > { %3936 = vmatprep.mubr.bf16.mxu0 %v7250_v10 }
 0x38b   : > { %3961 = vmatmul.mubr.bf16.gmra.mrb[52].mxu1 %v7251_v42 }
 0x38c   : > { %3964 = vmatprep.mubr.bf16.mxu1 %v7252_v44 }
 0x38e   : > { %3937 = vmatmul.mubr.bf16.gmra.mrb[60].mxu0 %v7253_v25 }
 0x393   : > { %3965 = vmatmul.mubr.bf16.gmra.mrb[56].mxu1 %v7254_v53 }
 0x394   : > { %3968 = vmatprep.mubr.bf16.mxu1 %v7255_v33 }
 0x39b   : > { %3969 = vmatmul.mubr.bf16.gmra.mrb[60].mxu1 %v7256_v35 }
 0x3cf   : > { %v3862_v1 = vpop.f32.mrb[32].mxu0 }
 0x3d0   : > { %3099 = vst [vmem:[%s6623_s18 + $0x10] sm:$0xff] %v3862_v1  ;;  %v2743_v46 = vpop.f32.mrb[33].mxu0 }
 0x3d1   : > { %3097 = vst [vmem:[%s6623_s18] sm:$0xff] %v2743_v46  ;;  %v3863_v43 = vpop.f32.mrb[34].mxu0 }
 0x3d2   : > { %3100 = vst [vmem:[%s6623_s18 + $0x18] sm:$0xff] %v3863_v43  ;;  %v2746_v58 = vpop.f32.mrb[35].mxu0 }
 0x3d3   : > { %v3894_v49 = vpop.f32.mrb[32].mxu1  ;;  %3098 = vst [vmem:[%s6623_s18 + $0x8] sm:$0xff] %v2746_v58 }
 0x3d4   : > { %3115 = vst [vmem:[%s6623_s18 + $0x90] sm:$0xff] %v3894_v49  ;;  %v2840_v55 = vpop.f32.mrb[33].mxu1 }
 0x3d5   : > { %3113 = vst [vmem:[%s6623_s18 + $0x80] sm:$0xff] %v2840_v55  ;;  %v3895_v57 = vpop.f32.mrb[34].mxu1 }
 0x3d6   : > { %3116 = vst [vmem:[%s6623_s18 + $0x98] sm:$0xff] %v3895_v57  ;;  %v2843_v7 = vpop.f32.mrb[35].mxu1 }
 0x3d7   : > { %3114 = vst [vmem:[%s6623_s18 + $0x88] sm:$0xff] %v2843_v7  ;;  %v3866_v6 = vpop.f32.mrb[36].mxu0 }
 0x3d8   : > { %3103 = vst [vmem:[%s6623_s18 + $0x30] sm:$0xff] %v3866_v6  ;;  %v2759_v37 = vpop.f32.mrb[37].mxu0 }
 0x3d9   : > { %3101 = vst [vmem:[%s6623_s18 + $0x20] sm:$0xff] %v2759_v37  ;;  %v3867_v52 = vpop.f32.mrb[38].mxu0 }
 0x3da   : > { %3104 = vst [vmem:[%s6623_s18 + $0x38] sm:$0xff] %v3867_v52  ;;  %v2762_v34 = vpop.f32.mrb[39].mxu0 }
 0x3db   : > { %v3898_v59 = vpop.f32.mrb[36].mxu1  ;;  %3102 = vst [vmem:[%s6623_s18 + $0x28] sm:$0xff] %v2762_v34 }
 0x3dc   : > { %3119 = vst [vmem:[%s6623_s18 + $0xb0] sm:$0xff] %v3898_v59  ;;  %v2856_v60 = vpop.f32.mrb[37].mxu1 }
 0x3dd   : > { %3117 = vst [vmem:[%s6623_s18 + $0xa0] sm:$0xff] %v2856_v60  ;;  %v3899_v16 = vpop.f32.mrb[38].mxu1 }
 0x3de   : > { %3120 = vst [vmem:[%s6623_s18 + $0xb8] sm:$0xff] %v3899_v16  ;;  %v2859_v47 = vpop.f32.mrb[39].mxu1 }
 0x3df   : > { %3118 = vst [vmem:[%s6623_s18 + $0xa8] sm:$0xff] %v2859_v47  ;;  %v3870_v62 = vpop.f32.mrb[40].mxu0 }
 0x3e0   : > { %3107 = vst [vmem:[%s6623_s18 + $0x50] sm:$0xff] %v3870_v62  ;;  %v2775_v12 = vpop.f32.mrb[41].mxu0 }
 0x3e1   : > { %3105 = vst [vmem:[%s6623_s18 + $0x40] sm:$0xff] %v2775_v12  ;;  %v3871_v0 = vpop.f32.mrb[42].mxu0 }
 0x3e2   : > { %3108 = vst [vmem:[%s6623_s18 + $0x58] sm:$0xff] %v3871_v0  ;;  %v2778_v4 = vpop.f32.mrb[43].mxu0 }
 0x3e3   : > { %v3902_v3 = vpop.f32.mrb[40].mxu1  ;;  %3106 = vst [vmem:[%s6623_s18 + $0x48] sm:$0xff] %v2778_v4 }
 0x3e4   : > { %3123 = vst [vmem:[%s6623_s18 + $0xd0] sm:$0xff] %v3902_v3  ;;  %v2872_v21 = vpop.f32.mrb[41].mxu1 }
 0x3e5   : > { %3121 = vst [vmem:[%s6623_s18 + $0xc0] sm:$0xff] %v2872_v21  ;;  %v3903_v14 = vpop.f32.mrb[42].mxu1 }
 0x3e6   : > { %3124 = vst [vmem:[%s6623_s18 + $0xd8] sm:$0xff] %v3903_v14  ;;  %v2875_v40 = vpop.f32.mrb[43].mxu1 }
 0x3e7   : > { %3122 = vst [vmem:[%s6623_s18 + $0xc8] sm:$0xff] %v2875_v40  ;;  %v3874_v54 = vpop.f32.mrb[44].mxu0 }
 0x3e8   : > { %3111 = vst [vmem:[%s6623_s18 + $0x70] sm:$0xff] %v3874_v54  ;;  %v2791_v56 = vpop.f32.mrb[45].mxu0 }
 0x3e9   : > { %3109 = vst [vmem:[%s6623_s18 + $0x60] sm:$0xff] %v2791_v56  ;;  %v3875_v20 = vpop.f32.mrb[46].mxu0 }
 0x3ea   : > { %3112 = vst [vmem:[%s6623_s18 + $0x78] sm:$0xff] %v3875_v20  ;;  %v2794_v27 = vpop.f32.mrb[47].mxu0 }
 0x3eb   : > { %v3906_v15 = vpop.f32.mrb[44].mxu1  ;;  %3110 = vst [vmem:[%s6623_s18 + $0x68] sm:$0xff] %v2794_v27 }
 0x3ec   : > { %3127 = vst [vmem:[%s6623_s18 + $0xf0] sm:$0xff] %v3906_v15  ;;  %v2888_v39 = vpop.f32.mrb[45].mxu1 }
 0x3ed   : > { %3125 = vst [vmem:[%s6623_s18 + $0xe0] sm:$0xff] %v2888_v39  ;;  %v3907_v41 = vpop.f32.mrb[46].mxu1 }
 0x3ee   : > { %3128 = vst [vmem:[%s6623_s18 + $0xf8] sm:$0xff] %v3907_v41  ;;  %v2891_v23 = vpop.f32.mrb[47].mxu1 }
 0x3ef   : > { %3126 = vst [vmem:[%s6623_s18 + $0xe8] sm:$0xff] %v2891_v23 }
 0x449   : > { %v3926_v45 = vpop.f32.mrb[48].mxu0 }
 0x44a   : > { %3131 = vst [vmem:[%s6623_s18 + $0x110] sm:$0xff] %v3926_v45  ;;  %v2937_v63 = vpop.f32.mrb[49].mxu0 }
 0x44b   : > { %3129 = vst [vmem:[%s6623_s18 + $0x100] sm:$0xff] %v2937_v63  ;;  %v3927_v24 = vpop.f32.mrb[50].mxu0 }
 0x44c   : > { %3132 = vst [vmem:[%s6623_s18 + $0x118] sm:$0xff] %v3927_v24  ;;  %v2940_v22 = vpop.f32.mrb[51].mxu0 }
 0x44d   : > { %3130 = vst [vmem:[%s6623_s18 + $0x108] sm:$0xff] %v2940_v22 }
 0x451   : > { %v3930_v51 = vpop.f32.mrb[52].mxu0 }
 0x452   : > { %3135 = vst [vmem:[%s6623_s18 + $0x130] sm:$0xff] %v3930_v51  ;;  %v2953_v5 = vpop.f32.mrb[53].mxu0 }
 0x453   : > { %3133 = vst [vmem:[%s6623_s18 + $0x120] sm:$0xff] %v2953_v5  ;;  %v3931_v29 = vpop.f32.mrb[54].mxu0 }
 0x454   : > { %3136 = vst [vmem:[%s6623_s18 + $0x138] sm:$0xff] %v3931_v29  ;;  %v2956_v61 = vpop.f32.mrb[55].mxu0 }
 0x455   : > { %3134 = vst [vmem:[%s6623_s18 + $0x128] sm:$0xff] %v2956_v61 }
 0x456   : > { %v3958_v32 = vpop.f32.mrb[48].mxu1 }
 0x457   : > { %3147 = vst [vmem:[%s6623_s18 + $0x190] sm:$0xff] %v3958_v32  ;;  %v3034_v28 = vpop.f32.mrb[49].mxu1 }
 0x458   : > { %3145 = vst [vmem:[%s6623_s18 + $0x180] sm:$0xff] %v3034_v28  ;;  %v3959_v18 = vpop.f32.mrb[50].mxu1 }
 0x459   : > { %3148 = vst [vmem:[%s6623_s18 + $0x198] sm:$0xff] %v3959_v18  ;;  %v3037_v13 = vpop.f32.mrb[51].mxu1  ;;  %v3934_v2 = vpop.f32.mrb[56].mxu0 }
 0x45a   : > { %3146 = vst [vmem:[%s6623_s18 + $0x188] sm:$0xff] %v3037_v13  ;;  %3139 = vst [vmem:[%s6623_s18 + $0x150] sm:$0xff] %v3934_v2  ;;  %v2969_v26 = vpop.f32.mrb[57].mxu0 }
 0x45b   : > { %3137 = vst [vmem:[%s6623_s18 + $0x140] sm:$0xff] %v2969_v26  ;;  %v3935_v50 = vpop.f32.mrb[58].mxu0 }
 0x45c   : > { %3140 = vst [vmem:[%s6623_s18 + $0x158] sm:$0xff] %v3935_v50  ;;  %v2972_v8 = vpop.f32.mrb[59].mxu0 }
 0x45d   : > { %3138 = vst [vmem:[%s6623_s18 + $0x148] sm:$0xff] %v2972_v8 }
 0x45e   : > { %v3962_v38 = vpop.f32.mrb[52].mxu1 }
 0x45f   : > { %3151 = vst [vmem:[%s6623_s18 + $0x1b0] sm:$0xff] %v3962_v38  ;;  %v3050_v30 = vpop.f32.mrb[53].mxu1 }
 0x460   : > { %3149 = vst [vmem:[%s6623_s18 + $0x1a0] sm:$0xff] %v3050_v30  ;;  %v3963_v11 = vpop.f32.mrb[54].mxu1 }
 0x461   : > { %3152 = vst [vmem:[%s6623_s18 + $0x1b8] sm:$0xff] %v3963_v11  ;;  %v3053_v48 = vpop.f32.mrb[55].mxu1  ;;  %v3938_v19 = vpop.f32.mrb[60].mxu0 }
 0x462   : > { %3150 = vst [vmem:[%s6623_s18 + $0x1a8] sm:$0xff] %v3053_v48  ;;  %3143 = vst [vmem:[%s6623_s18 + $0x170] sm:$0xff] %v3938_v19  ;;  %v2985_v17 = vpop.f32.mrb[61].mxu0 }
 0x463   : > { %3141 = vst [vmem:[%s6623_s18 + $0x160] sm:$0xff] %v2985_v17  ;;  %v3939_v36 = vpop.f32.mrb[62].mxu0 }
 0x464   : > { %3144 = vst [vmem:[%s6623_s18 + $0x178] sm:$0xff] %v3939_v36  ;;  %v2988_v9 = vpop.f32.mrb[63].mxu0 }
 0x465   : > { %3142 = vst [vmem:[%s6623_s18 + $0x168] sm:$0xff] %v2988_v9 }
 0x466   : > { %v3966_v31 = vpop.f32.mrb[56].mxu1 }
 0x467   : > { %3155 = vst [vmem:[%s6623_s18 + $0x1d0] sm:$0xff] %v3966_v31  ;;  %v3066_v10 = vpop.f32.mrb[57].mxu1 }
 0x468   : > { %3153 = vst [vmem:[%s6623_s18 + $0x1c0] sm:$0xff] %v3066_v10  ;;  %v3967_v42 = vpop.f32.mrb[58].mxu1 }
 0x469   : > { %3156 = vst [vmem:[%s6623_s18 + $0x1d8] sm:$0xff] %v3967_v42  ;;  %v3069_v44 = vpop.f32.mrb[59].mxu1 }
 0x46a   : > { %3154 = vst [vmem:[%s6623_s18 + $0x1c8] sm:$0xff] %v3069_v44 }
 0x46e   : > { %v3970_v25 = vpop.f32.mrb[60].mxu1 }
 0x46f   : > { %3159 = vst [vmem:[%s6623_s18 + $0x1f0] sm:$0xff] %v3970_v25  ;;  %v3082_v53 = vpop.f32.mrb[61].mxu1 }
 0x470   : > { %3157 = vst [vmem:[%s6623_s18 + $0x1e0] sm:$0xff] %v3082_v53  ;;  %v3971_v33 = vpop.f32.mrb[62].mxu1 }
 0x471   : > { %3160 = vst [vmem:[%s6623_s18 + $0x1f8] sm:$0xff] %v3971_v33  ;;  %v3085_v35 = vpop.f32.mrb[63].mxu1 }
 0x472   : > { %3158 = vst [vmem:[%s6623_s18 + $0x1e8] sm:$0xff] %v3085_v35 }
 0x473   : > { %4356 = shalt.err (!%p4353_p11)
}
 0x474   : > { %s4357_s9 = scalar_lea.hbm %s6691_s4, 8192  ;;  %s4361_s27 = scalar_lea.hbm %s6743_s3, 16384 }
 0x475   : > { %p4358_p3 = scmp.ne.s32.totalorder %s6691_s4, %s4357_s9  ;;  %p4362_p2 = scmp.lt.u32.totalorder %s6691_s4, %s6743_s3 }
 0x476   : > { %p4363_p4 = scmp.lt.u32.totalorder %s4361_s27, %s4357_s9  ;;  %p4365_p13 = scmp.lt.u32.totalorder %s4357_s9, %s6691_s4 }
 0x477   : > { %p4359_p8 = pnand %p4358_p3, %p7257_p1 }
 0x478   : > { %p4364_p6 = por %p4363_p4, %p4362_p2 }
 0x479   : > { %p4360_p0 = pneg %p4359_p8 }
 0x47a   : > { %p4366_p12 = por %p4365_p13, %p4364_p6 }
 0x47c   : > { %p4367_p10 = pnand %p4366_p12, %p4360_p0 }
 0x47e   : > { %4370 = shalt.err (!%p4367_p10)
}
 0x47f   : > { %s4420_s10 = smov 128   ;;  %s4421_s11 = smov 8  }
 0x480   : > { %3976 = dma.vmem_to_hbm [thread:$0]  (%p7257_p1), %s6693_s5, 8192, %s6691_s4, %s3162_s0, %s4420_s10, %s4420_s10, %s4421_s11  }
 0x481 PF: > { %s3191_s18 = sand.u32 1, %s4401_s14   ;;  %p7258_p5 = scmp.ne.s32.totalorder %s6881_s26, 0 }
 0x482   : > { %p7259_p7 = scmp.ge.s32.totalorder %s4413_s17, 2  ;;  %s3192_s21 = scalar_lea.sflag [#allocation6], %s3191_s18 }
 0x484   : > { %p3986_p9 = pnand %p7259_p7, %p7258_p5 }
 0x486   : > { %4396 = dma.done.wait (!%p3986_p9), %s3192_s21, 8192  }
 0x487   : > { %4398 = vsyncadd (!%p3986_p9), %s3192_s21, 4294959104  ;;  %p20_p11 = scmp.ge.s32.totalorder %s4470_s19, 4   ;;  %s7260_s14 = smov %s4405_s15 }
 0x488   : > { %s7261_s15 = smov %s4409_s16  ;;  %s7262_s16 = smov %s4482_s22 }
 0x489   : > { %s7263_s17 = smov %s4470_s19  ;;  %22 = sbr.rel (!%p20_p11) target bundleno = 9 (0x9), region = 86 }
 0x490   :  { %3197 = vsyncpa [#allocation5], 1 }
 0x491   :  { %3199 = vsyncpa [#allocation5 + $0x1], 1 }
 0x492   :  { %3200 = vsyncpa [#allocation8], 1 }
 0x493   :  { %3202 = vsyncpa [#allocation8 + $0x1], 1 }
 0x494   :  { %3203 = vsyncpa [#allocation6], 1 }
 0x495   :  { %3205 = vsyncpa [#allocation6 + $0x1], 1 }

</bundles_post_ra>
